<compile_context>
chip_gen: v7x
topology: tpu7x:2x2x1
jax: 0.10.0
libtpu: 0.0.40
codegen_flags: <defaults>
</compile_context>

<pallas_src>
import functools

import numpy as np
import jax
import jax.numpy as jnp
from jax.experimental import pallas as pl
from jax.experimental.pallas import tpu as pltpu

EPS = 1e-5


# ----------------------------------------------------------------------------
# Fused kernel (one grid step == one sample)
# ----------------------------------------------------------------------------
def neural_ode_fused_kernel(
    x_ref, wi_ref, bi_ref,
    a1w_ref, a1b_ref, c1w_ref, c1b_ref,
    dsw_ref, dsb_ref,
    a2w_ref, a2b_ref, c2w_ref, c2b_ref,
    w1r_ref, b1_ref, w2_ref, b2_ref,
    o_ref,
    pad_a, cat_a, pad_b, cat_b,
    *, L, CH1, CH2):
  L2 = L // 2
  P = 4  # AdaptiveMaxPool1d output length (L2 == 2 * P)

  # Zero staging buffers once per sample: rows 0 and n+1 stay zero and act as
  # the conv zero-padding (no batch-boundary masks needed: one sample / step).
  pad_a[...] = jnp.zeros_like(pad_a)
  pad_b[...] = jnp.zeros_like(pad_b)

  def conv_a(z, w_ref, b_ref):
    """Conv1d(k=3, pad=1) on (L, CH1): shifted reads + single K=3*CH1 matmul."""
    pad_a[pl.ds(1, L), :] = z
    cat_a[:, 0:CH1] = pad_a[pl.ds(0, L), :]               # x_{l-1}
    cat_a[:, CH1:2 * CH1] = z                             # x_l
    cat_a[:, 2 * CH1:3 * CH1] = pad_a[pl.ds(2, L), :]     # x_{l+1}
    return jnp.dot(cat_a[...].astype(jnp.bfloat16), w_ref[...],
                   preferred_element_type=jnp.float32) + b_ref[...]

  def conv_b(z, w_ref, b_ref):
    """Same, on the downsampled (L2, CH2) activations (K = 3*CH2)."""
    pad_b[pl.ds(1, L2), :] = z
    cat_b[:, 0:CH2] = pad_b[pl.ds(0, L2), :]
    cat_b[:, CH2:2 * CH2] = z
    cat_b[:, 2 * CH2:3 * CH2] = pad_b[pl.ds(2, L2), :]
    return jnp.dot(cat_b[...].astype(jnp.bfloat16), w_ref[...],
                   preferred_element_type=jnp.float32) + b_ref[...]

  def rk4(x0, f):
    # torchdiffeq 'rk4' (3/8-rule), dt = 1; incremental accumulation.
    k1 = f(x0)
    acc = k1
    k2 = f(x0 + k1 * (1.0 / 3.0))
    acc = acc + 3.0 * k2
    k3 = f(x0 + (k2 - k1 * (1.0 / 3.0)))
    acc = acc + 3.0 * k3
    k4 = f(x0 + (k1 - k2 + k3))
    return x0 + (acc + k4) * 0.125

  # ---- initial_conv: Conv1d(1->32,k=3,p=1)+BN+ReLU.  Cin=1 -> VPU broadcasts.
  x = x_ref[0]                                            # (L, 1)
  pad_a[pl.ds(1, L), 0:1] = x
  xm1 = pad_a[pl.ds(0, L), 0:1]
  xp1 = pad_a[pl.ds(2, L), 0:1]
  h = (xm1 * wi_ref[0:1, :] + x * wi_ref[1:2, :] + xp1 * wi_ref[2:3, :]
       + bi_ref[...])
  h = jnp.maximum(h, 0.0)                                 # (L, CH1)

  # ---- ode_block1 (channels = CH1) ----
  def f1(z):
    u = jnp.maximum(conv_a(z, a1w_ref, a1b_ref), 0.0)
    return conv_a(u, c1w_ref, c1b_ref)                    # Dropout == identity
  h = rk4(h, f1)

  # ---- downsample1: Conv1d(32->64, k=3, s=2, p=1)+BN+ReLU ----
  # Decimate BEFORE the weight matmul: build only the even-position rows.
  pad_a[pl.ds(1, L), :] = h
  cat_a[pl.ds(0, L2), 0:CH1] = pad_a[pl.ds(0, L2, stride=2), :]           # x_{2r-1}
  cat_a[pl.ds(0, L2), CH1:2 * CH1] = pad_a[pl.ds(1, L2, stride=2), :]     # x_{2r}
  cat_a[pl.ds(0, L2), 2 * CH1:3 * CH1] = pad_a[pl.ds(2, L2, stride=2), :] # x_{2r+1}
  h = jnp.dot(cat_a[pl.ds(0, L2), :].astype(jnp.bfloat16), dsw_ref[...],
              preferred_element_type=jnp.float32) + dsb_ref[...]
  h = jnp.maximum(h, 0.0)                                 # (L2, CH2)

  # ---- ode_block2 (channels = CH2) ----
  def f2(z):
    u = jnp.maximum(conv_b(z, a2w_ref, a2b_ref), 0.0)
    return conv_b(u, c2w_ref, c2b_ref)
  h = rk4(h, f2)

  # ---- AdaptiveMaxPool1d(4) with Lin == 8: max over adjacent row pairs ----
  pad_b[pl.ds(1, L2), :] = h
  pooled = jnp.maximum(pad_b[pl.ds(1, P, stride=2), :],
                       pad_b[pl.ds(2, P, stride=2), :])   # (P, CH2)

  # ---- flatten (channel-major, folded into permuted fc1 weights) + fc head --
  cat_b[pl.ds(0, P), 0:CH2] = pooled
  acc = b1_ref[...]                                       # (1, 64)
  for p in range(P):
    row = cat_b[pl.ds(p, 1), 0:CH2].astype(jnp.bfloat16)  # (1, CH2)
    acc = acc + jnp.dot(row, w1r_ref[p], preferred_element_type=jnp.float32)
  hfc = jnp.maximum(acc, 0.0)                             # Dropout == identity
  o_ref[0] = jnp.dot(hfc.astype(jnp.bfloat16), w2_ref[...],
                     preferred_element_type=jnp.float32) + b2_ref[...]


# ----------------------------------------------------------------------------
# pallas_call wrapper
# ----------------------------------------------------------------------------
def neural_ode_encoder_forward(x, params):
  (wi, bi, a1w, a1b, c1w, c1b, dsw, dsb,
   a2w, a2b, c2w, c2b, w1r, b1, w2, b2) = params
  B, L = x.shape
  CH1, CH2 = 32, 64
  nc = w2.shape[1]
  L2 = L // 2
  assert L == 16, "kernel assumes input_size == 16 (pool 8 -> 4 is pairwise max)"

  x3 = x.reshape(B, L, 1)

  def cspec(shape):
    nd = len(shape)
    return pl.BlockSpec(shape, lambda b, _nd=nd: (0,) * _nd)

  kernel = functools.partial(neural_ode_fused_kernel, L=L, CH1=CH1, CH2=CH2)
  out = pl.pallas_call(
      kernel,
      out_shape=jax.ShapeDtypeStruct((B, 1, nc), jnp.float32),
      grid=(B,),
      in_specs=[
          pl.BlockSpec((1, L, 1), lambda b: (b, 0, 0)),
          cspec(wi.shape), cspec(bi.shape),
          cspec(a1w.shape), cspec(a1b.shape),
          cspec(c1w.shape), cspec(c1b.shape),
          cspec(dsw.shape), cspec(dsb.shape),
          cspec(a2w.shape), cspec(a2b.shape),
          cspec(c2w.shape), cspec(c2b.shape),
          cspec(w1r.shape), cspec(b1.shape),
          cspec(w2.shape), cspec(b2.shape),
      ],
      out_specs=pl.BlockSpec((1, 1, nc), lambda b: (b, 0, 0)),
      scratch_shapes=[
          pltpu.VMEM((L + 2, CH1), jnp.float32),    # pad_a (zero-guarded rows)
          pltpu.VMEM((L, 3 * CH1), jnp.float32),    # cat_a [x_{l-1}|x_l|x_{l+1}]
          pltpu.VMEM((L2 + 2, CH2), jnp.float32),   # pad_b
          pltpu.VMEM((L2, 3 * CH2), jnp.float32),   # cat_b
      ],
      compiler_params=pltpu.CompilerParams(
          dimension_semantics=("parallel",)),
  )(x3, wi, bi, a1w, a1b, c1w, c1b, dsw, dsb, a2w, a2b, c2w, c2b, w1r, b1, w2, b2)
  return out.reshape(B, nc)


# ----------------------------------------------------------------------------
# Parameter setup (glue): deterministic init + BN-folding + tap stacking
# ----------------------------------------------------------------------------
def init_conv(key, cout, cin, k=3):
  kw, kb = jax.random.split(key)
  w = jax.random.normal(kw, (cout, cin, k), jnp.float32) * 0.1
  b = jax.random.normal(kb, (cout,), jnp.float32) * 0.05
  return w, b


def init_bn(key, c):
  k1, k2, k3, k4 = jax.random.split(key, 4)
  gamma = 1.0 + 0.1 * jax.random.normal(k1, (c,), jnp.float32)
  beta = 0.1 * jax.random.normal(k2, (c,), jnp.float32)
  mean = 0.1 * jax.random.normal(k3, (c,), jnp.float32)
  var = 0.5 + jax.random.uniform(k4, (c,), jnp.float32)
  return gamma, beta, mean, var


def fold_bn_into_conv(w, b, bn):
  """Fold eval-mode BatchNorm into the preceding conv (fp32, exact)."""
  gamma, beta, mean, var = bn
  s = gamma / jnp.sqrt(var + EPS)
  return w * s[:, None, None], (b - mean) * s + beta


def stacked_taps(wf):
  """(Cout, Cin, 3) -> (3*Cin, Cout) bf16: rows = [tap(l-1); tap(l); tap(l+1)]."""
  return jnp.concatenate([jnp.transpose(wf[:, :, k]) for k in range(3)],
                         axis=0).astype(jnp.bfloat16)


# ----------------------------------------------------------------------------
# Pure-JAX reference (PyTorch NCL layout, fp32-exact) for a correctness check
# ----------------------------------------------------------------------------
HI = jax.lax.Precision.HIGHEST


def conv1d_ref(x, w, b, stride=1):
  y = jax.lax.conv_general_dilated(
      x, w, window_strides=(stride,), padding=((1, 1),),
      dimension_numbers=("NCH", "OIH", "NCH"), precision=HI)
  return y + b[None, :, None]


def bn_ref(x, bn):
  gamma, beta, mean, var = bn
  s = gamma / jnp.sqrt(var + EPS)
  return (x - mean[None, :, None]) * s[None, :, None] + beta[None, :, None]


def odefunc_ref(x, c1w, c1b, bn1, c2w, c2b, bn2):
  h = jax.nn.relu(bn_ref(conv1d_ref(x, c1w, c1b), bn1))
  return bn_ref(conv1d_ref(h, c2w, c2b), bn2)


def odeblock_ref(x, c1w, c1b, bn1, c2w, c2b, bn2):
  f = lambda y: odefunc_ref(y, c1w, c1b, bn1, c2w, c2b, bn2)
  k1 = f(x)
  k2 = f(x + k1 / 3.0)
  k3 = f(x + (k2 - k1 / 3.0))
  k4 = f(x + (k1 - k2 + k3))
  return x + (k1 + 3.0 * (k2 + k3) + k4) * 0.125


# ----------------------------------------------------------------------------
if __name__ == "__main__":
  B, L, num_classes = 2, 16, 5

  key = jax.random.PRNGKey(0)
  keys = jax.random.split(key, 17)
  x = jax.random.normal(keys[0], (B, L), jnp.float32)

  ic_w, ic_b = init_conv(keys[1], 32, 1);       ic_bn = init_bn(keys[2], 32)
  o1c1_w, o1c1_b = init_conv(keys[3], 32, 32);  o1bn1 = init_bn(keys[4], 32)
  o1c2_w, o1c2_b = init_conv(keys[5], 32, 32);  o1bn2 = init_bn(keys[6], 32)
  ds_w, ds_b = init_conv(keys[7], 64, 32);      ds_bn = init_bn(keys[8], 64)
  o2c1_w, o2c1_b = init_conv(keys[9], 64, 64);  o2bn1 = init_bn(keys[10], 64)
  o2c2_w, o2c2_b = init_conv(keys[11], 64, 64); o2bn2 = init_bn(keys[12], 64)
  fc1_w = jax.random.normal(keys[13], (64, 256), jnp.float32) * 0.05
  fc1_b = jax.random.normal(keys[14], (64,), jnp.float32) * 0.05
  fc2_w = jax.random.normal(keys[15], (num_classes, 64), jnp.float32) * 0.1
  fc2_b = jax.random.normal(keys[16], (num_classes,), jnp.float32) * 0.05

  # Fold BN into convs + pack weights for the fused kernel (glue).
  wi_f, bi_f = fold_bn_into_conv(ic_w, ic_b, ic_bn)
  wi = jnp.transpose(wi_f[:, 0, :])                    # (3, 32) f32 (VPU path)
  bi = bi_f.reshape(1, -1)
  a1wf, a1bf = fold_bn_into_conv(o1c1_w, o1c1_b, o1bn1)
  c1wf, c1bf = fold_bn_into_conv(o1c2_w, o1c2_b, o1bn2)
  dswf, dsbf = fold_bn_into_conv(ds_w, ds_b, ds_bn)
  a2wf, a2bf = fold_bn_into_conv(o2c1_w, o2c1_b, o2bn1)
  c2wf, c2bf = fold_bn_into_conv(o2c2_w, o2c2_b, o2bn2)
  a1w, a1b = stacked_taps(a1wf), a1bf.reshape(1, -1)   # (96, 32) bf16
  c1w, c1b = stacked_taps(c1wf), c1bf.reshape(1, -1)
  dsw, dsb = stacked_taps(dswf), dsbf.reshape(1, -1)   # (96, 64) bf16
  a2w, a2b = stacked_taps(a2wf), a2bf.reshape(1, -1)   # (192, 64) bf16
  c2w, c2b = stacked_taps(c2wf), c2bf.reshape(1, -1)
  # fc1 weight permuted so flat feature j = c*4+p is consumed as 4 (64,64) blocks
  w1r = fc1_w.T.reshape(64, 4, 64).transpose(1, 0, 2).astype(jnp.bfloat16)
  b1 = fc1_b.reshape(1, -1)
  w2 = fc2_w.T.astype(jnp.bfloat16)                    # (64, num_classes)
  b2 = fc2_b.reshape(1, -1)

  params = (wi, bi, a1w, a1b, c1w, c1b, dsw, dsb,
            a2w, a2b, c2w, c2b, w1r, b1, w2, b2)

  out = jax.jit(neural_ode_encoder_forward)(x, params)
  out = jax.block_until_ready(out)

  # ---------------- reference check (fp32) ----------------
  h = x[:, None, :]                                            # (B, 1, L) NCL
  h = jax.nn.relu(bn_ref(conv1d_ref(h, ic_w, ic_b), ic_bn))
  h = odeblock_ref(h, o1c1_w, o1c1_b, o1bn1, o1c2_w, o1c2_b, o1bn2)
  h = jax.nn.relu(bn_ref(conv1d_ref(h, ds_w, ds_b, stride=2), ds_bn))
  h = odeblock_ref(h, o2c1_w, o2c1_b, o2bn1, o2c2_w, o2c2_b, o2bn2)
  h = h.reshape(B, 64, 4, 2).max(axis=-1)                      # AdaptiveMaxPool1d(4)
  h = h.reshape(B, 64 * 4)
  h = jax.nn.relu(jnp.dot(h, fc1_w.T, precision=HI) + fc1_b)
  ref = jnp.dot(h, fc2_w.T, precision=HI) + fc2_b

  assert out.shape == (B, num_classes)
  if not np.allclose(np.asarray(out), np.asarray(ref), rtol=2e-2, atol=2e-2):
    raise AssertionError(
        f"mismatch: max abs diff = "
        f"{np.max(np.abs(np.asarray(out) - np.asarray(ref)))}")
  print("KERNEL_OK")
</pallas_src>

<mosaic_0001>
module attributes {stable_mosaic.version = 11 : i64} {
  func.func @neural_ode_fused_kernel(%arg0: i32, %arg1: memref<1x16x1xf32, #tpu.memory_space<vmem>>, %arg2: memref<3x32xf32, #tpu.memory_space<vmem>>, %arg3: memref<1x32xf32, #tpu.memory_space<vmem>>, %arg4: memref<96x32xbf16, #tpu.memory_space<vmem>>, %arg5: memref<1x32xf32, #tpu.memory_space<vmem>>, %arg6: memref<96x32xbf16, #tpu.memory_space<vmem>>, %arg7: memref<1x32xf32, #tpu.memory_space<vmem>>, %arg8: memref<96x64xbf16, #tpu.memory_space<vmem>>, %arg9: memref<1x64xf32, #tpu.memory_space<vmem>>, %arg10: memref<192x64xbf16, #tpu.memory_space<vmem>>, %arg11: memref<1x64xf32, #tpu.memory_space<vmem>>, %arg12: memref<192x64xbf16, #tpu.memory_space<vmem>>, %arg13: memref<1x64xf32, #tpu.memory_space<vmem>>, %arg14: memref<4x64x64xbf16, #tpu.memory_space<vmem>>, %arg15: memref<1x64xf32, #tpu.memory_space<vmem>>, %arg16: memref<64x5xbf16, #tpu.memory_space<vmem>>, %arg17: memref<1x5xf32, #tpu.memory_space<vmem>>, %arg18: memref<1x1x5xf32, #tpu.memory_space<vmem>>, %arg19: memref<18x32xf32, #tpu.memory_space<vmem>>, %arg20: memref<16x96xf32, #tpu.memory_space<vmem>>, %arg21: memref<10x64xf32, #tpu.memory_space<vmem>>, %arg22: memref<8x192xf32, #tpu.memory_space<vmem>>) attributes {dimension_semantics = [#tpu.dimension_semantics<parallel>], iteration_bounds = array<i64: 2>, scalar_prefetch = 0 : i64, scratch_operands = 4 : i64, tpu.core_type = #tpu.core_type<tc>, window_params = [{transform_indices = @transform_0, window_bounds = array<i64: 1, 16, 1>}, {pipeline_mode = #tpu.pipeline_mode<synchronous>, transform_indices = @transform_1, window_bounds = array<i64: 3, 32>}, {pipeline_mode = #tpu.pipeline_mode<synchronous>, transform_indices = @transform_2, window_bounds = array<i64: 1, 32>}, {pipeline_mode = #tpu.pipeline_mode<synchronous>, transform_indices = @transform_3, window_bounds = array<i64: 96, 32>}, {pipeline_mode = #tpu.pipeline_mode<synchronous>, transform_indices = @transform_4, window_bounds = array<i64: 1, 32>}, {pipeline_mode = #tpu.pipeline_mode<synchronous>, transform_indices = @transform_5, window_bounds = array<i64: 96, 32>}, {pipeline_mode = #tpu.pipeline_mode<synchronous>, transform_indices = @transform_6, window_bounds = array<i64: 1, 32>}, {pipeline_mode = #tpu.pipeline_mode<synchronous>, transform_indices = @transform_7, window_bounds = array<i64: 96, 64>}, {pipeline_mode = #tpu.pipeline_mode<synchronous>, transform_indices = @transform_8, window_bounds = array<i64: 1, 64>}, {pipeline_mode = #tpu.pipeline_mode<synchronous>, transform_indices = @transform_9, window_bounds = array<i64: 192, 64>}, {pipeline_mode = #tpu.pipeline_mode<synchronous>, transform_indices = @transform_10, window_bounds = array<i64: 1, 64>}, {pipeline_mode = #tpu.pipeline_mode<synchronous>, transform_indices = @transform_11, window_bounds = array<i64: 192, 64>}, {pipeline_mode = #tpu.pipeline_mode<synchronous>, transform_indices = @transform_12, window_bounds = array<i64: 1, 64>}, {pipeline_mode = #tpu.pipeline_mode<synchronous>, transform_indices = @transform_13, window_bounds = array<i64: 4, 64, 64>}, {pipeline_mode = #tpu.pipeline_mode<synchronous>, transform_indices = @transform_14, window_bounds = array<i64: 1, 64>}, {pipeline_mode = #tpu.pipeline_mode<synchronous>, transform_indices = @transform_15, window_bounds = array<i64: 64, 5>}, {pipeline_mode = #tpu.pipeline_mode<synchronous>, transform_indices = @transform_16, window_bounds = array<i64: 1, 5>}, {transform_indices = @transform_17, window_bounds = array<i64: 1, 1, 5>}]} {
    %cst = arith.constant 0.000000e+00 : f32
    %0 = vector.broadcast %cst : f32 to vector<18x32xf32>
    %c0 = arith.constant 0 : index
    %c0_0 = arith.constant 0 : index
    %1 = vector.load %arg19[%c0, %c0_0] : memref<18x32xf32, #tpu.memory_space<vmem>>, vector<18x32xf32>
    tpu.vector_store %arg19[%c0, %c0_0], %0 {strides = array<i32>} : memref<18x32xf32, #tpu.memory_space<vmem>>, vector<18x32xf32>,
    %cst_1 = arith.constant 0.000000e+00 : f32
    %2 = vector.broadcast %cst_1 : f32 to vector<10x64xf32>
    %c0_2 = arith.constant 0 : index
    %c0_3 = arith.constant 0 : index
    %3 = vector.load %arg21[%c0_2, %c0_3] : memref<10x64xf32, #tpu.memory_space<vmem>>, vector<10x64xf32>
    tpu.vector_store %arg21[%c0_2, %c0_3], %2 {strides = array<i32>} : memref<10x64xf32, #tpu.memory_space<vmem>>, vector<10x64xf32>,
    %c0_4 = arith.constant 0 : index
    %c0_5 = arith.constant 0 : index
    %c0_6 = arith.constant 0 : index
    %4 = vector.load %arg1[%c0_4, %c0_5, %c0_6] : memref<1x16x1xf32, #tpu.memory_space<vmem>>, vector<1x16x1xf32>
    %5 = vector.shape_cast %4 : vector<1x16x1xf32> to vector<16x1xf32>
    %c1 = arith.constant 1 : index
    %c0_7 = arith.constant 0 : index
    %6 = vector.load %arg19[%c1, %c0_7] : memref<18x32xf32, #tpu.memory_space<vmem>>, vector<16x1xf32>
    tpu.vector_store %arg19[%c1, %c0_7], %5 {strides = array<i32>} : memref<18x32xf32, #tpu.memory_space<vmem>>, vector<16x1xf32>,
    %c0_8 = arith.constant 0 : index
    %c0_9 = arith.constant 0 : index
    %7 = vector.load %arg19[%c0_8, %c0_9] : memref<18x32xf32, #tpu.memory_space<vmem>>, vector<16x1xf32>
    %c2 = arith.constant 2 : index
    %c0_10 = arith.constant 0 : index
    %8 = vector.load %arg19[%c2, %c0_10] : memref<18x32xf32, #tpu.memory_space<vmem>>, vector<16x1xf32>
    %c0_11 = arith.constant 0 : index
    %c0_12 = arith.constant 0 : index
    %9 = vector.load %arg2[%c0_11, %c0_12] : memref<3x32xf32, #tpu.memory_space<vmem>>, vector<1x32xf32>
    %10 = vector.broadcast %7 : vector<16x1xf32> to vector<16x32xf32>
    %11 = vector.broadcast %9 : vector<1x32xf32> to vector<16x32xf32>
    %12 = arith.mulf %10, %11 : vector<16x32xf32>
    %c1_13 = arith.constant 1 : index
    %c0_14 = arith.constant 0 : index
    %13 = vector.load %arg2[%c1_13, %c0_14] : memref<3x32xf32, #tpu.memory_space<vmem>>, vector<1x32xf32>
    %14 = vector.broadcast %5 : vector<16x1xf32> to vector<16x32xf32>
    %15 = vector.broadcast %13 : vector<1x32xf32> to vector<16x32xf32>
    %16 = arith.mulf %14, %15 : vector<16x32xf32>
    %17 = arith.addf %12, %16 : vector<16x32xf32>
    %c2_15 = arith.constant 2 : index
    %c0_16 = arith.constant 0 : index
    %18 = vector.load %arg2[%c2_15, %c0_16] : memref<3x32xf32, #tpu.memory_space<vmem>>, vector<1x32xf32>
    %19 = vector.broadcast %8 : vector<16x1xf32> to vector<16x32xf32>
    %20 = vector.broadcast %18 : vector<1x32xf32> to vector<16x32xf32>
    %21 = arith.mulf %19, %20 : vector<16x32xf32>
    %22 = arith.addf %17, %21 : vector<16x32xf32>
    %c0_17 = arith.constant 0 : index
    %c0_18 = arith.constant 0 : index
    %23 = vector.load %arg3[%c0_17, %c0_18] : memref<1x32xf32, #tpu.memory_space<vmem>>, vector<1x32xf32>
    %24 = vector.broadcast %23 : vector<1x32xf32> to vector<16x32xf32>
    %25 = arith.addf %22, %24 : vector<16x32xf32>
    %cst_19 = arith.constant 0.000000e+00 : f32
    %26 = vector.broadcast %cst_19 : f32 to vector<16x32xf32>
    %27 = arith.maximumf %25, %26 : vector<16x32xf32>
    %c1_20 = arith.constant 1 : index
    %c0_21 = arith.constant 0 : index
    %28 = vector.load %arg19[%c1_20, %c0_21] : memref<18x32xf32, #tpu.memory_space<vmem>>, vector<16x32xf32>
    tpu.vector_store %arg19[%c1_20, %c0_21], %27 {strides = array<i32>} : memref<18x32xf32, #tpu.memory_space<vmem>>, vector<16x32xf32>,
    %c0_22 = arith.constant 0 : index
    %c0_23 = arith.constant 0 : index
    %29 = vector.load %arg19[%c0_22, %c0_23] : memref<18x32xf32, #tpu.memory_space<vmem>>, vector<16x32xf32>
    %c0_24 = arith.constant 0 : index
    %c0_25 = arith.constant 0 : index
    %30 = vector.load %arg20[%c0_24, %c0_25] : memref<16x96xf32, #tpu.memory_space<vmem>>, vector<16x32xf32>
    tpu.vector_store %arg20[%c0_24, %c0_25], %29 {strides = array<i32>} : memref<16x96xf32, #tpu.memory_space<vmem>>, vector<16x32xf32>,
    %c0_26 = arith.constant 0 : index
    %c32 = arith.constant 32 : index
    %31 = vector.load %arg20[%c0_26, %c32] : memref<16x96xf32, #tpu.memory_space<vmem>>, vector<16x32xf32>
    tpu.vector_store %arg20[%c0_26, %c32], %27 {strides = array<i32>} : memref<16x96xf32, #tpu.memory_space<vmem>>, vector<16x32xf32>,
    %c2_27 = arith.constant 2 : index
    %c0_28 = arith.constant 0 : index
    %32 = vector.load %arg19[%c2_27, %c0_28] : memref<18x32xf32, #tpu.memory_space<vmem>>, vector<16x32xf32>
    %c0_29 = arith.constant 0 : index
    %c64 = arith.constant 64 : index
    %33 = vector.load %arg20[%c0_29, %c64] : memref<16x96xf32, #tpu.memory_space<vmem>>, vector<16x32xf32>
    tpu.vector_store %arg20[%c0_29, %c64], %32 {strides = array<i32>} : memref<16x96xf32, #tpu.memory_space<vmem>>, vector<16x32xf32>,
    %c0_30 = arith.constant 0 : index
    %c0_31 = arith.constant 0 : index
    %34 = vector.load %arg20[%c0_30, %c0_31] : memref<16x96xf32, #tpu.memory_space<vmem>>, vector<16x96xf32>
    %35 = arith.truncf %34 : vector<16x96xf32> to vector<16x96xbf16>
    %c0_32 = arith.constant 0 : index
    %c0_33 = arith.constant 0 : index
    %36 = vector.load %arg4[%c0_32, %c0_33] : memref<96x32xbf16, #tpu.memory_space<vmem>>, vector<96x32xbf16>
    %cst_34 = arith.constant dense<0.000000e+00> : vector<16x32xf32>
    %37 = tpu.matmul %35, %36, %cst_34 {dimension_numbers = #tpu.dot_dimension_numbers<[1], [0], [0], [1], [0, 0, 1, 1], [], []>} : vector<16x96xbf16>, vector<96x32xbf16>, vector<16x32xf32> -> vector<16x32xf32>
    %c0_35 = arith.constant 0 : index
    %c0_36 = arith.constant 0 : index
    %38 = vector.load %arg5[%c0_35, %c0_36] : memref<1x32xf32, #tpu.memory_space<vmem>>, vector<1x32xf32>
    %39 = vector.broadcast %38 : vector<1x32xf32> to vector<16x32xf32>
    %40 = arith.addf %37, %39 : vector<16x32xf32>
    %cst_37 = arith.constant 0.000000e+00 : f32
    %41 = vector.broadcast %cst_37 : f32 to vector<16x32xf32>
    %42 = arith.maximumf %40, %41 : vector<16x32xf32>
    %c1_38 = arith.constant 1 : index
    %c0_39 = arith.constant 0 : index
    %43 = vector.load %arg19[%c1_38, %c0_39] : memref<18x32xf32, #tpu.memory_space<vmem>>, vector<16x32xf32>
    tpu.vector_store %arg19[%c1_38, %c0_39], %42 {strides = array<i32>} : memref<18x32xf32, #tpu.memory_space<vmem>>, vector<16x32xf32>,
    %c0_40 = arith.constant 0 : index
    %c0_41 = arith.constant 0 : index
    %44 = vector.load %arg19[%c0_40, %c0_41] : memref<18x32xf32, #tpu.memory_space<vmem>>, vector<16x32xf32>
    %c0_42 = arith.constant 0 : index
    %c0_43 = arith.constant 0 : index
    %45 = vector.load %arg20[%c0_42, %c0_43] : memref<16x96xf32, #tpu.memory_space<vmem>>, vector<16x32xf32>
    tpu.vector_store %arg20[%c0_42, %c0_43], %44 {strides = array<i32>} : memref<16x96xf32, #tpu.memory_space<vmem>>, vector<16x32xf32>,
    %c0_44 = arith.constant 0 : index
    %c32_45 = arith.constant 32 : index
    %46 = vector.load %arg20[%c0_44, %c32_45] : memref<16x96xf32, #tpu.memory_space<vmem>>, vector<16x32xf32>
    tpu.vector_store %arg20[%c0_44, %c32_45], %42 {strides = array<i32>} : memref<16x96xf32, #tpu.memory_space<vmem>>, vector<16x32xf32>,
    %c2_46 = arith.constant 2 : index
    %c0_47 = arith.constant 0 : index
    %47 = vector.load %arg19[%c2_46, %c0_47] : memref<18x32xf32, #tpu.memory_space<vmem>>, vector<16x32xf32>
    %c0_48 = arith.constant 0 : index
    %c64_49 = arith.constant 64 : index
    %48 = vector.load %arg20[%c0_48, %c64_49] : memref<16x96xf32, #tpu.memory_space<vmem>>, vector<16x32xf32>
    tpu.vector_store %arg20[%c0_48, %c64_49], %47 {strides = array<i32>} : memref<16x96xf32, #tpu.memory_space<vmem>>, vector<16x32xf32>,
    %c0_50 = arith.constant 0 : index
    %c0_51 = arith.constant 0 : index
    %49 = vector.load %arg20[%c0_50, %c0_51] : memref<16x96xf32, #tpu.memory_space<vmem>>, vector<16x96xf32>
    %50 = arith.truncf %49 : vector<16x96xf32> to vector<16x96xbf16>
    %c0_52 = arith.constant 0 : index
    %c0_53 = arith.constant 0 : index
    %51 = vector.load %arg6[%c0_52, %c0_53] : memref<96x32xbf16, #tpu.memory_space<vmem>>, vector<96x32xbf16>
    %cst_54 = arith.constant dense<0.000000e+00> : vector<16x32xf32>
    %52 = tpu.matmul %50, %51, %cst_54 {dimension_numbers = #tpu.dot_dimension_numbers<[1], [0], [0], [1], [0, 0, 1, 1], [], []>} : vector<16x96xbf16>, vector<96x32xbf16>, vector<16x32xf32> -> vector<16x32xf32>
    %c0_55 = arith.constant 0 : index
    %c0_56 = arith.constant 0 : index
    %53 = vector.load %arg7[%c0_55, %c0_56] : memref<1x32xf32, #tpu.memory_space<vmem>>, vector<1x32xf32>
    %54 = vector.broadcast %53 : vector<1x32xf32> to vector<16x32xf32>
    %55 = arith.addf %52, %54 : vector<16x32xf32>
    %cst_57 = arith.constant 0.333333343 : f32
    %56 = vector.broadcast %cst_57 : f32 to vector<16x32xf32>
    %57 = arith.mulf %55, %56 : vector<16x32xf32>
    %58 = arith.addf %27, %57 : vector<16x32xf32>
    %c1_58 = arith.constant 1 : index
    %c0_59 = arith.constant 0 : index
    %59 = vector.load %arg19[%c1_58, %c0_59] : memref<18x32xf32, #tpu.memory_space<vmem>>, vector<16x32xf32>
    tpu.vector_store %arg19[%c1_58, %c0_59], %58 {strides = array<i32>} : memref<18x32xf32, #tpu.memory_space<vmem>>, vector<16x32xf32>,
    %c0_60 = arith.constant 0 : index
    %c0_61 = arith.constant 0 : index
    %60 = vector.load %arg19[%c0_60, %c0_61] : memref<18x32xf32, #tpu.memory_space<vmem>>, vector<16x32xf32>
    %c0_62 = arith.constant 0 : index
    %c0_63 = arith.constant 0 : index
    %61 = vector.load %arg20[%c0_62, %c0_63] : memref<16x96xf32, #tpu.memory_space<vmem>>, vector<16x32xf32>
    tpu.vector_store %arg20[%c0_62, %c0_63], %60 {strides = array<i32>} : memref<16x96xf32, #tpu.memory_space<vmem>>, vector<16x32xf32>,
    %c0_64 = arith.constant 0 : index
    %c32_65 = arith.constant 32 : index
    %62 = vector.load %arg20[%c0_64, %c32_65] : memref<16x96xf32, #tpu.memory_space<vmem>>, vector<16x32xf32>
    tpu.vector_store %arg20[%c0_64, %c32_65], %58 {strides = array<i32>} : memref<16x96xf32, #tpu.memory_space<vmem>>, vector<16x32xf32>,
    %c2_66 = arith.constant 2 : index
    %c0_67 = arith.constant 0 : index
    %63 = vector.load %arg19[%c2_66, %c0_67] : memref<18x32xf32, #tpu.memory_space<vmem>>, vector<16x32xf32>
    %c0_68 = arith.constant 0 : index
    %c64_69 = arith.constant 64 : index
    %64 = vector.load %arg20[%c0_68, %c64_69] : memref<16x96xf32, #tpu.memory_space<vmem>>, vector<16x32xf32>
    tpu.vector_store %arg20[%c0_68, %c64_69], %63 {strides = array<i32>} : memref<16x96xf32, #tpu.memory_space<vmem>>, vector<16x32xf32>,
    %c0_70 = arith.constant 0 : index
    %c0_71 = arith.constant 0 : index
    %65 = vector.load %arg20[%c0_70, %c0_71] : memref<16x96xf32, #tpu.memory_space<vmem>>, vector<16x96xf32>
    %66 = arith.truncf %65 : vector<16x96xf32> to vector<16x96xbf16>
    %c0_72 = arith.constant 0 : index
    %c0_73 = arith.constant 0 : index
    %67 = vector.load %arg4[%c0_72, %c0_73] : memref<96x32xbf16, #tpu.memory_space<vmem>>, vector<96x32xbf16>
    %cst_74 = arith.constant dense<0.000000e+00> : vector<16x32xf32>
    %68 = tpu.matmul %66, %67, %cst_74 {dimension_numbers = #tpu.dot_dimension_numbers<[1], [0], [0], [1], [0, 0, 1, 1], [], []>} : vector<16x96xbf16>, vector<96x32xbf16>, vector<16x32xf32> -> vector<16x32xf32>
    %c0_75 = arith.constant 0 : index
    %c0_76 = arith.constant 0 : index
    %69 = vector.load %arg5[%c0_75, %c0_76] : memref<1x32xf32, #tpu.memory_space<vmem>>, vector<1x32xf32>
    %70 = vector.broadcast %69 : vector<1x32xf32> to vector<16x32xf32>
    %71 = arith.addf %68, %70 : vector<16x32xf32>
    %cst_77 = arith.constant 0.000000e+00 : f32
    %72 = vector.broadcast %cst_77 : f32 to vector<16x32xf32>
    %73 = arith.maximumf %71, %72 : vector<16x32xf32>
    %c1_78 = arith.constant 1 : index
    %c0_79 = arith.constant 0 : index
    %74 = vector.load %arg19[%c1_78, %c0_79] : memref<18x32xf32, #tpu.memory_space<vmem>>, vector<16x32xf32>
    tpu.vector_store %arg19[%c1_78, %c0_79], %73 {strides = array<i32>} : memref<18x32xf32, #tpu.memory_space<vmem>>, vector<16x32xf32>,
    %c0_80 = arith.constant 0 : index
    %c0_81 = arith.constant 0 : index
    %75 = vector.load %arg19[%c0_80, %c0_81] : memref<18x32xf32, #tpu.memory_space<vmem>>, vector<16x32xf32>
    %c0_82 = arith.constant 0 : index
    %c0_83 = arith.constant 0 : index
    %76 = vector.load %arg20[%c0_82, %c0_83] : memref<16x96xf32, #tpu.memory_space<vmem>>, vector<16x32xf32>
    tpu.vector_store %arg20[%c0_82, %c0_83], %75 {strides = array<i32>} : memref<16x96xf32, #tpu.memory_space<vmem>>, vector<16x32xf32>,
    %c0_84 = arith.constant 0 : index
    %c32_85 = arith.constant 32 : index
    %77 = vector.load %arg20[%c0_84, %c32_85] : memref<16x96xf32, #tpu.memory_space<vmem>>, vector<16x32xf32>
    tpu.vector_store %arg20[%c0_84, %c32_85], %73 {strides = array<i32>} : memref<16x96xf32, #tpu.memory_space<vmem>>, vector<16x32xf32>,
    %c2_86 = arith.constant 2 : index
    %c0_87 = arith.constant 0 : index
    %78 = vector.load %arg19[%c2_86, %c0_87] : memref<18x32xf32, #tpu.memory_space<vmem>>, vector<16x32xf32>
    %c0_88 = arith.constant 0 : index
    %c64_89 = arith.constant 64 : index
    %79 = vector.load %arg20[%c0_88, %c64_89] : memref<16x96xf32, #tpu.memory_space<vmem>>, vector<16x32xf32>
    tpu.vector_store %arg20[%c0_88, %c64_89], %78 {strides = array<i32>} : memref<16x96xf32, #tpu.memory_space<vmem>>, vector<16x32xf32>,
    %c0_90 = arith.constant 0 : index
    %c0_91 = arith.constant 0 : index
    %80 = vector.load %arg20[%c0_90, %c0_91] : memref<16x96xf32, #tpu.memory_space<vmem>>, vector<16x96xf32>
    %81 = arith.truncf %80 : vector<16x96xf32> to vector<16x96xbf16>
    %c0_92 = arith.constant 0 : index
    %c0_93 = arith.constant 0 : index
    %82 = vector.load %arg6[%c0_92, %c0_93] : memref<96x32xbf16, #tpu.memory_space<vmem>>, vector<96x32xbf16>
    %cst_94 = arith.constant dense<0.000000e+00> : vector<16x32xf32>
    %83 = tpu.matmul %81, %82, %cst_94 {dimension_numbers = #tpu.dot_dimension_numbers<[1], [0], [0], [1], [0, 0, 1, 1], [], []>} : vector<16x96xbf16>, vector<96x32xbf16>, vector<16x32xf32> -> vector<16x32xf32>
    %c0_95 = arith.constant 0 : index
    %c0_96 = arith.constant 0 : index
    %84 = vector.load %arg7[%c0_95, %c0_96] : memref<1x32xf32, #tpu.memory_space<vmem>>, vector<1x32xf32>
    %85 = vector.broadcast %84 : vector<1x32xf32> to vector<16x32xf32>
    %86 = arith.addf %83, %85 : vector<16x32xf32>
    %cst_97 = arith.constant 3.000000e+00 : f32
    %87 = vector.broadcast %cst_97 : f32 to vector<16x32xf32>
    %88 = arith.mulf %87, %86 : vector<16x32xf32>
    %89 = arith.addf %55, %88 : vector<16x32xf32>
    %cst_98 = arith.constant 0.333333343 : f32
    %90 = vector.broadcast %cst_98 : f32 to vector<16x32xf32>
    %91 = arith.mulf %55, %90 : vector<16x32xf32>
    %92 = arith.subf %86, %91 : vector<16x32xf32>
    %93 = arith.addf %27, %92 : vector<16x32xf32>
    %c1_99 = arith.constant 1 : index
    %c0_100 = arith.constant 0 : index
    %94 = vector.load %arg19[%c1_99, %c0_100] : memref<18x32xf32, #tpu.memory_space<vmem>>, vector<16x32xf32>
    tpu.vector_store %arg19[%c1_99, %c0_100], %93 {strides = array<i32>} : memref<18x32xf32, #tpu.memory_space<vmem>>, vector<16x32xf32>,
    %c0_101 = arith.constant 0 : index
    %c0_102 = arith.constant 0 : index
    %95 = vector.load %arg19[%c0_101, %c0_102] : memref<18x32xf32, #tpu.memory_space<vmem>>, vector<16x32xf32>
    %c0_103 = arith.constant 0 : index
    %c0_104 = arith.constant 0 : index
    %96 = vector.load %arg20[%c0_103, %c0_104] : memref<16x96xf32, #tpu.memory_space<vmem>>, vector<16x32xf32>
    tpu.vector_store %arg20[%c0_103, %c0_104], %95 {strides = array<i32>} : memref<16x96xf32, #tpu.memory_space<vmem>>, vector<16x32xf32>,
    %c0_105 = arith.constant 0 : index
    %c32_106 = arith.constant 32 : index
    %97 = vector.load %arg20[%c0_105, %c32_106] : memref<16x96xf32, #tpu.memory_space<vmem>>, vector<16x32xf32>
    tpu.vector_store %arg20[%c0_105, %c32_106], %93 {strides = array<i32>} : memref<16x96xf32, #tpu.memory_space<vmem>>, vector<16x32xf32>,
    %c2_107 = arith.constant 2 : index
    %c0_108 = arith.constant 0 : index
    %98 = vector.load %arg19[%c2_107, %c0_108] : memref<18x32xf32, #tpu.memory_space<vmem>>, vector<16x32xf32>
    %c0_109 = arith.constant 0 : index
    %c64_110 = arith.constant 64 : index
    %99 = vector.load %arg20[%c0_109, %c64_110] : memref<16x96xf32, #tpu.memory_space<vmem>>, vector<16x32xf32>
    tpu.vector_store %arg20[%c0_109, %c64_110], %98 {strides = array<i32>} : memref<16x96xf32, #tpu.memory_space<vmem>>, vector<16x32xf32>,
    %c0_111 = arith.constant 0 : index
    %c0_112 = arith.constant 0 : index
    %100 = vector.load %arg20[%c0_111, %c0_112] : memref<16x96xf32, #tpu.memory_space<vmem>>, vector<16x96xf32>
    %101 = arith.truncf %100 : vector<16x96xf32> to vector<16x96xbf16>
    %c0_113 = arith.constant 0 : index
    %c0_114 = arith.constant 0 : index
    %102 = vector.load %arg4[%c0_113, %c0_114] : memref<96x32xbf16, #tpu.memory_space<vmem>>, vector<96x32xbf16>
    %cst_115 = arith.constant dense<0.000000e+00> : vector<16x32xf32>
    %103 = tpu.matmul %101, %102, %cst_115 {dimension_numbers = #tpu.dot_dimension_numbers<[1], [0], [0], [1], [0, 0, 1, 1], [], []>} : vector<16x96xbf16>, vector<96x32xbf16>, vector<16x32xf32> -> vector<16x32xf32>
    %c0_116 = arith.constant 0 : index
    %c0_117 = arith.constant 0 : index
    %104 = vector.load %arg5[%c0_116, %c0_117] : memref<1x32xf32, #tpu.memory_space<vmem>>, vector<1x32xf32>
    %105 = vector.broadcast %104 : vector<1x32xf32> to vector<16x32xf32>
    %106 = arith.addf %103, %105 : vector<16x32xf32>
    %cst_118 = arith.constant 0.000000e+00 : f32
    %107 = vector.broadcast %cst_118 : f32 to vector<16x32xf32>
    %108 = arith.maximumf %106, %107 : vector<16x32xf32>
    %c1_119 = arith.constant 1 : index
    %c0_120 = arith.constant 0 : index
    %109 = vector.load %arg19[%c1_119, %c0_120] : memref<18x32xf32, #tpu.memory_space<vmem>>, vector<16x32xf32>
    tpu.vector_store %arg19[%c1_119, %c0_120], %108 {strides = array<i32>} : memref<18x32xf32, #tpu.memory_space<vmem>>, vector<16x32xf32>,
    %c0_121 = arith.constant 0 : index
    %c0_122 = arith.constant 0 : index
    %110 = vector.load %arg19[%c0_121, %c0_122] : memref<18x32xf32, #tpu.memory_space<vmem>>, vector<16x32xf32>
    %c0_123 = arith.constant 0 : index
    %c0_124 = arith.constant 0 : index
    %111 = vector.load %arg20[%c0_123, %c0_124] : memref<16x96xf32, #tpu.memory_space<vmem>>, vector<16x32xf32>
    tpu.vector_store %arg20[%c0_123, %c0_124], %110 {strides = array<i32>} : memref<16x96xf32, #tpu.memory_space<vmem>>, vector<16x32xf32>,
    %c0_125 = arith.constant 0 : index
    %c32_126 = arith.constant 32 : index
    %112 = vector.load %arg20[%c0_125, %c32_126] : memref<16x96xf32, #tpu.memory_space<vmem>>, vector<16x32xf32>
    tpu.vector_store %arg20[%c0_125, %c32_126], %108 {strides = array<i32>} : memref<16x96xf32, #tpu.memory_space<vmem>>, vector<16x32xf32>,
    %c2_127 = arith.constant 2 : index
    %c0_128 = arith.constant 0 : index
    %113 = vector.load %arg19[%c2_127, %c0_128] : memref<18x32xf32, #tpu.memory_space<vmem>>, vector<16x32xf32>
    %c0_129 = arith.constant 0 : index
    %c64_130 = arith.constant 64 : index
    %114 = vector.load %arg20[%c0_129, %c64_130] : memref<16x96xf32, #tpu.memory_space<vmem>>, vector<16x32xf32>
    tpu.vector_store %arg20[%c0_129, %c64_130], %113 {strides = array<i32>} : memref<16x96xf32, #tpu.memory_space<vmem>>, vector<16x32xf32>,
    %c0_131 = arith.constant 0 : index
    %c0_132 = arith.constant 0 : index
    %115 = vector.load %arg20[%c0_131, %c0_132] : memref<16x96xf32, #tpu.memory_space<vmem>>, vector<16x96xf32>
    %116 = arith.truncf %115 : vector<16x96xf32> to vector<16x96xbf16>
    %c0_133 = arith.constant 0 : index
    %c0_134 = arith.constant 0 : index
    %117 = vector.load %arg6[%c0_133, %c0_134] : memref<96x32xbf16, #tpu.memory_space<vmem>>, vector<96x32xbf16>
    %cst_135 = arith.constant dense<0.000000e+00> : vector<16x32xf32>
    %118 = tpu.matmul %116, %117, %cst_135 {dimension_numbers = #tpu.dot_dimension_numbers<[1], [0], [0], [1], [0, 0, 1, 1], [], []>} : vector<16x96xbf16>, vector<96x32xbf16>, vector<16x32xf32> -> vector<16x32xf32>
    %c0_136 = arith.constant 0 : index
    %c0_137 = arith.constant 0 : index
    %119 = vector.load %arg7[%c0_136, %c0_137] : memref<1x32xf32, #tpu.memory_space<vmem>>, vector<1x32xf32>
    %120 = vector.broadcast %119 : vector<1x32xf32> to vector<16x32xf32>
    %121 = arith.addf %118, %120 : vector<16x32xf32>
    %cst_138 = arith.constant 3.000000e+00 : f32
    %122 = vector.broadcast %cst_138 : f32 to vector<16x32xf32>
    %123 = arith.mulf %122, %121 : vector<16x32xf32>
    %124 = arith.addf %89, %123 : vector<16x32xf32>
    %125 = arith.subf %55, %86 : vector<16x32xf32>
    %126 = arith.addf %125, %121 : vector<16x32xf32>
    %127 = arith.addf %27, %126 : vector<16x32xf32>
    %c1_139 = arith.constant 1 : index
    %c0_140 = arith.constant 0 : index
    %128 = vector.load %arg19[%c1_139, %c0_140] : memref<18x32xf32, #tpu.memory_space<vmem>>, vector<16x32xf32>
    tpu.vector_store %arg19[%c1_139, %c0_140], %127 {strides = array<i32>} : memref<18x32xf32, #tpu.memory_space<vmem>>, vector<16x32xf32>,
    %c0_141 = arith.constant 0 : index
    %c0_142 = arith.constant 0 : index
    %129 = vector.load %arg19[%c0_141, %c0_142] : memref<18x32xf32, #tpu.memory_space<vmem>>, vector<16x32xf32>
    %c0_143 = arith.constant 0 : index
    %c0_144 = arith.constant 0 : index
    %130 = vector.load %arg20[%c0_143, %c0_144] : memref<16x96xf32, #tpu.memory_space<vmem>>, vector<16x32xf32>
    tpu.vector_store %arg20[%c0_143, %c0_144], %129 {strides = array<i32>} : memref<16x96xf32, #tpu.memory_space<vmem>>, vector<16x32xf32>,
    %c0_145 = arith.constant 0 : index
    %c32_146 = arith.constant 32 : index
    %131 = vector.load %arg20[%c0_145, %c32_146] : memref<16x96xf32, #tpu.memory_space<vmem>>, vector<16x32xf32>
    tpu.vector_store %arg20[%c0_145, %c32_146], %127 {strides = array<i32>} : memref<16x96xf32, #tpu.memory_space<vmem>>, vector<16x32xf32>,
    %c2_147 = arith.constant 2 : index
    %c0_148 = arith.constant 0 : index
    %132 = vector.load %arg19[%c2_147, %c0_148] : memref<18x32xf32, #tpu.memory_space<vmem>>, vector<16x32xf32>
    %c0_149 = arith.constant 0 : index
    %c64_150 = arith.constant 64 : index
    %133 = vector.load %arg20[%c0_149, %c64_150] : memref<16x96xf32, #tpu.memory_space<vmem>>, vector<16x32xf32>
    tpu.vector_store %arg20[%c0_149, %c64_150], %132 {strides = array<i32>} : memref<16x96xf32, #tpu.memory_space<vmem>>, vector<16x32xf32>,
    %c0_151 = arith.constant 0 : index
    %c0_152 = arith.constant 0 : index
    %134 = vector.load %arg20[%c0_151, %c0_152] : memref<16x96xf32, #tpu.memory_space<vmem>>, vector<16x96xf32>
    %135 = arith.truncf %134 : vector<16x96xf32> to vector<16x96xbf16>
    %c0_153 = arith.constant 0 : index
    %c0_154 = arith.constant 0 : index
    %136 = vector.load %arg4[%c0_153, %c0_154] : memref<96x32xbf16, #tpu.memory_space<vmem>>, vector<96x32xbf16>
    %cst_155 = arith.constant dense<0.000000e+00> : vector<16x32xf32>
    %137 = tpu.matmul %135, %136, %cst_155 {dimension_numbers = #tpu.dot_dimension_numbers<[1], [0], [0], [1], [0, 0, 1, 1], [], []>} : vector<16x96xbf16>, vector<96x32xbf16>, vector<16x32xf32> -> vector<16x32xf32>
    %c0_156 = arith.constant 0 : index
    %c0_157 = arith.constant 0 : index
    %138 = vector.load %arg5[%c0_156, %c0_157] : memref<1x32xf32, #tpu.memory_space<vmem>>, vector<1x32xf32>
    %139 = vector.broadcast %138 : vector<1x32xf32> to vector<16x32xf32>
    %140 = arith.addf %137, %139 : vector<16x32xf32>
    %cst_158 = arith.constant 0.000000e+00 : f32
    %141 = vector.broadcast %cst_158 : f32 to vector<16x32xf32>
    %142 = arith.maximumf %140, %141 : vector<16x32xf32>
    %c1_159 = arith.constant 1 : index
    %c0_160 = arith.constant 0 : index
    %143 = vector.load %arg19[%c1_159, %c0_160] : memref<18x32xf32, #tpu.memory_space<vmem>>, vector<16x32xf32>
    tpu.vector_store %arg19[%c1_159, %c0_160], %142 {strides = array<i32>} : memref<18x32xf32, #tpu.memory_space<vmem>>, vector<16x32xf32>,
    %c0_161 = arith.constant 0 : index
    %c0_162 = arith.constant 0 : index
    %144 = vector.load %arg19[%c0_161, %c0_162] : memref<18x32xf32, #tpu.memory_space<vmem>>, vector<16x32xf32>
    %c0_163 = arith.constant 0 : index
    %c0_164 = arith.constant 0 : index
    %145 = vector.load %arg20[%c0_163, %c0_164] : memref<16x96xf32, #tpu.memory_space<vmem>>, vector<16x32xf32>
    tpu.vector_store %arg20[%c0_163, %c0_164], %144 {strides = array<i32>} : memref<16x96xf32, #tpu.memory_space<vmem>>, vector<16x32xf32>,
    %c0_165 = arith.constant 0 : index
    %c32_166 = arith.constant 32 : index
    %146 = vector.load %arg20[%c0_165, %c32_166] : memref<16x96xf32, #tpu.memory_space<vmem>>, vector<16x32xf32>
    tpu.vector_store %arg20[%c0_165, %c32_166], %142 {strides = array<i32>} : memref<16x96xf32, #tpu.memory_space<vmem>>, vector<16x32xf32>,
    %c2_167 = arith.constant 2 : index
    %c0_168 = arith.constant 0 : index
    %147 = vector.load %arg19[%c2_167, %c0_168] : memref<18x32xf32, #tpu.memory_space<vmem>>, vector<16x32xf32>
    %c0_169 = arith.constant 0 : index
    %c64_170 = arith.constant 64 : index
    %148 = vector.load %arg20[%c0_169, %c64_170] : memref<16x96xf32, #tpu.memory_space<vmem>>, vector<16x32xf32>
    tpu.vector_store %arg20[%c0_169, %c64_170], %147 {strides = array<i32>} : memref<16x96xf32, #tpu.memory_space<vmem>>, vector<16x32xf32>,
    %c0_171 = arith.constant 0 : index
    %c0_172 = arith.constant 0 : index
    %149 = vector.load %arg20[%c0_171, %c0_172] : memref<16x96xf32, #tpu.memory_space<vmem>>, vector<16x96xf32>
    %150 = arith.truncf %149 : vector<16x96xf32> to vector<16x96xbf16>
    %c0_173 = arith.constant 0 : index
    %c0_174 = arith.constant 0 : index
    %151 = vector.load %arg6[%c0_173, %c0_174] : memref<96x32xbf16, #tpu.memory_space<vmem>>, vector<96x32xbf16>
    %cst_175 = arith.constant dense<0.000000e+00> : vector<16x32xf32>
    %152 = tpu.matmul %150, %151, %cst_175 {dimension_numbers = #tpu.dot_dimension_numbers<[1], [0], [0], [1], [0, 0, 1, 1], [], []>} : vector<16x96xbf16>, vector<96x32xbf16>, vector<16x32xf32> -> vector<16x32xf32>
    %c0_176 = arith.constant 0 : index
    %c0_177 = arith.constant 0 : index
    %153 = vector.load %arg7[%c0_176, %c0_177] : memref<1x32xf32, #tpu.memory_space<vmem>>, vector<1x32xf32>
    %154 = vector.broadcast %153 : vector<1x32xf32> to vector<16x32xf32>
    %155 = arith.addf %152, %154 : vector<16x32xf32>
    %156 = arith.addf %124, %155 : vector<16x32xf32>
    %cst_178 = arith.constant 1.250000e-01 : f32
    %157 = vector.broadcast %cst_178 : f32 to vector<16x32xf32>
    %158 = arith.mulf %156, %157 : vector<16x32xf32>
    %159 = arith.addf %27, %158 : vector<16x32xf32>
    %c1_179 = arith.constant 1 : index
    %c0_180 = arith.constant 0 : index
    %160 = vector.load %arg19[%c1_179, %c0_180] : memref<18x32xf32, #tpu.memory_space<vmem>>, vector<16x32xf32>
    tpu.vector_store %arg19[%c1_179, %c0_180], %159 {strides = array<i32>} : memref<18x32xf32, #tpu.memory_space<vmem>>, vector<16x32xf32>,
    %c0_181 = arith.constant 0 : index
    %c0_182 = arith.constant 0 : index
    %161 = tpu.strided_load %arg19[%c0_181, %c0_182] {strides = array<i32: 2, 1>} : memref<18x32xf32, #tpu.memory_space<vmem>>, vector<8x32xf32>
    %c0_183 = arith.constant 0 : index
    %c0_184 = arith.constant 0 : index
    %162 = vector.load %arg20[%c0_183, %c0_184] : memref<16x96xf32, #tpu.memory_space<vmem>>, vector<8x32xf32>
    tpu.vector_store %arg20[%c0_183, %c0_184], %161 {strides = array<i32>} : memref<16x96xf32, #tpu.memory_space<vmem>>, vector<8x32xf32>,
    %c1_185 = arith.constant 1 : index
    %c0_186 = arith.constant 0 : index
    %163 = tpu.strided_load %arg19[%c1_185, %c0_186] {strides = array<i32: 2, 1>} : memref<18x32xf32, #tpu.memory_space<vmem>>, vector<8x32xf32>
    %c0_187 = arith.constant 0 : index
    %c32_188 = arith.constant 32 : index
    %164 = vector.load %arg20[%c0_187, %c32_188] : memref<16x96xf32, #tpu.memory_space<vmem>>, vector<8x32xf32>
    tpu.vector_store %arg20[%c0_187, %c32_188], %163 {strides = array<i32>} : memref<16x96xf32, #tpu.memory_space<vmem>>, vector<8x32xf32>,
    %c2_189 = arith.constant 2 : index
    %c0_190 = arith.constant 0 : index
    %165 = tpu.strided_load %arg19[%c2_189, %c0_190] {strides = array<i32: 2, 1>} : memref<18x32xf32, #tpu.memory_space<vmem>>, vector<8x32xf32>
    %c0_191 = arith.constant 0 : index
    %c64_192 = arith.constant 64 : index
    %166 = vector.load %arg20[%c0_191, %c64_192] : memref<16x96xf32, #tpu.memory_space<vmem>>, vector<8x32xf32>
    tpu.vector_store %arg20[%c0_191, %c64_192], %165 {strides = array<i32>} : memref<16x96xf32, #tpu.memory_space<vmem>>, vector<8x32xf32>,
    %c0_193 = arith.constant 0 : index
    %c0_194 = arith.constant 0 : index
    %167 = vector.load %arg20[%c0_193, %c0_194] : memref<16x96xf32, #tpu.memory_space<vmem>>, vector<8x96xf32>
    %168 = arith.truncf %167 : vector<8x96xf32> to vector<8x96xbf16>
    %c0_195 = arith.constant 0 : index
    %c0_196 = arith.constant 0 : index
    %169 = vector.load %arg8[%c0_195, %c0_196] : memref<96x64xbf16, #tpu.memory_space<vmem>>, vector<96x64xbf16>
    %cst_197 = arith.constant dense<0.000000e+00> : vector<8x64xf32>
    %170 = tpu.matmul %168, %169, %cst_197 {dimension_numbers = #tpu.dot_dimension_numbers<[1], [0], [0], [1], [0, 0, 1, 1], [], []>} : vector<8x96xbf16>, vector<96x64xbf16>, vector<8x64xf32> -> vector<8x64xf32>
    %c0_198 = arith.constant 0 : index
    %c0_199 = arith.constant 0 : index
    %171 = vector.load %arg9[%c0_198, %c0_199] : memref<1x64xf32, #tpu.memory_space<vmem>>, vector<1x64xf32>
    %172 = vector.broadcast %171 : vector<1x64xf32> to vector<8x64xf32>
    %173 = arith.addf %170, %172 : vector<8x64xf32>
    %cst_200 = arith.constant 0.000000e+00 : f32
    %174 = vector.broadcast %cst_200 : f32 to vector<8x64xf32>
    %175 = arith.maximumf %173, %174 : vector<8x64xf32>
    %c1_201 = arith.constant 1 : index
    %c0_202 = arith.constant 0 : index
    %176 = vector.load %arg21[%c1_201, %c0_202] : memref<10x64xf32, #tpu.memory_space<vmem>>, vector<8x64xf32>
    tpu.vector_store %arg21[%c1_201, %c0_202], %175 {strides = array<i32>} : memref<10x64xf32, #tpu.memory_space<vmem>>, vector<8x64xf32>,
    %c0_203 = arith.constant 0 : index
    %c0_204 = arith.constant 0 : index
    %177 = vector.load %arg21[%c0_203, %c0_204] : memref<10x64xf32, #tpu.memory_space<vmem>>, vector<8x64xf32>
    %c0_205 = arith.constant 0 : index
    %c0_206 = arith.constant 0 : index
    %178 = vector.load %arg22[%c0_205, %c0_206] : memref<8x192xf32, #tpu.memory_space<vmem>>, vector<8x64xf32>
    tpu.vector_store %arg22[%c0_205, %c0_206], %177 {strides = array<i32>} : memref<8x192xf32, #tpu.memory_space<vmem>>, vector<8x64xf32>,
    %c0_207 = arith.constant 0 : index
    %c64_208 = arith.constant 64 : index
    %179 = vector.load %arg22[%c0_207, %c64_208] : memref<8x192xf32, #tpu.memory_space<vmem>>, vector<8x64xf32>
    tpu.vector_store %arg22[%c0_207, %c64_208], %175 {strides = array<i32>} : memref<8x192xf32, #tpu.memory_space<vmem>>, vector<8x64xf32>,
    %c2_209 = arith.constant 2 : index
    %c0_210 = arith.constant 0 : index
    %180 = vector.load %arg21[%c2_209, %c0_210] : memref<10x64xf32, #tpu.memory_space<vmem>>, vector<8x64xf32>
    %c0_211 = arith.constant 0 : index
    %c128 = arith.constant 128 : index
    %181 = vector.load %arg22[%c0_211, %c128] : memref<8x192xf32, #tpu.memory_space<vmem>>, vector<8x64xf32>
    tpu.vector_store %arg22[%c0_211, %c128], %180 {strides = array<i32>} : memref<8x192xf32, #tpu.memory_space<vmem>>, vector<8x64xf32>,
    %c0_212 = arith.constant 0 : index
    %c0_213 = arith.constant 0 : index
    %182 = vector.load %arg22[%c0_212, %c0_213] : memref<8x192xf32, #tpu.memory_space<vmem>>, vector<8x192xf32>
    %183 = arith.truncf %182 : vector<8x192xf32> to vector<8x192xbf16>
    %c0_214 = arith.constant 0 : index
    %c0_215 = arith.constant 0 : index
    %184 = vector.load %arg10[%c0_214, %c0_215] : memref<192x64xbf16, #tpu.memory_space<vmem>>, vector<192x64xbf16>
    %cst_216 = arith.constant dense<0.000000e+00> : vector<8x64xf32>
    %185 = tpu.matmul %183, %184, %cst_216 {dimension_numbers = #tpu.dot_dimension_numbers<[1], [0], [0], [1], [0, 0, 1, 1], [], []>} : vector<8x192xbf16>, vector<192x64xbf16>, vector<8x64xf32> -> vector<8x64xf32>
    %c0_217 = arith.constant 0 : index
    %c0_218 = arith.constant 0 : index
    %186 = vector.load %arg11[%c0_217, %c0_218] : memref<1x64xf32, #tpu.memory_space<vmem>>, vector<1x64xf32>
    %187 = vector.broadcast %186 : vector<1x64xf32> to vector<8x64xf32>
    %188 = arith.addf %185, %187 : vector<8x64xf32>
    %cst_219 = arith.constant 0.000000e+00 : f32
    %189 = vector.broadcast %cst_219 : f32 to vector<8x64xf32>
    %190 = arith.maximumf %188, %189 : vector<8x64xf32>
    %c1_220 = arith.constant 1 : index
    %c0_221 = arith.constant 0 : index
    %191 = vector.load %arg21[%c1_220, %c0_221] : memref<10x64xf32, #tpu.memory_space<vmem>>, vector<8x64xf32>
    tpu.vector_store %arg21[%c1_220, %c0_221], %190 {strides = array<i32>} : memref<10x64xf32, #tpu.memory_space<vmem>>, vector<8x64xf32>,
    %c0_222 = arith.constant 0 : index
    %c0_223 = arith.constant 0 : index
    %192 = vector.load %arg21[%c0_222, %c0_223] : memref<10x64xf32, #tpu.memory_space<vmem>>, vector<8x64xf32>
    %c0_224 = arith.constant 0 : index
    %c0_225 = arith.constant 0 : index
    %193 = vector.load %arg22[%c0_224, %c0_225] : memref<8x192xf32, #tpu.memory_space<vmem>>, vector<8x64xf32>
    tpu.vector_store %arg22[%c0_224, %c0_225], %192 {strides = array<i32>} : memref<8x192xf32, #tpu.memory_space<vmem>>, vector<8x64xf32>,
    %c0_226 = arith.constant 0 : index
    %c64_227 = arith.constant 64 : index
    %194 = vector.load %arg22[%c0_226, %c64_227] : memref<8x192xf32, #tpu.memory_space<vmem>>, vector<8x64xf32>
    tpu.vector_store %arg22[%c0_226, %c64_227], %190 {strides = array<i32>} : memref<8x192xf32, #tpu.memory_space<vmem>>, vector<8x64xf32>,
    %c2_228 = arith.constant 2 : index
    %c0_229 = arith.constant 0 : index
    %195 = vector.load %arg21[%c2_228, %c0_229] : memref<10x64xf32, #tpu.memory_space<vmem>>, vector<8x64xf32>
    %c0_230 = arith.constant 0 : index
    %c128_231 = arith.constant 128 : index
    %196 = vector.load %arg22[%c0_230, %c128_231] : memref<8x192xf32, #tpu.memory_space<vmem>>, vector<8x64xf32>
    tpu.vector_store %arg22[%c0_230, %c128_231], %195 {strides = array<i32>} : memref<8x192xf32, #tpu.memory_space<vmem>>, vector<8x64xf32>,
    %c0_232 = arith.constant 0 : index
    %c0_233 = arith.constant 0 : index
    %197 = vector.load %arg22[%c0_232, %c0_233] : memref<8x192xf32, #tpu.memory_space<vmem>>, vector<8x192xf32>
    %198 = arith.truncf %197 : vector<8x192xf32> to vector<8x192xbf16>
    %c0_234 = arith.constant 0 : index
    %c0_235 = arith.constant 0 : index
    %199 = vector.load %arg12[%c0_234, %c0_235] : memref<192x64xbf16, #tpu.memory_space<vmem>>, vector<192x64xbf16>
    %cst_236 = arith.constant dense<0.000000e+00> : vector<8x64xf32>
    %200 = tpu.matmul %198, %199, %cst_236 {dimension_numbers = #tpu.dot_dimension_numbers<[1], [0], [0], [1], [0, 0, 1, 1], [], []>} : vector<8x192xbf16>, vector<192x64xbf16>, vector<8x64xf32> -> vector<8x64xf32>
    %c0_237 = arith.constant 0 : index
    %c0_238 = arith.constant 0 : index
    %201 = vector.load %arg13[%c0_237, %c0_238] : memref<1x64xf32, #tpu.memory_space<vmem>>, vector<1x64xf32>
    %202 = vector.broadcast %201 : vector<1x64xf32> to vector<8x64xf32>
    %203 = arith.addf %200, %202 : vector<8x64xf32>
    %cst_239 = arith.constant 0.333333343 : f32
    %204 = vector.broadcast %cst_239 : f32 to vector<8x64xf32>
    %205 = arith.mulf %203, %204 : vector<8x64xf32>
    %206 = arith.addf %175, %205 : vector<8x64xf32>
    %c1_240 = arith.constant 1 : index
    %c0_241 = arith.constant 0 : index
    %207 = vector.load %arg21[%c1_240, %c0_241] : memref<10x64xf32, #tpu.memory_space<vmem>>, vector<8x64xf32>
    tpu.vector_store %arg21[%c1_240, %c0_241], %206 {strides = array<i32>} : memref<10x64xf32, #tpu.memory_space<vmem>>, vector<8x64xf32>,
    %c0_242 = arith.constant 0 : index
    %c0_243 = arith.constant 0 : index
    %208 = vector.load %arg21[%c0_242, %c0_243] : memref<10x64xf32, #tpu.memory_space<vmem>>, vector<8x64xf32>
    %c0_244 = arith.constant 0 : index
    %c0_245 = arith.constant 0 : index
    %209 = vector.load %arg22[%c0_244, %c0_245] : memref<8x192xf32, #tpu.memory_space<vmem>>, vector<8x64xf32>
    tpu.vector_store %arg22[%c0_244, %c0_245], %208 {strides = array<i32>} : memref<8x192xf32, #tpu.memory_space<vmem>>, vector<8x64xf32>,
    %c0_246 = arith.constant 0 : index
    %c64_247 = arith.constant 64 : index
    %210 = vector.load %arg22[%c0_246, %c64_247] : memref<8x192xf32, #tpu.memory_space<vmem>>, vector<8x64xf32>
    tpu.vector_store %arg22[%c0_246, %c64_247], %206 {strides = array<i32>} : memref<8x192xf32, #tpu.memory_space<vmem>>, vector<8x64xf32>,
    %c2_248 = arith.constant 2 : index
    %c0_249 = arith.constant 0 : index
    %211 = vector.load %arg21[%c2_248, %c0_249] : memref<10x64xf32, #tpu.memory_space<vmem>>, vector<8x64xf32>
    %c0_250 = arith.constant 0 : index
    %c128_251 = arith.constant 128 : index
    %212 = vector.load %arg22[%c0_250, %c128_251] : memref<8x192xf32, #tpu.memory_space<vmem>>, vector<8x64xf32>
    tpu.vector_store %arg22[%c0_250, %c128_251], %211 {strides = array<i32>} : memref<8x192xf32, #tpu.memory_space<vmem>>, vector<8x64xf32>,
    %c0_252 = arith.constant 0 : index
    %c0_253 = arith.constant 0 : index
    %213 = vector.load %arg22[%c0_252, %c0_253] : memref<8x192xf32, #tpu.memory_space<vmem>>, vector<8x192xf32>
    %214 = arith.truncf %213 : vector<8x192xf32> to vector<8x192xbf16>
    %c0_254 = arith.constant 0 : index
    %c0_255 = arith.constant 0 : index
    %215 = vector.load %arg10[%c0_254, %c0_255] : memref<192x64xbf16, #tpu.memory_space<vmem>>, vector<192x64xbf16>
    %cst_256 = arith.constant dense<0.000000e+00> : vector<8x64xf32>
    %216 = tpu.matmul %214, %215, %cst_256 {dimension_numbers = #tpu.dot_dimension_numbers<[1], [0], [0], [1], [0, 0, 1, 1], [], []>} : vector<8x192xbf16>, vector<192x64xbf16>, vector<8x64xf32> -> vector<8x64xf32>
    %c0_257 = arith.constant 0 : index
    %c0_258 = arith.constant 0 : index
    %217 = vector.load %arg11[%c0_257, %c0_258] : memref<1x64xf32, #tpu.memory_space<vmem>>, vector<1x64xf32>
    %218 = vector.broadcast %217 : vector<1x64xf32> to vector<8x64xf32>
    %219 = arith.addf %216, %218 : vector<8x64xf32>
    %cst_259 = arith.constant 0.000000e+00 : f32
    %220 = vector.broadcast %cst_259 : f32 to vector<8x64xf32>
    %221 = arith.maximumf %219, %220 : vector<8x64xf32>
    %c1_260 = arith.constant 1 : index
    %c0_261 = arith.constant 0 : index
    %222 = vector.load %arg21[%c1_260, %c0_261] : memref<10x64xf32, #tpu.memory_space<vmem>>, vector<8x64xf32>
    tpu.vector_store %arg21[%c1_260, %c0_261], %221 {strides = array<i32>} : memref<10x64xf32, #tpu.memory_space<vmem>>, vector<8x64xf32>,
    %c0_262 = arith.constant 0 : index
    %c0_263 = arith.constant 0 : index
    %223 = vector.load %arg21[%c0_262, %c0_263] : memref<10x64xf32, #tpu.memory_space<vmem>>, vector<8x64xf32>
    %c0_264 = arith.constant 0 : index
    %c0_265 = arith.constant 0 : index
    %224 = vector.load %arg22[%c0_264, %c0_265] : memref<8x192xf32, #tpu.memory_space<vmem>>, vector<8x64xf32>
    tpu.vector_store %arg22[%c0_264, %c0_265], %223 {strides = array<i32>} : memref<8x192xf32, #tpu.memory_space<vmem>>, vector<8x64xf32>,
    %c0_266 = arith.constant 0 : index
    %c64_267 = arith.constant 64 : index
    %225 = vector.load %arg22[%c0_266, %c64_267] : memref<8x192xf32, #tpu.memory_space<vmem>>, vector<8x64xf32>
    tpu.vector_store %arg22[%c0_266, %c64_267], %221 {strides = array<i32>} : memref<8x192xf32, #tpu.memory_space<vmem>>, vector<8x64xf32>,
    %c2_268 = arith.constant 2 : index
    %c0_269 = arith.constant 0 : index
    %226 = vector.load %arg21[%c2_268, %c0_269] : memref<10x64xf32, #tpu.memory_space<vmem>>, vector<8x64xf32>
    %c0_270 = arith.constant 0 : index
    %c128_271 = arith.constant 128 : index
    %227 = vector.load %arg22[%c0_270, %c128_271] : memref<8x192xf32, #tpu.memory_space<vmem>>, vector<8x64xf32>
    tpu.vector_store %arg22[%c0_270, %c128_271], %226 {strides = array<i32>} : memref<8x192xf32, #tpu.memory_space<vmem>>, vector<8x64xf32>,
    %c0_272 = arith.constant 0 : index
    %c0_273 = arith.constant 0 : index
    %228 = vector.load %arg22[%c0_272, %c0_273] : memref<8x192xf32, #tpu.memory_space<vmem>>, vector<8x192xf32>
    %229 = arith.truncf %228 : vector<8x192xf32> to vector<8x192xbf16>
    %c0_274 = arith.constant 0 : index
    %c0_275 = arith.constant 0 : index
    %230 = vector.load %arg12[%c0_274, %c0_275] : memref<192x64xbf16, #tpu.memory_space<vmem>>, vector<192x64xbf16>
    %cst_276 = arith.constant dense<0.000000e+00> : vector<8x64xf32>
    %231 = tpu.matmul %229, %230, %cst_276 {dimension_numbers = #tpu.dot_dimension_numbers<[1], [0], [0], [1], [0, 0, 1, 1], [], []>} : vector<8x192xbf16>, vector<192x64xbf16>, vector<8x64xf32> -> vector<8x64xf32>
    %c0_277 = arith.constant 0 : index
    %c0_278 = arith.constant 0 : index
    %232 = vector.load %arg13[%c0_277, %c0_278] : memref<1x64xf32, #tpu.memory_space<vmem>>, vector<1x64xf32>
    %233 = vector.broadcast %232 : vector<1x64xf32> to vector<8x64xf32>
    %234 = arith.addf %231, %233 : vector<8x64xf32>
    %cst_279 = arith.constant 3.000000e+00 : f32
    %235 = vector.broadcast %cst_279 : f32 to vector<8x64xf32>
    %236 = arith.mulf %235, %234 : vector<8x64xf32>
    %237 = arith.addf %203, %236 : vector<8x64xf32>
    %cst_280 = arith.constant 0.333333343 : f32
    %238 = vector.broadcast %cst_280 : f32 to vector<8x64xf32>
    %239 = arith.mulf %203, %238 : vector<8x64xf32>
    %240 = arith.subf %234, %239 : vector<8x64xf32>
    %241 = arith.addf %175, %240 : vector<8x64xf32>
    %c1_281 = arith.constant 1 : index
    %c0_282 = arith.constant 0 : index
    %242 = vector.load %arg21[%c1_281, %c0_282] : memref<10x64xf32, #tpu.memory_space<vmem>>, vector<8x64xf32>
    tpu.vector_store %arg21[%c1_281, %c0_282], %241 {strides = array<i32>} : memref<10x64xf32, #tpu.memory_space<vmem>>, vector<8x64xf32>,
    %c0_283 = arith.constant 0 : index
    %c0_284 = arith.constant 0 : index
    %243 = vector.load %arg21[%c0_283, %c0_284] : memref<10x64xf32, #tpu.memory_space<vmem>>, vector<8x64xf32>
    %c0_285 = arith.constant 0 : index
    %c0_286 = arith.constant 0 : index
    %244 = vector.load %arg22[%c0_285, %c0_286] : memref<8x192xf32, #tpu.memory_space<vmem>>, vector<8x64xf32>
    tpu.vector_store %arg22[%c0_285, %c0_286], %243 {strides = array<i32>} : memref<8x192xf32, #tpu.memory_space<vmem>>, vector<8x64xf32>,
    %c0_287 = arith.constant 0 : index
    %c64_288 = arith.constant 64 : index
    %245 = vector.load %arg22[%c0_287, %c64_288] : memref<8x192xf32, #tpu.memory_space<vmem>>, vector<8x64xf32>
    tpu.vector_store %arg22[%c0_287, %c64_288], %241 {strides = array<i32>} : memref<8x192xf32, #tpu.memory_space<vmem>>, vector<8x64xf32>,
    %c2_289 = arith.constant 2 : index
    %c0_290 = arith.constant 0 : index
    %246 = vector.load %arg21[%c2_289, %c0_290] : memref<10x64xf32, #tpu.memory_space<vmem>>, vector<8x64xf32>
    %c0_291 = arith.constant 0 : index
    %c128_292 = arith.constant 128 : index
    %247 = vector.load %arg22[%c0_291, %c128_292] : memref<8x192xf32, #tpu.memory_space<vmem>>, vector<8x64xf32>
    tpu.vector_store %arg22[%c0_291, %c128_292], %246 {strides = array<i32>} : memref<8x192xf32, #tpu.memory_space<vmem>>, vector<8x64xf32>,
    %c0_293 = arith.constant 0 : index
    %c0_294 = arith.constant 0 : index
    %248 = vector.load %arg22[%c0_293, %c0_294] : memref<8x192xf32, #tpu.memory_space<vmem>>, vector<8x192xf32>
    %249 = arith.truncf %248 : vector<8x192xf32> to vector<8x192xbf16>
    %c0_295 = arith.constant 0 : index
    %c0_296 = arith.constant 0 : index
    %250 = vector.load %arg10[%c0_295, %c0_296] : memref<192x64xbf16, #tpu.memory_space<vmem>>, vector<192x64xbf16>
    %cst_297 = arith.constant dense<0.000000e+00> : vector<8x64xf32>
    %251 = tpu.matmul %249, %250, %cst_297 {dimension_numbers = #tpu.dot_dimension_numbers<[1], [0], [0], [1], [0, 0, 1, 1], [], []>} : vector<8x192xbf16>, vector<192x64xbf16>, vector<8x64xf32> -> vector<8x64xf32>
    %c0_298 = arith.constant 0 : index
    %c0_299 = arith.constant 0 : index
    %252 = vector.load %arg11[%c0_298, %c0_299] : memref<1x64xf32, #tpu.memory_space<vmem>>, vector<1x64xf32>
    %253 = vector.broadcast %252 : vector<1x64xf32> to vector<8x64xf32>
    %254 = arith.addf %251, %253 : vector<8x64xf32>
    %cst_300 = arith.constant 0.000000e+00 : f32
    %255 = vector.broadcast %cst_300 : f32 to vector<8x64xf32>
    %256 = arith.maximumf %254, %255 : vector<8x64xf32>
    %c1_301 = arith.constant 1 : index
    %c0_302 = arith.constant 0 : index
    %257 = vector.load %arg21[%c1_301, %c0_302] : memref<10x64xf32, #tpu.memory_space<vmem>>, vector<8x64xf32>
    tpu.vector_store %arg21[%c1_301, %c0_302], %256 {strides = array<i32>} : memref<10x64xf32, #tpu.memory_space<vmem>>, vector<8x64xf32>,
    %c0_303 = arith.constant 0 : index
    %c0_304 = arith.constant 0 : index
    %258 = vector.load %arg21[%c0_303, %c0_304] : memref<10x64xf32, #tpu.memory_space<vmem>>, vector<8x64xf32>
    %c0_305 = arith.constant 0 : index
    %c0_306 = arith.constant 0 : index
    %259 = vector.load %arg22[%c0_305, %c0_306] : memref<8x192xf32, #tpu.memory_space<vmem>>, vector<8x64xf32>
    tpu.vector_store %arg22[%c0_305, %c0_306], %258 {strides = array<i32>} : memref<8x192xf32, #tpu.memory_space<vmem>>, vector<8x64xf32>,
    %c0_307 = arith.constant 0 : index
    %c64_308 = arith.constant 64 : index
    %260 = vector.load %arg22[%c0_307, %c64_308] : memref<8x192xf32, #tpu.memory_space<vmem>>, vector<8x64xf32>
    tpu.vector_store %arg22[%c0_307, %c64_308], %256 {strides = array<i32>} : memref<8x192xf32, #tpu.memory_space<vmem>>, vector<8x64xf32>,
    %c2_309 = arith.constant 2 : index
    %c0_310 = arith.constant 0 : index
    %261 = vector.load %arg21[%c2_309, %c0_310] : memref<10x64xf32, #tpu.memory_space<vmem>>, vector<8x64xf32>
    %c0_311 = arith.constant 0 : index
    %c128_312 = arith.constant 128 : index
    %262 = vector.load %arg22[%c0_311, %c128_312] : memref<8x192xf32, #tpu.memory_space<vmem>>, vector<8x64xf32>
    tpu.vector_store %arg22[%c0_311, %c128_312], %261 {strides = array<i32>} : memref<8x192xf32, #tpu.memory_space<vmem>>, vector<8x64xf32>,
    %c0_313 = arith.constant 0 : index
    %c0_314 = arith.constant 0 : index
    %263 = vector.load %arg22[%c0_313, %c0_314] : memref<8x192xf32, #tpu.memory_space<vmem>>, vector<8x192xf32>
    %264 = arith.truncf %263 : vector<8x192xf32> to vector<8x192xbf16>
    %c0_315 = arith.constant 0 : index
    %c0_316 = arith.constant 0 : index
    %265 = vector.load %arg12[%c0_315, %c0_316] : memref<192x64xbf16, #tpu.memory_space<vmem>>, vector<192x64xbf16>
    %cst_317 = arith.constant dense<0.000000e+00> : vector<8x64xf32>
    %266 = tpu.matmul %264, %265, %cst_317 {dimension_numbers = #tpu.dot_dimension_numbers<[1], [0], [0], [1], [0, 0, 1, 1], [], []>} : vector<8x192xbf16>, vector<192x64xbf16>, vector<8x64xf32> -> vector<8x64xf32>
    %c0_318 = arith.constant 0 : index
    %c0_319 = arith.constant 0 : index
    %267 = vector.load %arg13[%c0_318, %c0_319] : memref<1x64xf32, #tpu.memory_space<vmem>>, vector<1x64xf32>
    %268 = vector.broadcast %267 : vector<1x64xf32> to vector<8x64xf32>
    %269 = arith.addf %266, %268 : vector<8x64xf32>
    %cst_320 = arith.constant 3.000000e+00 : f32
    %270 = vector.broadcast %cst_320 : f32 to vector<8x64xf32>
    %271 = arith.mulf %270, %269 : vector<8x64xf32>
    %272 = arith.addf %237, %271 : vector<8x64xf32>
    %273 = arith.subf %203, %234 : vector<8x64xf32>
    %274 = arith.addf %273, %269 : vector<8x64xf32>
    %275 = arith.addf %175, %274 : vector<8x64xf32>
    %c1_321 = arith.constant 1 : index
    %c0_322 = arith.constant 0 : index
    %276 = vector.load %arg21[%c1_321, %c0_322] : memref<10x64xf32, #tpu.memory_space<vmem>>, vector<8x64xf32>
    tpu.vector_store %arg21[%c1_321, %c0_322], %275 {strides = array<i32>} : memref<10x64xf32, #tpu.memory_space<vmem>>, vector<8x64xf32>,
    %c0_323 = arith.constant 0 : index
    %c0_324 = arith.constant 0 : index
    %277 = vector.load %arg21[%c0_323, %c0_324] : memref<10x64xf32, #tpu.memory_space<vmem>>, vector<8x64xf32>
    %c0_325 = arith.constant 0 : index
    %c0_326 = arith.constant 0 : index
    %278 = vector.load %arg22[%c0_325, %c0_326] : memref<8x192xf32, #tpu.memory_space<vmem>>, vector<8x64xf32>
    tpu.vector_store %arg22[%c0_325, %c0_326], %277 {strides = array<i32>} : memref<8x192xf32, #tpu.memory_space<vmem>>, vector<8x64xf32>,
    %c0_327 = arith.constant 0 : index
    %c64_328 = arith.constant 64 : index
    %279 = vector.load %arg22[%c0_327, %c64_328] : memref<8x192xf32, #tpu.memory_space<vmem>>, vector<8x64xf32>
    tpu.vector_store %arg22[%c0_327, %c64_328], %275 {strides = array<i32>} : memref<8x192xf32, #tpu.memory_space<vmem>>, vector<8x64xf32>,
    %c2_329 = arith.constant 2 : index
    %c0_330 = arith.constant 0 : index
    %280 = vector.load %arg21[%c2_329, %c0_330] : memref<10x64xf32, #tpu.memory_space<vmem>>, vector<8x64xf32>
    %c0_331 = arith.constant 0 : index
    %c128_332 = arith.constant 128 : index
    %281 = vector.load %arg22[%c0_331, %c128_332] : memref<8x192xf32, #tpu.memory_space<vmem>>, vector<8x64xf32>
    tpu.vector_store %arg22[%c0_331, %c128_332], %280 {strides = array<i32>} : memref<8x192xf32, #tpu.memory_space<vmem>>, vector<8x64xf32>,
    %c0_333 = arith.constant 0 : index
    %c0_334 = arith.constant 0 : index
    %282 = vector.load %arg22[%c0_333, %c0_334] : memref<8x192xf32, #tpu.memory_space<vmem>>, vector<8x192xf32>
    %283 = arith.truncf %282 : vector<8x192xf32> to vector<8x192xbf16>
    %c0_335 = arith.constant 0 : index
    %c0_336 = arith.constant 0 : index
    %284 = vector.load %arg10[%c0_335, %c0_336] : memref<192x64xbf16, #tpu.memory_space<vmem>>, vector<192x64xbf16>
    %cst_337 = arith.constant dense<0.000000e+00> : vector<8x64xf32>
    %285 = tpu.matmul %283, %284, %cst_337 {dimension_numbers = #tpu.dot_dimension_numbers<[1], [0], [0], [1], [0, 0, 1, 1], [], []>} : vector<8x192xbf16>, vector<192x64xbf16>, vector<8x64xf32> -> vector<8x64xf32>
    %c0_338 = arith.constant 0 : index
    %c0_339 = arith.constant 0 : index
    %286 = vector.load %arg11[%c0_338, %c0_339] : memref<1x64xf32, #tpu.memory_space<vmem>>, vector<1x64xf32>
    %287 = vector.broadcast %286 : vector<1x64xf32> to vector<8x64xf32>
    %288 = arith.addf %285, %287 : vector<8x64xf32>
    %cst_340 = arith.constant 0.000000e+00 : f32
    %289 = vector.broadcast %cst_340 : f32 to vector<8x64xf32>
    %290 = arith.maximumf %288, %289 : vector<8x64xf32>
    %c1_341 = arith.constant 1 : index
    %c0_342 = arith.constant 0 : index
    %291 = vector.load %arg21[%c1_341, %c0_342] : memref<10x64xf32, #tpu.memory_space<vmem>>, vector<8x64xf32>
    tpu.vector_store %arg21[%c1_341, %c0_342], %290 {strides = array<i32>} : memref<10x64xf32, #tpu.memory_space<vmem>>, vector<8x64xf32>,
    %c0_343 = arith.constant 0 : index
    %c0_344 = arith.constant 0 : index
    %292 = vector.load %arg21[%c0_343, %c0_344] : memref<10x64xf32, #tpu.memory_space<vmem>>, vector<8x64xf32>
    %c0_345 = arith.constant 0 : index
    %c0_346 = arith.constant 0 : index
    %293 = vector.load %arg22[%c0_345, %c0_346] : memref<8x192xf32, #tpu.memory_space<vmem>>, vector<8x64xf32>
    tpu.vector_store %arg22[%c0_345, %c0_346], %292 {strides = array<i32>} : memref<8x192xf32, #tpu.memory_space<vmem>>, vector<8x64xf32>,
    %c0_347 = arith.constant 0 : index
    %c64_348 = arith.constant 64 : index
    %294 = vector.load %arg22[%c0_347, %c64_348] : memref<8x192xf32, #tpu.memory_space<vmem>>, vector<8x64xf32>
    tpu.vector_store %arg22[%c0_347, %c64_348], %290 {strides = array<i32>} : memref<8x192xf32, #tpu.memory_space<vmem>>, vector<8x64xf32>,
    %c2_349 = arith.constant 2 : index
    %c0_350 = arith.constant 0 : index
    %295 = vector.load %arg21[%c2_349, %c0_350] : memref<10x64xf32, #tpu.memory_space<vmem>>, vector<8x64xf32>
    %c0_351 = arith.constant 0 : index
    %c128_352 = arith.constant 128 : index
    %296 = vector.load %arg22[%c0_351, %c128_352] : memref<8x192xf32, #tpu.memory_space<vmem>>, vector<8x64xf32>
    tpu.vector_store %arg22[%c0_351, %c128_352], %295 {strides = array<i32>} : memref<8x192xf32, #tpu.memory_space<vmem>>, vector<8x64xf32>,
    %c0_353 = arith.constant 0 : index
    %c0_354 = arith.constant 0 : index
    %297 = vector.load %arg22[%c0_353, %c0_354] : memref<8x192xf32, #tpu.memory_space<vmem>>, vector<8x192xf32>
    %298 = arith.truncf %297 : vector<8x192xf32> to vector<8x192xbf16>
    %c0_355 = arith.constant 0 : index
    %c0_356 = arith.constant 0 : index
    %299 = vector.load %arg12[%c0_355, %c0_356] : memref<192x64xbf16, #tpu.memory_space<vmem>>, vector<192x64xbf16>
    %cst_357 = arith.constant dense<0.000000e+00> : vector<8x64xf32>
    %300 = tpu.matmul %298, %299, %cst_357 {dimension_numbers = #tpu.dot_dimension_numbers<[1], [0], [0], [1], [0, 0, 1, 1], [], []>} : vector<8x192xbf16>, vector<192x64xbf16>, vector<8x64xf32> -> vector<8x64xf32>
    %c0_358 = arith.constant 0 : index
    %c0_359 = arith.constant 0 : index
    %301 = vector.load %arg13[%c0_358, %c0_359] : memref<1x64xf32, #tpu.memory_space<vmem>>, vector<1x64xf32>
    %302 = vector.broadcast %301 : vector<1x64xf32> to vector<8x64xf32>
    %303 = arith.addf %300, %302 : vector<8x64xf32>
    %304 = arith.addf %272, %303 : vector<8x64xf32>
    %cst_360 = arith.constant 1.250000e-01 : f32
    %305 = vector.broadcast %cst_360 : f32 to vector<8x64xf32>
    %306 = arith.mulf %304, %305 : vector<8x64xf32>
    %307 = arith.addf %175, %306 : vector<8x64xf32>
    %c1_361 = arith.constant 1 : index
    %c0_362 = arith.constant 0 : index
    %308 = vector.load %arg21[%c1_361, %c0_362] : memref<10x64xf32, #tpu.memory_space<vmem>>, vector<8x64xf32>
    tpu.vector_store %arg21[%c1_361, %c0_362], %307 {strides = array<i32>} : memref<10x64xf32, #tpu.memory_space<vmem>>, vector<8x64xf32>,
    %c1_363 = arith.constant 1 : index
    %c0_364 = arith.constant 0 : index
    %309 = tpu.strided_load %arg21[%c1_363, %c0_364] {strides = array<i32: 2, 1>} : memref<10x64xf32, #tpu.memory_space<vmem>>, vector<4x64xf32>
    %c2_365 = arith.constant 2 : index
    %c0_366 = arith.constant 0 : index
    %310 = tpu.strided_load %arg21[%c2_365, %c0_366] {strides = array<i32: 2, 1>} : memref<10x64xf32, #tpu.memory_space<vmem>>, vector<4x64xf32>
    %311 = arith.maximumf %309, %310 : vector<4x64xf32>
    %c0_367 = arith.constant 0 : index
    %c0_368 = arith.constant 0 : index
    %312 = vector.load %arg22[%c0_367, %c0_368] : memref<8x192xf32, #tpu.memory_space<vmem>>, vector<4x64xf32>
    tpu.vector_store %arg22[%c0_367, %c0_368], %311 {strides = array<i32>} : memref<8x192xf32, #tpu.memory_space<vmem>>, vector<4x64xf32>,
    %c0_369 = arith.constant 0 : index
    %c0_370 = arith.constant 0 : index
    %313 = vector.load %arg15[%c0_369, %c0_370] : memref<1x64xf32, #tpu.memory_space<vmem>>, vector<1x64xf32>
    %c0_371 = arith.constant 0 : index
    %c0_372 = arith.constant 0 : index
    %314 = vector.load %arg22[%c0_371, %c0_372] : memref<8x192xf32, #tpu.memory_space<vmem>>, vector<1x64xf32>
    %315 = arith.truncf %314 : vector<1x64xf32> to vector<1x64xbf16>
    %c0_373 = arith.constant 0 : index
    %c0_374 = arith.constant 0 : index
    %c0_375 = arith.constant 0 : index
    %316 = vector.load %arg14[%c0_373, %c0_374, %c0_375] : memref<4x64x64xbf16, #tpu.memory_space<vmem>>, vector<1x64x64xbf16>
    %317 = vector.shape_cast %316 : vector<1x64x64xbf16> to vector<64x64xbf16>
    %cst_376 = arith.constant dense<0.000000e+00> : vector<1x64xf32>
    %318 = tpu.matmul %315, %317, %cst_376 {dimension_numbers = #tpu.dot_dimension_numbers<[1], [0], [0], [1], [0, 0, 1, 1], [], []>} : vector<1x64xbf16>, vector<64x64xbf16>, vector<1x64xf32> -> vector<1x64xf32>
    %319 = arith.addf %313, %318 : vector<1x64xf32>
    %c1_377 = arith.constant 1 : index
    %c0_378 = arith.constant 0 : index
    %320 = vector.load %arg22[%c1_377, %c0_378] : memref<8x192xf32, #tpu.memory_space<vmem>>, vector<1x64xf32>
    %321 = arith.truncf %320 : vector<1x64xf32> to vector<1x64xbf16>
    %c1_379 = arith.constant 1 : index
    %c0_380 = arith.constant 0 : index
    %c0_381 = arith.constant 0 : index
    %322 = vector.load %arg14[%c1_379, %c0_380, %c0_381] : memref<4x64x64xbf16, #tpu.memory_space<vmem>>, vector<1x64x64xbf16>
    %323 = vector.shape_cast %322 : vector<1x64x64xbf16> to vector<64x64xbf16>
    %cst_382 = arith.constant dense<0.000000e+00> : vector<1x64xf32>
    %324 = tpu.matmul %321, %323, %cst_382 {dimension_numbers = #tpu.dot_dimension_numbers<[1], [0], [0], [1], [0, 0, 1, 1], [], []>} : vector<1x64xbf16>, vector<64x64xbf16>, vector<1x64xf32> -> vector<1x64xf32>
    %325 = arith.addf %319, %324 : vector<1x64xf32>
    %c2_383 = arith.constant 2 : index
    %c0_384 = arith.constant 0 : index
    %326 = vector.load %arg22[%c2_383, %c0_384] : memref<8x192xf32, #tpu.memory_space<vmem>>, vector<1x64xf32>
    %327 = arith.truncf %326 : vector<1x64xf32> to vector<1x64xbf16>
    %c2_385 = arith.constant 2 : index
    %c0_386 = arith.constant 0 : index
    %c0_387 = arith.constant 0 : index
    %328 = vector.load %arg14[%c2_385, %c0_386, %c0_387] : memref<4x64x64xbf16, #tpu.memory_space<vmem>>, vector<1x64x64xbf16>
    %329 = vector.shape_cast %328 : vector<1x64x64xbf16> to vector<64x64xbf16>
    %cst_388 = arith.constant dense<0.000000e+00> : vector<1x64xf32>
    %330 = tpu.matmul %327, %329, %cst_388 {dimension_numbers = #tpu.dot_dimension_numbers<[1], [0], [0], [1], [0, 0, 1, 1], [], []>} : vector<1x64xbf16>, vector<64x64xbf16>, vector<1x64xf32> -> vector<1x64xf32>
    %331 = arith.addf %325, %330 : vector<1x64xf32>
    %c3 = arith.constant 3 : index
    %c0_389 = arith.constant 0 : index
    %332 = vector.load %arg22[%c3, %c0_389] : memref<8x192xf32, #tpu.memory_space<vmem>>, vector<1x64xf32>
    %333 = arith.truncf %332 : vector<1x64xf32> to vector<1x64xbf16>
    %c3_390 = arith.constant 3 : index
    %c0_391 = arith.constant 0 : index
    %c0_392 = arith.constant 0 : index
    %334 = vector.load %arg14[%c3_390, %c0_391, %c0_392] : memref<4x64x64xbf16, #tpu.memory_space<vmem>>, vector<1x64x64xbf16>
    %335 = vector.shape_cast %334 : vector<1x64x64xbf16> to vector<64x64xbf16>
    %cst_393 = arith.constant dense<0.000000e+00> : vector<1x64xf32>
    %336 = tpu.matmul %333, %335, %cst_393 {dimension_numbers = #tpu.dot_dimension_numbers<[1], [0], [0], [1], [0, 0, 1, 1], [], []>} : vector<1x64xbf16>, vector<64x64xbf16>, vector<1x64xf32> -> vector<1x64xf32>
    %337 = arith.addf %331, %336 : vector<1x64xf32>
    %cst_394 = arith.constant 0.000000e+00 : f32
    %338 = vector.broadcast %cst_394 : f32 to vector<1x64xf32>
    %339 = arith.maximumf %337, %338 : vector<1x64xf32>
    %340 = arith.truncf %339 : vector<1x64xf32> to vector<1x64xbf16>
    %c0_395 = arith.constant 0 : index
    %c0_396 = arith.constant 0 : index
    %341 = vector.load %arg16[%c0_395, %c0_396] : memref<64x5xbf16, #tpu.memory_space<vmem>>, vector<64x5xbf16>
    %cst_397 = arith.constant dense<0.000000e+00> : vector<1x5xf32>
    %342 = tpu.matmul %340, %341, %cst_397 {dimension_numbers = #tpu.dot_dimension_numbers<[1], [0], [0], [1], [0, 0, 1, 1], [], []>} : vector<1x64xbf16>, vector<64x5xbf16>, vector<1x5xf32> -> vector<1x5xf32>
    %c0_398 = arith.constant 0 : index
    %c0_399 = arith.constant 0 : index
    %343 = vector.load %arg17[%c0_398, %c0_399] : memref<1x5xf32, #tpu.memory_space<vmem>>, vector<1x5xf32>
    %344 = arith.addf %342, %343 : vector<1x5xf32>
    %c0_400 = arith.constant 0 : index
    %c0_401 = arith.constant 0 : index
    %c0_402 = arith.constant 0 : index
    %345 = vector.load %arg18[%c0_400, %c0_401, %c0_402] : memref<1x1x5xf32, #tpu.memory_space<vmem>>, vector<1x1x5xf32>
    %346 = vector.shape_cast %345 : vector<1x1x5xf32> to vector<1x5xf32>
    %347 = vector.shape_cast %344 : vector<1x5xf32> to vector<1x1x5xf32>
    tpu.vector_store %arg18[%c0_400, %c0_401, %c0_402], %347 {strides = array<i32>} : memref<1x1x5xf32, #tpu.memory_space<vmem>>, vector<1x1x5xf32>,
    return
  }
  func.func @transform_0(%arg0: i32) -> (i32, i32, i32) {
    %c0_i32 = arith.constant 0 : i32
    %c0_i32_0 = arith.constant 0 : i32
    %c0_i32_1 = arith.constant 0 : i32
    return %arg0, %c0_i32, %c0_i32_0 : i32, i32, i32
  }
  func.func @transform_1(%arg0: i32) -> (i32, i32) {
    %c0_i32 = arith.constant 0 : i32
    %c0_i32_0 = arith.constant 0 : i32
    %c0_i32_1 = arith.constant 0 : i32
    return %c0_i32, %c0_i32_0 : i32, i32
  }
  func.func @transform_2(%arg0: i32) -> (i32, i32) {
    %c0_i32 = arith.constant 0 : i32
    %c0_i32_0 = arith.constant 0 : i32
    %c0_i32_1 = arith.constant 0 : i32
    return %c0_i32, %c0_i32_0 : i32, i32
  }
  func.func @transform_3(%arg0: i32) -> (i32, i32) {
    %c0_i32 = arith.constant 0 : i32
    %c0_i32_0 = arith.constant 0 : i32
    %c0_i32_1 = arith.constant 0 : i32
    return %c0_i32, %c0_i32_0 : i32, i32
  }
  func.func @transform_4(%arg0: i32) -> (i32, i32) {
    %c0_i32 = arith.constant 0 : i32
    %c0_i32_0 = arith.constant 0 : i32
    %c0_i32_1 = arith.constant 0 : i32
    return %c0_i32, %c0_i32_0 : i32, i32
  }
  func.func @transform_5(%arg0: i32) -> (i32, i32) {
    %c0_i32 = arith.constant 0 : i32
    %c0_i32_0 = arith.constant 0 : i32
    %c0_i32_1 = arith.constant 0 : i32
    return %c0_i32, %c0_i32_0 : i32, i32
  }
  func.func @transform_6(%arg0: i32) -> (i32, i32) {
    %c0_i32 = arith.constant 0 : i32
    %c0_i32_0 = arith.constant 0 : i32
    %c0_i32_1 = arith.constant 0 : i32
    return %c0_i32, %c0_i32_0 : i32, i32
  }
  func.func @transform_7(%arg0: i32) -> (i32, i32) {
    %c0_i32 = arith.constant 0 : i32
    %c0_i32_0 = arith.constant 0 : i32
    %c0_i32_1 = arith.constant 0 : i32
    return %c0_i32, %c0_i32_0 : i32, i32
  }
  func.func @transform_8(%arg0: i32) -> (i32, i32) {
    %c0_i32 = arith.constant 0 : i32
    %c0_i32_0 = arith.constant 0 : i32
    %c0_i32_1 = arith.constant 0 : i32
    return %c0_i32, %c0_i32_0 : i32, i32
  }
  func.func @transform_9(%arg0: i32) -> (i32, i32) {
    %c0_i32 = arith.constant 0 : i32
    %c0_i32_0 = arith.constant 0 : i32
    %c0_i32_1 = arith.constant 0 : i32
    return %c0_i32, %c0_i32_0 : i32, i32
  }
  func.func @transform_10(%arg0: i32) -> (i32, i32) {
    %c0_i32 = arith.constant 0 : i32
    %c0_i32_0 = arith.constant 0 : i32
    %c0_i32_1 = arith.constant 0 : i32
    return %c0_i32, %c0_i32_0 : i32, i32
  }
  func.func @transform_11(%arg0: i32) -> (i32, i32) {
    %c0_i32 = arith.constant 0 : i32
    %c0_i32_0 = arith.constant 0 : i32
    %c0_i32_1 = arith.constant 0 : i32
    return %c0_i32, %c0_i32_0 : i32, i32
  }
  func.func @transform_12(%arg0: i32) -> (i32, i32) {
    %c0_i32 = arith.constant 0 : i32
    %c0_i32_0 = arith.constant 0 : i32
    %c0_i32_1 = arith.constant 0 : i32
    return %c0_i32, %c0_i32_0 : i32, i32
  }
  func.func @transform_13(%arg0: i32) -> (i32, i32, i32) {
    %c0_i32 = arith.constant 0 : i32
    %c0_i32_0 = arith.constant 0 : i32
    %c0_i32_1 = arith.constant 0 : i32
    %c0_i32_2 = arith.constant 0 : i32
    return %c0_i32, %c0_i32_0, %c0_i32_1 : i32, i32, i32
  }
  func.func @transform_14(%arg0: i32) -> (i32, i32) {
    %c0_i32 = arith.constant 0 : i32
    %c0_i32_0 = arith.constant 0 : i32
    %c0_i32_1 = arith.constant 0 : i32
    return %c0_i32, %c0_i32_0 : i32, i32
  }
  func.func @transform_15(%arg0: i32) -> (i32, i32) {
    %c0_i32 = arith.constant 0 : i32
    %c0_i32_0 = arith.constant 0 : i32
    %c0_i32_1 = arith.constant 0 : i32
    return %c0_i32, %c0_i32_0 : i32, i32
  }
  func.func @transform_16(%arg0: i32) -> (i32, i32) {
    %c0_i32 = arith.constant 0 : i32
    %c0_i32_0 = arith.constant 0 : i32
    %c0_i32_1 = arith.constant 0 : i32
    return %c0_i32, %c0_i32_0 : i32, i32
  }
  func.func @transform_17(%arg0: i32) -> (i32, i32, i32) {
    %c0_i32 = arith.constant 0 : i32
    %c0_i32_0 = arith.constant 0 : i32
    %c0_i32_1 = arith.constant 0 : i32
    return %arg0, %c0_i32, %c0_i32_0 : i32, i32, i32
  }
}

</mosaic_0001>

<bundles_post_ra>
// kernel: neural_ode_encoder_forward.1
= control target key start
LH: loop header
LB: loop body
LE: loop exit
PB: predicated region body
PF: predicated region fallthrough
CT: control target
= control target key end

     0   :  { %s5649_s0 = inlined_call_operand.vmem [shape: f32[2,16,1], index: 0, kind: input, shape index: {}]   ;;  %s5650_s1 = inlined_call_operand.vmem [shape: f32[3,32], index: 1, kind: input, shape index: {}]   ;;  %s5651_s2 = inlined_call_operand.vmem [shape: f32[1,32], index: 2, kind: input, shape index: {}]   ;;  %s5652_s3 = inlined_call_operand.vmem [shape: bf16[96,32], index: 3, kind: input, shape index: {}]   ;;  %s5653_s4 = inlined_call_operand.vmem [shape: f32[1,32], index: 4, kind: input, shape index: {}]   ;;  %s5654_s5 = inlined_call_operand.vmem [shape: bf16[96,32], index: 5, kind: input, shape index: {}]   ;;  %s5655_s6 = inlined_call_operand.vmem [shape: f32[1,32], index: 6, kind: input, shape index: {}]   ;;  %s5656_s7 = inlined_call_operand.vmem [shape: bf16[96,64], index: 7, kind: input, shape index: {}]   ;;  %s5657_s8 = inlined_call_operand.vmem [shape: f32[1,64], index: 8, kind: input, shape index: {}]   ;;  %s5658_s9 = inlined_call_operand.vmem [shape: bf16[192,64], index: 9, kind: input, shape index: {}]   ;;  %s5659_s10 = inlined_call_operand.vmem [shape: f32[1,64], index: 10, kind: input, shape index: {}]   ;;  %s5660_s11 = inlined_call_operand.vmem [shape: bf16[192,64], index: 11, kind: input, shape index: {}]   ;;  %s5661_s12 = inlined_call_operand.vmem [shape: f32[1,64], index: 12, kind: input, shape index: {}]   ;;  %s5662_s13 = inlined_call_operand.vmem [shape: bf16[4,64,64], index: 13, kind: input, shape index: {}]   ;;  %s5663_s14 = inlined_call_operand.vmem [shape: f32[1,64], index: 14, kind: input, shape index: {}]   ;;  %s5664_s15 = inlined_call_operand.vmem [shape: bf16[64,5], index: 15, kind: input, shape index: {}]   ;;  %s5665_s16 = inlined_call_operand.vmem [shape: f32[1,5], index: 16, kind: input, shape index: {}]   ;;  %s5666_s17 = inlined_call_operand.hbm [shape: f32[2,1,5], index: 17, kind: output, shape index: {}]  }
   0x1   :  { %5676 = sst [smem:[#allocation13_spill]] %s5649_s0 }
   0x2   :  { %5677 = sst [smem:[#allocation14_spill]] %s5650_s1 }
   0x3   :  { %5678 = sst [smem:[#allocation15_spill]] %s5651_s2 }
   0x4   :  { %22 = vsyncpa [#allocation7], 0 }
   0x5   :  { %24 = vsyncpa [#allocation7 + $0x1], 0  ;;  %s4525_s24 = smov 0   ;;  %s4527_s25 = smov 0  }
   0x6   :  { %s4529_s26 = smov 0   ;;  %s4531_s27 = smov 0  }
   0x7 LB: > { %5679 = sst [smem:[#allocation9_spill]] %s4423_s26  ;;  %s4546_s28 = sadd.s32 4294967295, %s4427_s27   ;;  %s4427_s27 = sphi %s4531_s27, %s5691_s27   ;;  %s4423_s26 = sphi %s4529_s26, %s5693_s26   ;;  %s4419_s25 = sphi %s4527_s25, %s5695_s25   ;;  %s4415_s24 = sphi %s4525_s24, %s5694_s24  }
   0x8   : > { %s3600_s29 = sadd.s32 4294967294, %s4427_s27   ;;  %s4550_s0 = sadd.s32 1, %s4427_s27  }
   0x9   : > { %5680 = sst [smem:[#allocation10_spill]] %s4550_s0  ;;  %s399_s30 = sadd.s32 1, %s4423_s26 }
   0xa   : > { %s396_s18 = ssub.s32 %s4427_s27, %s4550_s0  ;;  %p409_p0 = scmp.ne.s32.totalorder %s4423_s26, %s4419_s25 }
   0xb   : > { %p397_p1 = scmp.eq.s32.totalorder %s396_s18, 0  ;;  %p410_p2 = scmp.eq.s32.totalorder %s4546_s28, 1 }
   0xc   : > { %p415_p3 = scmp.ne.s32.totalorder %s4419_s25, %s4415_s24  ;;  %p416_p4 = scmp.eq.s32.totalorder %s3600_s29, 1 }
   0xd   : > { %s4561_s19 = scalar_select %p397_p1, %s4423_s26, %s399_s30  }
   0xe   : > { %p4563_p5 = por %p410_p2, %p409_p0  ;;  %p4567_p6 = por %p416_p4, %p415_p3 }
   0xf   : > { %5681 = sst [smem:[#allocation11_spill]] %s4561_s19  ;;  %p3603_p7 = scmp.ge.s32.totalorder %s4427_s27, 1 }
  0x10   : > { %s5683_s20 = scalar_select %p4567_p6, 1, 0 }
  0x11   : > { %p490_p8 = scmp.lt.s32.totalorder %s4427_s27, 3 }
  0x12   : > { %5684 = sst [smem:[#allocation12_spill]] %s5683_s20 }
  0x13   : > { %p491_p9 = pnand %p3603_p7, %p490_p8 }
  0x14   : > { %p541_p10 = scmp.lt.s32.totalorder (!%p491_p9), %s4546_s28, 1  ;;  %vm547_vm0 = vcmask (!%p491_p9), 261120   ;;  %v4429_v0 = vmov (!%p491_p9), 0   ;;  %v4430_v1 = vmov (!%p491_p9), 0.0   ;;  %vm550_vm1 = vcmask (!%p491_p9), 254976   ;;  %s5685_s30 = sld [smem:[#allocation13_spill]] (!%p491_p9) }
  0x15   : > { %494 = sbr.rel (%p491_p9) target bundleno = 6590 (0x19be), region = 88  ;;  %4193 = vset.pattern.permute.xlu1 (!%p491_p9), %v4429_v0  ;;  %548 = vst.msk [vmem:[#allocation2] sm:$0xff] (!%p491_p9), %vm547_vm0, %v4430_v1  ;;  %549 = vst.msk [vmem:[#allocation2 + $0x8] sm:$0xff] (!%p491_p9), %vm547_vm0, %v4430_v1  ;;  %4194 = vset.pattern.permute.xlu0 (!%p491_p9), %v4429_v0  ;;  %vm558_vm2 = vcmask (!%p491_p9), 7168   ;;  %v4195_v8 = vld [vmem:[%s5652_s3] sm:$0xff] (!%p491_p9)   ;;  %v4196_v12 = vld [vmem:[%s5652_s3 + $0x8] sm:$0xff] (!%p491_p9)  }
  0x16   : > { %551 = vst.msk [vmem:[#allocation2 + $0x10] sm:$0x3] (!%p491_p9), %vm550_vm1, %v4430_v1  ;;  %3935 = vmatprep.subr.bf16.mxu0 (!%p491_p9), %v4430_v1  ;;  %3951 = vmatprep.subr.bf16.mxu1 (!%p491_p9), %v4430_v1  ;;  %v4197_v18 = vld [vmem:[%s5652_s3 + $0x10] sm:$0xff] (!%p491_p9)   ;;  %s5687_s2 = sld [smem:[#allocation15_spill]] (!%p491_p9)  ;;  %v4198_v30 = vld [vmem:[%s5652_s3 + $0x18] sm:$0xff] (!%p491_p9)   ;;  %v4199_v33 = vld [vmem:[%s5652_s3 + $0x20] sm:$0xff] (!%p491_p9)  }
  0x17   : > { %3936 = vmatpush3.bf16.msra.mxu0 (!%p491_p9), %v4195_v8  ;;  %vm4431_vm3 = vmmov (!%p491_p9), 0   ;;  %s5674_s19 = smov (!%p491_p9), 32   ;;  %v4200_v37 = vld [vmem:[%s5652_s3 + $0x28] sm:$0xff] (!%p491_p9)   ;;  %s5672_s26 = smov (!%p491_p9), 64   ;;  %vm645_vm4 = vcmask (!%p491_p9), 523520   ;;  %vm658_vm5 = vcmask (!%p491_p9), 785920  }
  0x18   : > { %3937 = vmatprep.subr.bf16.mxu0 (!%p491_p9), %v4430_v1  ;;  %3947 = vmatprep.mubr.msk.bf16.mxu0 (!%p491_p9), %vm4431_vm3, %v4430_v1  ;;  %vm719_vm6 = vcmask (!%p491_p9), 785408   ;;  %v4201_v49 = vld [vmem:[%s5654_s5] sm:$0xff] (!%p491_p9)   ;;  %v4202_v50 = vld [vmem:[%s5654_s5 + $0x8] sm:$0xff] (!%p491_p9)   ;;  %v4203_v51 = vld [vmem:[%s5654_s5 + $0x10] sm:$0xff] (!%p491_p9)   ;;  %s5689_s20 = smov (!%p491_p9), 32   ;;  %vm552_vm7 = vcmask (!%p491_p9), 523264  }
  0x19   : > { %3963 = vmatprep.mubr.msk.bf16.mxu1 (!%p491_p9), %vm4431_vm3, %v4430_v1  ;;  %3952 = vmatpush3.bf16.msra.mxu1 (!%p491_p9), %v4201_v49  ;;  %v4204_v52 = vld [vmem:[%s5654_s5 + $0x18] sm:$0xff] (!%p491_p9)   ;;  %v4667_v53 = vld [vmem:[%s5653_s4] ss:$0 sm:$0xff] (!%p491_p9)  ;;  %v4206_v63 = vld [vmem:[%s5654_s5 + $0x28] sm:$0xff] (!%p491_p9)   ;;  %vm554_vm8 = vcmask (!%p491_p9), 517120   ;;  %553 = vst.msk [vmem:[#allocation4] sm:$0xff] (!%p491_p9), %vm552_vm7, %v4430_v1 }
  0x1a   : > { %3953 = vmatprep.subr.bf16.mxu1 (!%p491_p9), %v4430_v1  ;;  %v4205_v58 = vld [vmem:[%s5654_s5 + $0x20] sm:$0xff] (!%p491_p9)   ;;  %555 = vst.msk [vmem:[#allocation4 + $0x8] sm:$0x3] (!%p491_p9), %vm554_vm8, %v4430_v1  ;;  %vm1836_vm9 = vcmask (!%p491_p9), 1048064   ;;  %vm3134_vm10 = vcmask (!%p491_p9), 519168   ;;  %vm3530_vm11 = vcmask (!%p491_p9), 32768  }
  0x1b   : > { %3938 = vmatpush3.bf16.msra.mxu0 (!%p491_p9), %v4196_v12 }
  0x1c   : > { %s542_s21 = scalar_select %p541_p10, %s4546_s28, 1  ;;  %3939 = vmatprep.subr.bf16.mxu0 %v4430_v1  ;;  %v3609_v25 = vld [vmem:[%s5687_s2] ss:$0 sm:$0xff] }
  0x1d   : > { %3954 = vmatpush3.bf16.msra.mxu1 %v4202_v50  ;;  %s4434_s2 = smov [#allocation6]  }
  0x1e   : > { %s3846_s22 = sshll.u32 %s542_s21, 4  ;;  %3955 = vmatprep.subr.bf16.mxu1 %v4430_v1  ;;  %s5688_s21 = smov 64  }
  0x1f   : > { %s545_s18 = scalar_lea.vmem %s5685_s30, %s3846_s22  ;;  %3940 = vmatpush3.bf16.msra.mxu0 %v4197_v18  ;;  %s539_s22 = sand.u32 1, %s4419_s25  }
  0x20   : > { %v556_v2 = vld [vmem:[%s545_s18] sm:$0xff]  ;;  %v557_v3 = vld [vmem:[%s545_s18 + $0x8] sm:$0xff]  ;;  %s5686_s18 = sld [smem:[#allocation14_spill]]  ;;  %3941 = vmatprep.subr.bf16.mxu0 %v4430_v1  ;;  %s4369_s0 = sshll.u32 %s4434_s2, 4  ;;  %s4370_s0 = int_to_ptr.vmem [resolvable:$false] %s4369_s0 }
  0x21   : > { %585 = vperm.xlu1 %4193, %v556_v2   ;;  %559 = vst.msk [vmem:[#allocation2 + $0x1] sm:$0xff] %vm558_vm2, %v556_v2  ;;  %560 = vst.msk [vmem:[#allocation2 + $0x9] sm:$0xff] %vm558_vm2, %v557_v3  ;;  %3956 = vmatpush3.bf16.msra.mxu1 %v4203_v51  ;;  %v4217_v51 = vld [vmem:[%s5654_s5 + $0x20] sm:$0xff]   ;;  %s4371_s29 = scalar_lea.vmem %s4370_s0, 32 }
  0x22   : > { %3957 = vmatprep.subr.bf16.mxu1 %v4430_v1 }
  0x23   : > { %3942 = vmatpush3.bf16.msra.mxu0 %v4198_v30 }
  0x24   : > { %3943 = vmatprep.subr.bf16.mxu0 %v4430_v1 }
  0x25   : > { %590 = vperm.xlu1 %4193, %v557_v3   ;;  %3958 = vmatpush3.bf16.msra.mxu1 %v4204_v52 }
  0x26   : > { %v3607_v13 = vld [vmem:[%s5686_s18 + $0x1] ss:$0 sm:$0xff]  ;;  %v3606_v14 = vld [vmem:[%s5686_s18] ss:$0 sm:$0xff]  ;;  %v3608_v15 = vld [vmem:[%s5686_s18 + $0x2] ss:$0 sm:$0xff]  ;;  %3959 = vmatprep.subr.bf16.mxu1 %v4430_v1 }
  0x27   : > { %3944 = vmatpush3.bf16.msra.mxu0 %v4199_v33 }
  0x28   : > { %v564_v4 = vld [vmem:[#allocation2 + $0xa] sm:$0xff]  ;;  %v561_v6 = vld [vmem:[#allocation2] sm:$0xff]  ;;  %3945 = vmatprep.subr.bf16.mxu0 %v4430_v1 }
  0x29   : > { %v562_v5 = vld [vmem:[#allocation2 + $0x8] sm:$0xff]  ;;  %609 = vperm.xlu1 %4193, %v564_v4   ;;  %568 = vperm.xlu0 %4194, %v561_v6  }
  0x2a   : > { %v563_v7 = vld [vmem:[#allocation2 + $0x2] sm:$0xff]  ;;  %3960 = vmatpush3.bf16.msra.mxu1 %v4205_v58 }
  0x2b   : > { %3946 = vmatpush3.bf16.msra.mxu0 %v4200_v37  ;;  %3961 = vmatprep.subr.bf16.mxu1 %v4430_v1 }
  0x2c   : > { %3967 = vmatprep.subr.bf16.mxu0 %v4430_v1 }
  0x2d   : > { %573 = vperm.xlu0 %4194, %v562_v5  }
  0x2e   : > { %3962 = vmatpush3.bf16.msra.mxu1 %v4206_v63 }
  0x2f   : > { %3983 = vmatprep.subr.bf16.mxu1 %v4430_v1 }
  0x31   : > { %604 = vperm.xlu0 %4194, %v563_v7  }
  0xa0   : > { %v586_v9 = vpop.permute.xlu1 %585 }
  0xa1   : > { %v597_v19 = vmul.f32 %v3607_v13, %v586_v9 }
  0xa4   : > { %v591_v10 = vpop.permute.xlu1 %590 }
  0xa5   : > { %v598_v20 = vmul.f32 %v3607_v13, %v591_v10  ;;  %v4207_v13 = vld [vmem:[%s5652_s3] sm:$0xff]  }
  0xa8   : > { %v569_v11 = vpop.permute.xlu0 %568  ;;  %v610_v16 = vpop.permute.xlu1 %609 }
  0xa9   : > { %v580_v21 = vmul.f32 %v3606_v14, %v569_v11  ;;  %v617_v23 = vmul.f32 %v3608_v15, %v610_v16  ;;  %v4710_v16 = vld [vmem:[%s5655_s6] ss:$0 sm:$0xff] }
  0xab   : > { %v599_v27 = vadd.f32 %v597_v19, %v580_v21 }
  0xac   : > { %v574_v17 = vpop.permute.xlu0 %573 }
  0xad   : > { %v581_v22 = vmul.f32 %v3606_v14, %v574_v17  ;;  %v4208_v14 = vld [vmem:[%s5652_s3 + $0x8] sm:$0xff]   ;;  %v4210_v17 = vld [vmem:[%s5652_s3 + $0x18] sm:$0xff]  }
  0xaf   : > { %v600_v24 = vadd.f32 %v598_v20, %v581_v22 }
  0xb0   : > { %v605_v26 = vpop.permute.xlu0 %604 }
  0xb1   : > { %v619_v28 = vadd.f32 %v617_v23, %v600_v24  ;;  %v616_v29 = vmul.f32 %v3608_v15, %v605_v26  ;;  %v4209_v15 = vld [vmem:[%s5652_s3 + $0x10] sm:$0xff]  }
  0xb3   : > { %v628_v31 = vadd.f32 %v3609_v25, %v619_v28  ;;  %v618_v32 = vadd.f32 %v616_v29, %v599_v27  ;;  %v4212_v29 = vld [vmem:[%s5652_s3 + $0x28] sm:$0xff]  }
  0xb5   : > { %v4618_v34 = vmax.f32 %v628_v31, 0.0  ;;  %v627_v35 = vadd.f32 %v3609_v25, %v618_v32  ;;  %v4211_v25 = vld [vmem:[%s5652_s3 + $0x20] sm:$0xff]  }
  0xb7   : > { %632 = vst.msk [vmem:[#allocation2 + $0x9] sm:$0xff] %vm547_vm0, %v4618_v34  ;;  %v4626_v36 = vmax.f32 %v627_v35, 0.0  ;;  %641 = vrot.lane.b32.xlu1 %v4618_v34, %s5674_s19 }
  0xb9   : > { %631 = vst.msk [vmem:[#allocation2 + $0x1] sm:$0xff] %vm547_vm0, %v4626_v36  ;;  %639 = vrot.lane.b32.xlu0 %v4626_v36, %s5674_s19 }
  0xbe   : > { %v649_v38 = vld [vmem:[#allocation2 + $0xa] sm:$0xff] }
  0xbf   : > { %654 = vrot.lane.b32.xlu1 %v649_v38, %s5672_s26 }
  0xc0   : > { %v634_v39 = vld [vmem:[#allocation2 + $0x8] sm:$0xff]  ;;  %v633_v41 = vld [vmem:[#allocation2] sm:$0xff] }
  0xc1   : > { %v648_v40 = vld [vmem:[#allocation2 + $0x2] sm:$0xff]  ;;  %636 = vst.msk [vmem:[#allocation3 + $0x8] sm:$0xff] %vm547_vm0, %v634_v39  ;;  %635 = vst.msk [vmem:[#allocation3] sm:$0xff] %vm547_vm0, %v633_v41 }
  0xc2   : > { %652 = vrot.lane.b32.xlu0 %v648_v40, %s5672_s26 }
 0x129   : > { %v642_v42 = vpop.permute.xlu1 %641 }
 0x12a   : > { %647 = vst.msk [vmem:[#allocation3 + $0x8] sm:$0xff] %vm645_vm4, %v642_v42 }
 0x12b   : > { %v640_v43 = vpop.permute.xlu0 %639 }
 0x12c   : > { %646 = vst.msk [vmem:[#allocation3] sm:$0xff] %vm645_vm4, %v640_v43  ;;  %v4213_v43 = vld [vmem:[%s5654_s5] sm:$0xff]  }
 0x131   : > { %v655_v44 = vpop.permute.xlu1 %654 }
 0x132   : > { %660 = vst.msk [vmem:[#allocation3 + $0x8] sm:$0xff] %vm658_vm5, %v655_v44  ;;  %v4214_v44 = vld [vmem:[%s5654_s5 + $0x8] sm:$0xff]  }
 0x134   : > { %v653_v45 = vpop.permute.xlu0 %652 }
 0x135   : > { %659 = vst.msk [vmem:[#allocation3] sm:$0xff] %vm658_vm5, %v653_v45  ;;  %v4215_v45 = vld [vmem:[%s5654_s5 + $0x10] sm:$0xff]  }
 0x139   : > { %v662_v47 = vld [vmem:[#allocation3 + $0x8] sm:$0xff] }
 0x13c   : > { %v661_v46 = vld [vmem:[#allocation3] sm:$0xff] }
 0x13d   : > { %v663_v48 = vpack.c.bf16 %v662_v47, %v661_v46  ;;  %v4216_v46 = vld [vmem:[%s5654_s5 + $0x18] sm:$0xff]  }
 0x13f   : > { %3948 = vmatmul.mubr.msk.bf16.vlgmr.msra.gmra.mrb[0].mxu0 %vm719_vm6, %v663_v48 }
 0x140   : > { %3979 = vmatprep.mubr.msk.bf16.mxu0 %vm4431_vm3, %v4430_v1  ;;  %3968 = vmatpush3.bf16.msra.mxu0 %v4207_v13 }
 0x141   : > { %3969 = vmatprep.subr.bf16.mxu0 %v4430_v1 }
 0x144   : > { %3970 = vmatpush3.bf16.msra.mxu0 %v4208_v14 }
 0x145   : > { %3971 = vmatprep.subr.bf16.mxu0 %v4430_v1 }
 0x148   : > { %3972 = vmatpush3.bf16.msra.mxu0 %v4209_v15 }
 0x149   : > { %3973 = vmatprep.subr.bf16.mxu0 %v4430_v1 }
 0x14c   : > { %3974 = vmatpush3.bf16.msra.mxu0 %v4210_v17 }
 0x14d   : > { %3975 = vmatprep.subr.bf16.mxu0 %v4430_v1 }
 0x150   : > { %3976 = vmatpush3.bf16.msra.mxu0 %v4211_v25  ;;  %v4224_v25 = vld [vmem:[%s5652_s3 + $0x28] sm:$0xff]  }
 0x151   : > { %3977 = vmatprep.subr.bf16.mxu0 %v4430_v1 }
 0x154   : > { %3978 = vmatpush3.bf16.msra.mxu0 %v4212_v29 }
 0x155   : > { %3999 = vmatprep.subr.bf16.mxu0 %v4430_v1 }
 0x212   : > { %v757_v54 = vpop.f32.mrb[0].mxu0 }
 0x213   : > { %v758_v55 = vadd.f32 %v4667_v53, %v757_v54  ;;  %v3949_v56 = vpop.f32.mrb[1].mxu0 }
 0x214   : > { %v760_v57 = vpop.f32.mrb[2].mxu0 }
 0x215   : > { %v764_v59 = vmax.f32 %v758_v55, 0.0  ;;  %v761_v60 = vadd.f32 %v4667_v53, %v760_v57  ;;  %v3950_v61 = vpop.f32.mrb[3].mxu0  ;;  %v4218_v57 = vld [vmem:[%s5654_s5 + $0x28] sm:$0xff]  }
 0x217   : > { %766 = vst.msk [vmem:[#allocation2 + $0x1] sm:$0xff] %vm547_vm0, %v764_v59  ;;  %v765_v62 = vmax.f32 %v761_v60, 0.0  ;;  %774 = vrot.lane.b32.xlu0 %v764_v59, %s5674_s19 }
 0x219   : > { %767 = vst.msk [vmem:[#allocation2 + $0x9] sm:$0xff] %vm547_vm0, %v765_v62  ;;  %776 = vrot.lane.b32.xlu1 %v765_v62, %s5674_s19  ;;  %s540_s19 = scalar_lea.vmem [#allocation6], %s539_s22 }
 0x21a   : > { %s3545_s23 = sshll.u32 %s540_s19, 4  ;;  %s5609_s23 = int_to_ptr.vmem [resolvable:$true] %s3545_s23 }
 0x21b   : > { %s4365_s30 = scalar_lea.vmem %s5609_s23, 16  ;;  %p4372_p0 = scmp.lt.s32.totalorder %s5609_s23, %s4370_s0 }
 0x21c   : > { %p4366_p11 = scmp.ne.s32.totalorder %s5609_s23, %s4365_s30  ;;  %p4373_p1 = scmp.lt.s32.totalorder %s4371_s29, %s4365_s30 }
 0x21e   : > { %v768_v2 = vld [vmem:[#allocation2] sm:$0xff]  ;;  %p4367_p12 = pnand %p4366_p11, %p4563_p5  ;;  %p4374_p2 = por %p4373_p1, %p4372_p0 }
 0x21f   : > { %770 = vst.msk [vmem:[#allocation3] sm:$0xff] %vm547_vm0, %v768_v2 }
 0x220   : > { %v783_v3 = vld [vmem:[#allocation2 + $0xa] sm:$0xff]  ;;  %v782_v4 = vld [vmem:[#allocation2 + $0x2] sm:$0xff]  ;;  %p4368_p13 = pneg %p4367_p12 }
 0x221   : > { %v769_v5 = vld [vmem:[#allocation2 + $0x8] sm:$0xff]  ;;  %788 = vrot.lane.b32.xlu1 %v783_v3, %s5688_s21  ;;  %786 = vrot.lane.b32.xlu0 %v782_v4, %s5688_s21 }
 0x222   : > { %771 = vst.msk [vmem:[#allocation3 + $0x8] sm:$0xff] %vm547_vm0, %v769_v5  ;;  %p4375_p3 = pnand %p4374_p2, %p4368_p13 }
 0x289   : > { %v775_v6 = vpop.permute.xlu0 %774 }
 0x28a   : > { %780 = vst.msk [vmem:[#allocation3] sm:$0xff] %vm645_vm4, %v775_v6 }
 0x28b   : > { %v777_v7 = vpop.permute.xlu1 %776 }
 0x28c   : > { %781 = vst.msk [vmem:[#allocation3 + $0x8] sm:$0xff] %vm645_vm4, %v777_v7  ;;  %v4219_v7 = vld [vmem:[%s5652_s3] sm:$0xff]  }
 0x293   : > { %v789_v8 = vpop.permute.xlu1 %788  ;;  %v787_v9 = vpop.permute.xlu0 %786 }
 0x294   : > { %793 = vst.msk [vmem:[#allocation3 + $0x8] sm:$0xff] %vm658_vm5, %v789_v8  ;;  %792 = vst.msk [vmem:[#allocation3] sm:$0xff] %vm658_vm5, %v787_v9  ;;  %v4220_v8 = vld [vmem:[%s5652_s3 + $0x8] sm:$0xff]   ;;  %v4221_v9 = vld [vmem:[%s5652_s3 + $0x10] sm:$0xff]  }
 0x29b   : > { %v794_v10 = vld [vmem:[#allocation3] sm:$0xff]  ;;  %v795_v11 = vld [vmem:[#allocation3 + $0x8] sm:$0xff] }
 0x29c   : > { %v796_v12 = vpack.c.bf16 %v795_v11, %v794_v10  ;;  %v4222_v10 = vld [vmem:[%s5652_s3 + $0x18] sm:$0xff]  }
 0x29e   : > { %3964 = vmatmul.mubr.msk.bf16.vlgmr.msra.gmra.mrb[0].mxu1 %vm719_vm6, %v796_v12 }
 0x29f   : > { %3995 = vmatprep.mubr.msk.bf16.mxu1 %vm4431_vm3, %v4430_v1  ;;  %3984 = vmatpush3.bf16.msra.mxu1 %v4213_v43 }
 0x2a0   : > { %3985 = vmatprep.subr.bf16.mxu1 %v4430_v1 }
 0x2a3   : > { %3986 = vmatpush3.bf16.msra.mxu1 %v4214_v44 }
 0x2a4   : > { %3987 = vmatprep.subr.bf16.mxu1 %v4430_v1 }
 0x2a7   : > { %3988 = vmatpush3.bf16.msra.mxu1 %v4215_v45 }
 0x2a8   : > { %3989 = vmatprep.subr.bf16.mxu1 %v4430_v1 }
 0x2ab   : > { %3990 = vmatpush3.bf16.msra.mxu1 %v4216_v46 }
 0x2ac   : > { %3991 = vmatprep.subr.bf16.mxu1 %v4430_v1 }
 0x2af   : > { %3992 = vmatpush3.bf16.msra.mxu1 %v4217_v51 }
 0x2b0   : > { %3993 = vmatprep.subr.bf16.mxu1 %v4430_v1 }
 0x2b3   : > { %3994 = vmatpush3.bf16.msra.mxu1 %v4218_v57 }
 0x2b4   : > { %4015 = vmatprep.subr.bf16.mxu1 %v4430_v1 }
 0x371   : > { %v889_v18 = vpop.f32.mrb[0].mxu1 }
 0x372   : > { %v4717_v19 = vadd.f32 %v4710_v16, %v889_v18  ;;  %v3965_v20 = vpop.f32.mrb[1].mxu1 }
 0x373   : > { %v892_v21 = vpop.f32.mrb[2].mxu1  ;;  %v4223_v20 = vld [vmem:[%s5652_s3 + $0x20] sm:$0xff]  }
 0x374   : > { %v4720_v22 = vmul.f32 0.33333334, %v4717_v19  ;;  %v4723_v23 = vadd.f32 %v4710_v16, %v892_v21  ;;  %v3966_v24 = vpop.f32.mrb[3].mxu1 }
 0x376   : > { %v4730_v26 = vmul.f32 0.33333334, %v4723_v23  ;;  %v898_v27 = vadd.f32 %v4720_v22, %v4626_v36 }
 0x378   : > { %908 = vrot.lane.b32.xlu0 %v898_v27, %s5689_s20  ;;  %900 = vst.msk [vmem:[#allocation2 + $0x1] sm:$0xff] %vm547_vm0, %v898_v27  ;;  %v899_v28 = vadd.f32 %v4730_v26, %v4618_v34 }
 0x37a   : > { %910 = vrot.lane.b32.xlu1 %v899_v28, %s5689_s20  ;;  %901 = vst.msk [vmem:[#allocation2 + $0x9] sm:$0xff] %vm547_vm0, %v899_v28 }
 0x37f   : > { %v902_v30 = vld [vmem:[#allocation2] sm:$0xff] }
 0x380   : > { %904 = vst.msk [vmem:[#allocation3] sm:$0xff] %vm547_vm0, %v902_v30 }
 0x381   : > { %v917_v31 = vld [vmem:[#allocation2 + $0xa] sm:$0xff]  ;;  %v916_v32 = vld [vmem:[#allocation2 + $0x2] sm:$0xff] }
 0x382   : > { %v903_v33 = vld [vmem:[#allocation2 + $0x8] sm:$0xff]  ;;  %922 = vrot.lane.b32.xlu1 %v917_v31, %s5688_s21  ;;  %920 = vrot.lane.b32.xlu0 %v916_v32, %s5688_s21 }
 0x383   : > { %905 = vst.msk [vmem:[#allocation3 + $0x8] sm:$0xff] %vm547_vm0, %v903_v33 }
 0x3ea   : > { %v909_v35 = vpop.permute.xlu0 %908 }
 0x3eb   : > { %914 = vst.msk [vmem:[#allocation3] sm:$0xff] %vm645_vm4, %v909_v35 }
 0x3ec   : > { %v911_v37 = vpop.permute.xlu1 %910 }
 0x3ed   : > { %915 = vst.msk [vmem:[#allocation3 + $0x8] sm:$0xff] %vm645_vm4, %v911_v37 }
 0x3f4   : > { %v923_v38 = vpop.permute.xlu1 %922  ;;  %v921_v39 = vpop.permute.xlu0 %920 }
 0x3f5   : > { %927 = vst.msk [vmem:[#allocation3 + $0x8] sm:$0xff] %vm658_vm5, %v923_v38  ;;  %926 = vst.msk [vmem:[#allocation3] sm:$0xff] %vm658_vm5, %v921_v39  ;;  %v4225_v39 = vld [vmem:[%s5654_s5] sm:$0xff]  }
 0x3fc   : > { %v928_v40 = vld [vmem:[#allocation3] sm:$0xff]  ;;  %v929_v41 = vld [vmem:[#allocation3 + $0x8] sm:$0xff] }
 0x3fd   : > { %v930_v42 = vpack.c.bf16 %v929_v41, %v928_v40  ;;  %v4226_v40 = vld [vmem:[%s5654_s5 + $0x8] sm:$0xff]   ;;  %v4227_v41 = vld [vmem:[%s5654_s5 + $0x10] sm:$0xff]  }
 0x3ff   : > { %3980 = vmatmul.mubr.msk.bf16.vlgmr.msra.gmra.mrb[4].mxu0 %vm719_vm6, %v930_v42  ;;  %v4228_v42 = vld [vmem:[%s5654_s5 + $0x18] sm:$0xff]  }
 0x400   : > { %4011 = vmatprep.mubr.msk.bf16.mxu0 %vm4431_vm3, %v4430_v1  ;;  %4000 = vmatpush3.bf16.msra.mxu0 %v4219_v7  ;;  %v4234_v7 = vld [vmem:[%s5652_s3 + $0x18] sm:$0xff]  }
 0x401   : > { %4001 = vmatprep.subr.bf16.mxu0 %v4430_v1 }
 0x404   : > { %4002 = vmatpush3.bf16.msra.mxu0 %v4220_v8 }
 0x405   : > { %4003 = vmatprep.subr.bf16.mxu0 %v4430_v1 }
 0x408   : > { %4004 = vmatpush3.bf16.msra.mxu0 %v4221_v9 }
 0x409   : > { %4005 = vmatprep.subr.bf16.mxu0 %v4430_v1 }
 0x40c   : > { %4006 = vmatpush3.bf16.msra.mxu0 %v4222_v10 }
 0x40d   : > { %4007 = vmatprep.subr.bf16.mxu0 %v4430_v1 }
 0x410   : > { %4008 = vmatpush3.bf16.msra.mxu0 %v4223_v20 }
 0x411   : > { %4009 = vmatprep.subr.bf16.mxu0 %v4430_v1 }
 0x414   : > { %4010 = vmatpush3.bf16.msra.mxu0 %v4224_v25  ;;  %v4235_v25 = vld [vmem:[%s5652_s3 + $0x20] sm:$0xff]  }
 0x415   : > { %4031 = vmatprep.subr.bf16.mxu0 %v4430_v1 }
 0x4d2   : > { %v1023_v47 = vpop.f32.mrb[4].mxu0 }
 0x4d3   : > { %v1024_v48 = vadd.f32 %v4667_v53, %v1023_v47  ;;  %v3981_v49 = vpop.f32.mrb[5].mxu0  ;;  %v4229_v47 = vld [vmem:[%s5654_s5 + $0x20] sm:$0xff]  }
 0x4d4   : > { %v1026_v50 = vpop.f32.mrb[6].mxu0 }
 0x4d5   : > { %v1030_v52 = vmax.f32 %v1024_v48, 0.0  ;;  %v1027_v54 = vadd.f32 %v4667_v53, %v1026_v50  ;;  %v3982_v55 = vpop.f32.mrb[7].mxu0 }
 0x4d7   : > { %1032 = vst.msk [vmem:[#allocation2 + $0x1] sm:$0xff] %vm547_vm0, %v1030_v52  ;;  %v1031_v56 = vmax.f32 %v1027_v54, 0.0  ;;  %1040 = vrot.lane.b32.xlu0 %v1030_v52, %s5689_s20  ;;  %v4230_v52 = vld [vmem:[%s5654_s5 + $0x28] sm:$0xff]  }
 0x4d9   : > { %1033 = vst.msk [vmem:[#allocation2 + $0x9] sm:$0xff] %vm547_vm0, %v1031_v56  ;;  %1042 = vrot.lane.b32.xlu1 %v1031_v56, %s5689_s20 }
 0x4de   : > { %v1034_v58 = vld [vmem:[#allocation2] sm:$0xff] }
 0x4df   : > { %1036 = vst.msk [vmem:[#allocation3] sm:$0xff] %vm547_vm0, %v1034_v58 }
 0x4e0   : > { %v1049_v59 = vld [vmem:[#allocation2 + $0xa] sm:$0xff]  ;;  %v1048_v60 = vld [vmem:[#allocation2 + $0x2] sm:$0xff] }
 0x4e1   : > { %v1035_v61 = vld [vmem:[#allocation2 + $0x8] sm:$0xff]  ;;  %1054 = vrot.lane.b32.xlu1 %v1049_v59, %s5688_s21  ;;  %1052 = vrot.lane.b32.xlu0 %v1048_v60, %s5688_s21 }
 0x4e2   : > { %1037 = vst.msk [vmem:[#allocation3 + $0x8] sm:$0xff] %vm547_vm0, %v1035_v61 }
 0x549   : > { %v1041_v62 = vpop.permute.xlu0 %1040 }
 0x54a   : > { %1046 = vst.msk [vmem:[#allocation3] sm:$0xff] %vm645_vm4, %v1041_v62 }
 0x54b   : > { %v1043_v63 = vpop.permute.xlu1 %1042 }
 0x54c   : > { %1047 = vst.msk [vmem:[#allocation3 + $0x8] sm:$0xff] %vm645_vm4, %v1043_v63 }
 0x553   : > { %v1055_v2 = vpop.permute.xlu1 %1054  ;;  %v1053_v3 = vpop.permute.xlu0 %1052 }
 0x554   : > { %1059 = vst.msk [vmem:[#allocation3 + $0x8] sm:$0xff] %vm658_vm5, %v1055_v2  ;;  %1058 = vst.msk [vmem:[#allocation3] sm:$0xff] %vm658_vm5, %v1053_v3  ;;  %v4231_v3 = vld [vmem:[%s5652_s3] sm:$0xff]  }
 0x55b   : > { %v1060_v4 = vld [vmem:[#allocation3] sm:$0xff]  ;;  %v1061_v5 = vld [vmem:[#allocation3 + $0x8] sm:$0xff] }
 0x55c   : > { %v1062_v6 = vpack.c.bf16 %v1061_v5, %v1060_v4  ;;  %v4232_v4 = vld [vmem:[%s5652_s3 + $0x8] sm:$0xff]   ;;  %v4233_v5 = vld [vmem:[%s5652_s3 + $0x10] sm:$0xff]  }
 0x55e   : > { %3996 = vmatmul.mubr.msk.bf16.vlgmr.msra.gmra.mrb[4].mxu1 %vm719_vm6, %v1062_v6 }
 0x55f   : > { %4027 = vmatprep.mubr.msk.bf16.mxu1 %vm4431_vm3, %v4430_v1  ;;  %4016 = vmatpush3.bf16.msra.mxu1 %v4225_v39 }
 0x560   : > { %4017 = vmatprep.subr.bf16.mxu1 %v4430_v1 }
 0x563   : > { %4018 = vmatpush3.bf16.msra.mxu1 %v4226_v40 }
 0x564   : > { %4019 = vmatprep.subr.bf16.mxu1 %v4430_v1 }
 0x567   : > { %4020 = vmatpush3.bf16.msra.mxu1 %v4227_v41 }
 0x568   : > { %4021 = vmatprep.subr.bf16.mxu1 %v4430_v1 }
 0x56b   : > { %4022 = vmatpush3.bf16.msra.mxu1 %v4228_v42 }
 0x56c   : > { %4023 = vmatprep.subr.bf16.mxu1 %v4430_v1 }
 0x56f   : > { %4024 = vmatpush3.bf16.msra.mxu1 %v4229_v47 }
 0x570   : > { %4025 = vmatprep.subr.bf16.mxu1 %v4430_v1 }
 0x573   : > { %4026 = vmatpush3.bf16.msra.mxu1 %v4230_v52 }
 0x574   : > { %4047 = vmatprep.subr.bf16.mxu1 %v4430_v1 }
 0x631   : > { %v1155_v11 = vpop.f32.mrb[4].mxu1 }
 0x632   : > { %v4813_v12 = vadd.f32 %v4710_v16, %v1155_v11  ;;  %v3997_v13 = vpop.f32.mrb[5].mxu1 }
 0x633   : > { %v1158_v14 = vpop.f32.mrb[6].mxu1 }
 0x634   : > { %v1166_v15 = vsub.f32 %v4813_v12, %v4720_v22  ;;  %v4818_v17 = vadd.f32 %v4710_v16, %v1158_v14  ;;  %v3998_v18 = vpop.f32.mrb[7].mxu1  ;;  %v1162_v6 = vmul.f32 3.0, %v4813_v12  ;;  %v1436_v11 = vsub.f32 %v4717_v19, %v4813_v12 }
 0x636   : > { %v1167_v21 = vsub.f32 %v4818_v17, %v4730_v26  ;;  %v1168_v24 = vadd.f32 %v1166_v15, %v4626_v36  ;;  %v1163_v8 = vmul.f32 3.0, %v4818_v17  ;;  %v1437_v15 = vsub.f32 %v4723_v23, %v4818_v17 }
 0x638   : > { %1178 = vrot.lane.b32.xlu0 %v1168_v24, %s5689_s20  ;;  %1170 = vst.msk [vmem:[#allocation2 + $0x1] sm:$0xff] %vm547_vm0, %v1168_v24  ;;  %v1169_v22 = vadd.f32 %v1167_v21, %v4618_v34  ;;  %v1165_v12 = vadd.f32 %v1163_v8, %v4723_v23  ;;  %v4245_v8 = vld [vmem:[%s5656_s7 + $0x10] sm:$0xff]  }
 0x63a   : > { %1180 = vrot.lane.b32.xlu1 %v1169_v22, %s5689_s20  ;;  %1171 = vst.msk [vmem:[#allocation2 + $0x9] sm:$0xff] %vm547_vm0, %v1169_v22  ;;  %v1164_v22 = vadd.f32 %v1162_v6, %v4717_v19  ;;  %v4243_v6 = vld [vmem:[%s5656_s7] sm:$0xff]  }
 0x63f   : > { %v1172_v26 = vld [vmem:[#allocation2] sm:$0xff] }
 0x640   : > { %1174 = vst.msk [vmem:[#allocation3] sm:$0xff] %vm547_vm0, %v1172_v26 }
 0x641   : > { %v1187_v27 = vld [vmem:[#allocation2 + $0xa] sm:$0xff]  ;;  %v1186_v28 = vld [vmem:[#allocation2 + $0x2] sm:$0xff] }
 0x642   : > { %v1173_v29 = vld [vmem:[#allocation2 + $0x8] sm:$0xff]  ;;  %1192 = vrot.lane.b32.xlu1 %v1187_v27, %s5688_s21  ;;  %1190 = vrot.lane.b32.xlu0 %v1186_v28, %s5688_s21 }
 0x643   : > { %1175 = vst.msk [vmem:[#allocation3 + $0x8] sm:$0xff] %vm547_vm0, %v1173_v29  ;;  %v4236_v29 = vld [vmem:[%s5652_s3 + $0x28] sm:$0xff]  }
 0x6aa   : > { %v1179_v30 = vpop.permute.xlu0 %1178 }
 0x6ab   : > { %1184 = vst.msk [vmem:[#allocation3] sm:$0xff] %vm645_vm4, %v1179_v30 }
 0x6ac   : > { %v1181_v31 = vpop.permute.xlu1 %1180 }
 0x6ad   : > { %1185 = vst.msk [vmem:[#allocation3 + $0x8] sm:$0xff] %vm645_vm4, %v1181_v31 }
 0x6b4   : > { %v1193_v32 = vpop.permute.xlu1 %1192  ;;  %v1191_v33 = vpop.permute.xlu0 %1190 }
 0x6b5   : > { %1197 = vst.msk [vmem:[#allocation3 + $0x8] sm:$0xff] %vm658_vm5, %v1193_v32  ;;  %1196 = vst.msk [vmem:[#allocation3] sm:$0xff] %vm658_vm5, %v1191_v33 }
 0x6bc   : > { %v1198_v35 = vld [vmem:[#allocation3] sm:$0xff]  ;;  %v1199_v37 = vld [vmem:[#allocation3 + $0x8] sm:$0xff] }
 0x6bd   : > { %v1200_v38 = vpack.c.bf16 %v1199_v37, %v1198_v35 }
 0x6bf   : > { %4012 = vmatmul.mubr.msk.bf16.vlgmr.msra.gmra.mrb[8].mxu0 %vm719_vm6, %v1200_v38 }
 0x6c0   : > { %4043 = vmatprep.mubr.msk.bf16.mxu0 %vm4431_vm3, %v4430_v1  ;;  %4032 = vmatpush3.bf16.msra.mxu0 %v4231_v3 }
 0x6c1   : > { %4033 = vmatprep.subr.bf16.mxu0 %v4430_v1 }
 0x6c4   : > { %4034 = vmatpush3.bf16.msra.mxu0 %v4232_v4 }
 0x6c5   : > { %4035 = vmatprep.subr.bf16.mxu0 %v4430_v1 }
 0x6c8   : > { %4036 = vmatpush3.bf16.msra.mxu0 %v4233_v5 }
 0x6c9   : > { %4037 = vmatprep.subr.bf16.mxu0 %v4430_v1 }
 0x6cc   : > { %4038 = vmatpush3.bf16.msra.mxu0 %v4234_v7  ;;  %v4244_v7 = vld [vmem:[%s5656_s7 + $0x8] sm:$0xff]  }
 0x6cd   : > { %4039 = vmatprep.subr.bf16.mxu0 %v4430_v1 }
 0x6d0   : > { %4040 = vmatpush3.bf16.msra.mxu0 %v4235_v25 }
 0x6d1   : > { %4041 = vmatprep.subr.bf16.mxu0 %v4430_v1 }
 0x6d4   : > { %4042 = vmatpush3.bf16.msra.mxu0 %v4236_v29 }
 0x6d5   : > { %4063 = vmatprep.subr.bf16.mxu0 %v4430_v1 }
 0x792   : > { %v1293_v43 = vpop.f32.mrb[8].mxu0 }
 0x793   : > { %v1294_v44 = vadd.f32 %v4667_v53, %v1293_v43  ;;  %v4013_v45 = vpop.f32.mrb[9].mxu0  ;;  %v4237_v43 = vld [vmem:[%s5654_s5] sm:$0xff]  }
 0x794   : > { %v1296_v46 = vpop.f32.mrb[10].mxu0  ;;  %v4239_v45 = vld [vmem:[%s5654_s5 + $0x10] sm:$0xff]  }
 0x795   : > { %v1300_v48 = vmax.f32 %v1294_v44, 0.0  ;;  %v1297_v49 = vadd.f32 %v4667_v53, %v1296_v46  ;;  %v4014_v50 = vpop.f32.mrb[11].mxu0  ;;  %v4238_v44 = vld [vmem:[%s5654_s5 + $0x8] sm:$0xff]   ;;  %v4240_v46 = vld [vmem:[%s5654_s5 + $0x18] sm:$0xff]  }
 0x797   : > { %1302 = vst.msk [vmem:[#allocation2 + $0x1] sm:$0xff] %vm547_vm0, %v1300_v48  ;;  %v1301_v51 = vmax.f32 %v1297_v49, 0.0  ;;  %1310 = vrot.lane.b32.xlu0 %v1300_v48, %s5689_s20 }
 0x799   : > { %1303 = vst.msk [vmem:[#allocation2 + $0x9] sm:$0xff] %vm547_vm0, %v1301_v51  ;;  %1312 = vrot.lane.b32.xlu1 %v1301_v51, %s5689_s20  ;;  %v4241_v51 = vld [vmem:[%s5654_s5 + $0x20] sm:$0xff]  }
 0x79e   : > { %v1304_v54 = vld [vmem:[#allocation2] sm:$0xff] }
 0x79f   : > { %1306 = vst.msk [vmem:[#allocation3] sm:$0xff] %vm547_vm0, %v1304_v54 }
 0x7a0   : > { %v1319_v55 = vld [vmem:[#allocation2 + $0xa] sm:$0xff]  ;;  %v1318_v56 = vld [vmem:[#allocation2 + $0x2] sm:$0xff] }
 0x7a1   : > { %v1305_v57 = vld [vmem:[#allocation2 + $0x8] sm:$0xff]  ;;  %1324 = vrot.lane.b32.xlu1 %v1319_v55, %s5688_s21  ;;  %1322 = vrot.lane.b32.xlu0 %v1318_v56, %s5688_s21 }
 0x7a2   : > { %1307 = vst.msk [vmem:[#allocation3 + $0x8] sm:$0xff] %vm547_vm0, %v1305_v57  ;;  %v4242_v57 = vld [vmem:[%s5654_s5 + $0x28] sm:$0xff]  }
 0x809   : > { %v1311_v58 = vpop.permute.xlu0 %1310 }
 0x80a   : > { %1316 = vst.msk [vmem:[#allocation3] sm:$0xff] %vm645_vm4, %v1311_v58 }
 0x80b   : > { %v1313_v59 = vpop.permute.xlu1 %1312 }
 0x80c   : > { %1317 = vst.msk [vmem:[#allocation3 + $0x8] sm:$0xff] %vm645_vm4, %v1313_v59 }
 0x813   : > { %v1325_v60 = vpop.permute.xlu1 %1324  ;;  %v1323_v61 = vpop.permute.xlu0 %1322 }
 0x814   : > { %1329 = vst.msk [vmem:[#allocation3 + $0x8] sm:$0xff] %vm658_vm5, %v1325_v60  ;;  %1328 = vst.msk [vmem:[#allocation3] sm:$0xff] %vm658_vm5, %v1323_v61 }
 0x81b   : > { %v1330_v62 = vld [vmem:[#allocation3] sm:$0xff]  ;;  %v1331_v63 = vld [vmem:[#allocation3 + $0x8] sm:$0xff] }
 0x81c   : > { %v1332_v2 = vpack.c.bf16 %v1331_v63, %v1330_v62 }
 0x81e   : > { %4028 = vmatmul.mubr.msk.bf16.vlgmr.msra.gmra.mrb[8].mxu1 %vm719_vm6, %v1332_v2 }
 0x81f   : > { %4059 = vmatprep.mubr.msk.bf16.mxu1 %vm4431_vm3, %v4430_v1  ;;  %4048 = vmatpush3.bf16.msra.mxu1 %v4237_v43  ;;  %v3674_v43 = vld [vmem:[%s5657_s8] ss:$0 sm:$0xff] }
 0x820   : > { %4049 = vmatprep.subr.bf16.mxu1 %v4430_v1 }
 0x823   : > { %4050 = vmatpush3.bf16.msra.mxu1 %v4238_v44 }
 0x824   : > { %4051 = vmatprep.subr.bf16.mxu1 %v4430_v1 }
 0x827   : > { %4052 = vmatpush3.bf16.msra.mxu1 %v4239_v45 }
 0x828   : > { %4053 = vmatprep.subr.bf16.mxu1 %v4430_v1 }
 0x82b   : > { %4054 = vmatpush3.bf16.msra.mxu1 %v4240_v46 }
 0x82c   : > { %4055 = vmatprep.subr.bf16.mxu1 %v4430_v1 }
 0x82f   : > { %4056 = vmatpush3.bf16.msra.mxu1 %v4241_v51 }
 0x830   : > { %4057 = vmatprep.subr.bf16.mxu1 %v4430_v1 }
 0x833   : > { %4058 = vmatpush3.bf16.msra.mxu1 %v4242_v57 }
 0x834   : > { %1950 = vmatprep.subr.bf16.mxu1 %v4429_v0 }
 0x8f1   : > { %v1425_v9 = vpop.f32.mrb[8].mxu1 }
 0x8f2   : > { %v1426_v10 = vadd.f32 %v4710_v16, %v1425_v9  ;;  %v4029_v13 = vpop.f32.mrb[9].mxu1 }
 0x8f3   : > { %v1428_v14 = vpop.f32.mrb[10].mxu1 }
 0x8f4   : > { %v1432_v18 = vmul.f32 3.0, %v1426_v10  ;;  %v1438_v20 = vadd.f32 %v1436_v11, %v1426_v10  ;;  %v1429_v21 = vadd.f32 %v4710_v16, %v1428_v14  ;;  %v4030_v24 = vpop.f32.mrb[11].mxu1 }
 0x8f5   : > { %v4246_v24 = vld [vmem:[%s5656_s7 + $0x18] sm:$0xff]  }
 0x8f6   : > { %v1433_v26 = vmul.f32 3.0, %v1429_v21  ;;  %v1439_v27 = vadd.f32 %v1437_v15, %v1429_v21  ;;  %v1440_v17 = vadd.f32 %v1438_v20, %v4626_v36  ;;  %v4919_v28 = vadd.f32 %v1432_v18, %v1164_v22 }
 0x8f8   : > { %1450 = vrot.lane.b32.xlu0 %v1440_v17, %s5689_s20  ;;  %1442 = vst.msk [vmem:[#allocation2 + $0x1] sm:$0xff] %vm547_vm0, %v1440_v17  ;;  %v1441_v19 = vadd.f32 %v1439_v27, %v4618_v34  ;;  %v4927_v30 = vadd.f32 %v1433_v26, %v1165_v12  ;;  %v4247_v12 = vld [vmem:[%s5656_s7 + $0x20] sm:$0xff]   ;;  %v4248_v26 = vld [vmem:[%s5656_s7 + $0x28] sm:$0xff]  }
 0x8fa   : > { %1452 = vrot.lane.b32.xlu1 %v1441_v19, %s5689_s20  ;;  %1443 = vst.msk [vmem:[#allocation2 + $0x9] sm:$0xff] %vm547_vm0, %v1441_v19 }
 0x8ff   : > { %v1444_v23 = vld [vmem:[#allocation2] sm:$0xff] }
 0x900   : > { %1446 = vst.msk [vmem:[#allocation3] sm:$0xff] %vm547_vm0, %v1444_v23  ;;  %v4250_v23 = vld [vmem:[%s5658_s9 + $0x8] sm:$0xff]  }
 0x901   : > { %v1459_v31 = vld [vmem:[#allocation2 + $0xa] sm:$0xff]  ;;  %v1458_v32 = vld [vmem:[#allocation2 + $0x2] sm:$0xff] }
 0x902   : > { %v1445_v33 = vld [vmem:[#allocation2 + $0x8] sm:$0xff]  ;;  %1464 = vrot.lane.b32.xlu1 %v1459_v31, %s5688_s21  ;;  %1462 = vrot.lane.b32.xlu0 %v1458_v32, %s5688_s21  ;;  %v4251_v31 = vld [vmem:[%s5658_s9 + $0x10] sm:$0xff]   ;;  %v4252_v32 = vld [vmem:[%s5658_s9 + $0x18] sm:$0xff]  }
 0x903   : > { %1447 = vst.msk [vmem:[#allocation3 + $0x8] sm:$0xff] %vm547_vm0, %v1445_v33  ;;  %v4253_v33 = vld [vmem:[%s5658_s9 + $0x20] sm:$0xff]  }
 0x96a   : > { %v1451_v35 = vpop.permute.xlu0 %1450 }
 0x96b   : > { %1456 = vst.msk [vmem:[#allocation3] sm:$0xff] %vm645_vm4, %v1451_v35  ;;  %v4254_v35 = vld [vmem:[%s5658_s9 + $0x28] sm:$0xff]  }
 0x96c   : > { %v1453_v37 = vpop.permute.xlu1 %1452 }
 0x96d   : > { %1457 = vst.msk [vmem:[#allocation3 + $0x8] sm:$0xff] %vm645_vm4, %v1453_v37  ;;  %v4255_v37 = vld [vmem:[%s5658_s9 + $0x30] sm:$0xff]  }
 0x974   : > { %v1465_v38 = vpop.permute.xlu1 %1464  ;;  %v1463_v39 = vpop.permute.xlu0 %1462 }
 0x975   : > { %1469 = vst.msk [vmem:[#allocation3 + $0x8] sm:$0xff] %vm658_vm5, %v1465_v38  ;;  %1468 = vst.msk [vmem:[#allocation3] sm:$0xff] %vm658_vm5, %v1463_v39  ;;  %v4256_v38 = vld [vmem:[%s5658_s9 + $0x38] sm:$0xff]   ;;  %v4257_v39 = vld [vmem:[%s5658_s9 + $0x40] sm:$0xff]  }
 0x97c   : > { %v1470_v40 = vld [vmem:[#allocation3] sm:$0xff]  ;;  %v1471_v41 = vld [vmem:[#allocation3 + $0x8] sm:$0xff] }
 0x97d   : > { %v1472_v42 = vpack.c.bf16 %v1471_v41, %v1470_v40  ;;  %v4258_v40 = vld [vmem:[%s5658_s9 + $0x48] sm:$0xff]   ;;  %v4259_v41 = vld [vmem:[%s5658_s9 + $0x50] sm:$0xff]  }
 0x97f   : > { %4044 = vmatmul.mubr.msk.bf16.vlgmr.msra.gmra.mrb[12].mxu0 %vm719_vm6, %v1472_v42  ;;  %v4260_v42 = vld [vmem:[%s5658_s9 + $0x58] sm:$0xff]  }
 0x980   : > { %4075 = vmatprep.mubr.msk.bf16.mxu0 %vm4431_vm3, %v4430_v1  ;;  %4064 = vmatpush3.bf16.msra.mxu0 %v4243_v6  ;;  %v4272_v6 = vld [vmem:[%s5660_s11 + $0x58] sm:$0xff]  }
 0x981   : > { %4065 = vmatprep.subr.bf16.mxu0 %v4430_v1 }
 0x984   : > { %4066 = vmatpush3.bf16.msra.mxu0 %v4244_v7  ;;  %v5135_v7 = vld [vmem:[%s5659_s10] ss:$0 sm:$0xff] }
 0x985   : > { %4067 = vmatprep.subr.bf16.mxu0 %v4430_v1 }
 0x988   : > { %4068 = vmatpush3.bf16.msra.mxu0 %v4245_v8 }
 0x989   : > { %4069 = vmatprep.subr.bf16.mxu0 %v4430_v1 }
 0x98c   : > { %4070 = vmatpush3.bf16.msra.mxu0 %v4246_v24 }
 0x98d   : > { %4071 = vmatprep.subr.bf16.mxu0 %v4430_v1 }
 0x990   : > { %4072 = vmatpush3.bf16.msra.mxu0 %v4247_v12  ;;  %v4273_v12 = vld [vmem:[%s5658_s9] sm:$0xff]  }
 0x991   : > { %4073 = vmatprep.subr.bf16.mxu0 %v4430_v1 }
 0x994   : > { %4074 = vmatpush3.bf16.msra.mxu0 %v4248_v26  ;;  %v4275_v26 = vld [vmem:[%s5658_s9 + $0x10] sm:$0xff]  }
 0x995   : > { %2111 = vmatprep.subr.bf16.mxu0 %v4429_v0 }
 0xa52   : > { %v1565_v47 = vpop.f32.mrb[12].mxu0 }
 0xa53   : > { %v1566_v48 = vadd.f32 %v4667_v53, %v1565_v47  ;;  %v4045_v49 = vpop.f32.mrb[13].mxu0 }
 0xa54   : > { %v1568_v50 = vpop.f32.mrb[14].mxu0 }
 0xa55   : > { %v1572_v52 = vmax.f32 %v1566_v48, 0.0  ;;  %v1569_v54 = vadd.f32 %v4667_v53, %v1568_v50  ;;  %v4046_v55 = vpop.f32.mrb[15].mxu0 }
 0xa57   : > { %1574 = vst.msk [vmem:[#allocation2 + $0x1] sm:$0xff] %vm547_vm0, %v1572_v52  ;;  %v1573_v56 = vmax.f32 %v1569_v54, 0.0  ;;  %1582 = vrot.lane.b32.xlu0 %v1572_v52, %s5689_s20 }
 0xa59   : > { %1575 = vst.msk [vmem:[#allocation2 + $0x9] sm:$0xff] %vm547_vm0, %v1573_v56  ;;  %1584 = vrot.lane.b32.xlu1 %v1573_v56, %s5689_s20 }
 0xa5e   : > { %v1576_v53 = vld [vmem:[#allocation2] sm:$0xff] }
 0xa5f   : > { %1578 = vst.msk [vmem:[#allocation3] sm:$0xff] %vm547_vm0, %v1576_v53  ;;  %v4261_v53 = vld [vmem:[%s5660_s11] sm:$0xff]  }
 0xa60   : > { %v1591_v58 = vld [vmem:[#allocation2 + $0xa] sm:$0xff]  ;;  %v1590_v59 = vld [vmem:[#allocation2 + $0x2] sm:$0xff] }
 0xa61   : > { %v1577_v60 = vld [vmem:[#allocation2 + $0x8] sm:$0xff]  ;;  %1596 = vrot.lane.b32.xlu1 %v1591_v58, %s5688_s21  ;;  %1594 = vrot.lane.b32.xlu0 %v1590_v59, %s5688_s21  ;;  %v4263_v59 = vld [vmem:[%s5660_s11 + $0x10] sm:$0xff]  }
 0xa62   : > { %1579 = vst.msk [vmem:[#allocation3 + $0x8] sm:$0xff] %vm547_vm0, %v1577_v60  ;;  %v4262_v58 = vld [vmem:[%s5660_s11 + $0x8] sm:$0xff]   ;;  %v4264_v60 = vld [vmem:[%s5660_s11 + $0x18] sm:$0xff]  }
 0xac9   : > { %v1583_v61 = vpop.permute.xlu0 %1582 }
 0xaca   : > { %1588 = vst.msk [vmem:[#allocation3] sm:$0xff] %vm645_vm4, %v1583_v61  ;;  %v4265_v61 = vld [vmem:[%s5660_s11 + $0x20] sm:$0xff]  }
 0xacb   : > { %v1585_v62 = vpop.permute.xlu1 %1584 }
 0xacc   : > { %1589 = vst.msk [vmem:[#allocation3 + $0x8] sm:$0xff] %vm645_vm4, %v1585_v62  ;;  %v4266_v62 = vld [vmem:[%s5660_s11 + $0x28] sm:$0xff]  }
 0xad3   : > { %v1597_v63 = vpop.permute.xlu1 %1596  ;;  %v1595_v2 = vpop.permute.xlu0 %1594 }
 0xad4   : > { %1601 = vst.msk [vmem:[#allocation3 + $0x8] sm:$0xff] %vm658_vm5, %v1597_v63  ;;  %1600 = vst.msk [vmem:[#allocation3] sm:$0xff] %vm658_vm5, %v1595_v2  ;;  %v4267_v63 = vld [vmem:[%s5660_s11 + $0x30] sm:$0xff]   ;;  %v4268_v2 = vld [vmem:[%s5660_s11 + $0x38] sm:$0xff]  }
 0xadb   : > { %v1602_v3 = vld [vmem:[#allocation3] sm:$0xff]  ;;  %v1603_v4 = vld [vmem:[#allocation3 + $0x8] sm:$0xff] }
 0xadc   : > { %v1604_v5 = vpack.c.bf16 %v1603_v4, %v1602_v3  ;;  %v4269_v3 = vld [vmem:[%s5660_s11 + $0x40] sm:$0xff]   ;;  %v4270_v4 = vld [vmem:[%s5660_s11 + $0x48] sm:$0xff]  }
 0xade   : > { %4060 = vmatmul.mubr.msk.bf16.vlgmr.msra.gmra.mrb[12].mxu1 %vm719_vm6, %v1604_v5  ;;  %v4271_v5 = vld [vmem:[%s5660_s11 + $0x50] sm:$0xff]  }
 0xbb1   : > { %v1697_v9 = vpop.f32.mrb[12].mxu1 }
 0xbb2   : > { %v1698_v10 = vadd.f32 %v4710_v16, %v1697_v9  ;;  %v4061_v11 = vpop.f32.mrb[13].mxu1 }
 0xbb3   : > { %v1700_v13 = vpop.f32.mrb[14].mxu1 }
 0xbb4   : > { %v1704_v14 = vadd.f32 %v1698_v10, %v4919_v28  ;;  %v1701_v15 = vadd.f32 %v4710_v16, %v1700_v13  ;;  %v4062_v18 = vpop.f32.mrb[15].mxu1 }
 0xbb6   : > { %v1706_v20 = vmul.f32 0.125, %v1704_v14  ;;  %v1705_v21 = vadd.f32 %v1701_v15, %v4927_v30  ;;  %v4249_v30 = vld [vmem:[%s5658_s9] sm:$0xff]  }
 0xbb7   : > { %1951 = vmatpush1.bf16.msra.mxu1 %v4249_v30  ;;  %v4283_v30 = vld [vmem:[%s5658_s9 + $0x50] sm:$0xff]  }
 0xbb8   : > { %v1708_v22 = vadd.f32 %v1706_v20, %v4626_v36  ;;  %v1707_v25 = vmul.f32 0.125, %v1705_v21  ;;  %1952 = vmatprep.subr.bf16.mxu1 %v4429_v0 }
 0xbba   : > { %1710 = vst.msk [vmem:[#allocation2 + $0x1] sm:$0xff] %vm547_vm0, %v1708_v22  ;;  %v1709_v16 = vadd.f32 %v1707_v25, %v4618_v34 }
 0xbbb   : > { %1953 = vmatpush1.bf16.msra.mxu1 %v4250_v23  ;;  %v4284_v23 = vld [vmem:[%s5658_s9 + $0x58] sm:$0xff]  }
 0xbbc   : > { %1711 = vst.msk [vmem:[#allocation2 + $0x9] sm:$0xff] %vm547_vm0, %v1709_v16  ;;  %1954 = vmatprep.subr.bf16.mxu1 %v4429_v0  ;;  %v4274_v16 = vld [vmem:[%s5658_s9 + $0x8] sm:$0xff]  }
 0xbbf   : > { %1955 = vmatpush1.bf16.msra.mxu1 %v4251_v31  ;;  %v5195_v31 = vld [vmem:[%s5661_s12] ss:$0 sm:$0xff] }
 0xbc0   : > { %1956 = vmatprep.subr.bf16.mxu1 %v4429_v0 }
 0xbc3   : > { %v1722_v36 = vld [vmem:[#allocation2 + $0x2] ss:$2 sm:$0xff]  ;;  %v1715_v27 = vld [vmem:[#allocation2 + $0x1] ss:$2 sm:$0xff]  ;;  %1957 = vmatpush1.bf16.msra.mxu1 %v4252_v32 }
 0xbc4   : > { %v1712_v17 = vld [vmem:[#allocation2] ss:$2 sm:$0xff]  ;;  %1724 = vrot.lane.b32.xlu1 %v1722_v36, %s5688_s21  ;;  %1717 = vrot.lane.b32.xlu0 %v1715_v27, %s5689_s20  ;;  %v4276_v36 = vld [vmem:[%s5658_s9 + $0x18] sm:$0xff]   ;;  %s3843_s20 = sshll.u32 %s4546_s28, 4  ;;  %s3533_s28 = scalar_lea.sflag [#allocation7], %s539_s22 }
 0xbc5   : > { %1713 = vst.msk [vmem:[#allocation3] sm:$0xff] %vm547_vm0, %v1712_v17  ;;  %1958 = vmatprep.subr.bf16.mxu1 %v4429_v0  ;;  %v4277_v27 = vld [vmem:[%s5658_s9 + $0x20] sm:$0xff]   ;;  %v4278_v17 = vld [vmem:[%s5658_s9 + $0x28] sm:$0xff]  }
 0xbc7   : > { %1959 = vmatpush1.bf16.msra.mxu1 %v4253_v33 }
 0xbc8   : > { %1960 = vmatprep.subr.bf16.mxu1 %v4429_v0 }
 0xbcb   : > { %1961 = vmatpush1.bf16.msra.mxu1 %v4254_v35 }
 0xbcc   : > { %1962 = vmatprep.subr.bf16.mxu1 %v4429_v0 }
 0xbcf   : > { %1963 = vmatpush1.bf16.msra.mxu1 %v4255_v37 }
 0xbd0   : > { %1964 = vmatprep.subr.bf16.mxu1 %v4429_v0 }
 0xbd3   : > { %1965 = vmatpush1.bf16.msra.mxu1 %v4256_v38 }
 0xbd4   : > { %1966 = vmatprep.subr.bf16.mxu1 %v4429_v0 }
 0xbd7   : > { %1967 = vmatpush1.bf16.msra.mxu1 %v4257_v39 }
 0xbd8   : > { %1968 = vmatprep.subr.bf16.mxu1 %v4429_v0 }
 0xbdb   : > { %1969 = vmatpush1.bf16.msra.mxu1 %v4258_v40 }
 0xbdc   : > { %1970 = vmatprep.subr.bf16.mxu1 %v4429_v0 }
 0xbdf   : > { %1971 = vmatpush1.bf16.msra.mxu1 %v4259_v41 }
 0xbe0   : > { %1972 = vmatprep.subr.bf16.mxu1 %v4429_v0 }
 0xbe3   : > { %1973 = vmatpush1.bf16.msra.mxu1 %v4260_v42 }
 0xbe4   : > { %2273 = vmatprep.subr.bf16.mxu1 %v4429_v0 }
 0xc36   : > { %v1725_v34 = vpop.permute.xlu1 %1724  ;;  %v1718_v28 = vpop.permute.xlu0 %1717 }
 0xc37   : > { %1720 = vst.msk [vmem:[#allocation3] sm:$0xff] %vm645_vm4, %v1718_v28  ;;  %v4280_v28 = vld [vmem:[%s5658_s9 + $0x38] sm:$0xff]  }
 0xc38   : > { %1727 = vst.msk [vmem:[#allocation3] sm:$0xff] %vm658_vm5, %v1725_v34  ;;  %v4279_v34 = vld [vmem:[%s5658_s9 + $0x30] sm:$0xff]  }
 0xc3f   : > { %v1728_v19 = vld [vmem:[#allocation3] sm:$0xff] }
 0xc40   : > { %v1729_v29 = vpack.c.bf16 %v1728_v19, %v1728_v19  ;;  %v4281_v19 = vld [vmem:[%s5658_s9 + $0x40] sm:$0xff]  }
 0xc42   : > { %4076 = vmatmul.mubr.msk.bf16.vlgmr.msra.gmra.mrb[16].mxu0 %vm719_vm6, %v1729_v29  ;;  %v4282_v29 = vld [vmem:[%s5658_s9 + $0x48] sm:$0xff]  }
 0xc43   : > { %2112 = vmatpush1.bf16.msra.mxu0 %v4261_v53  ;;  %v4293_v53 = vld [vmem:[%s5660_s11 + $0x40] sm:$0xff]  }
 0xc44   : > { %2113 = vmatprep.subr.bf16.mxu0 %v4429_v0 }
 0xc47   : > { %2114 = vmatpush1.bf16.msra.mxu0 %v4262_v58  ;;  %v4294_v58 = vld [vmem:[%s5660_s11 + $0x48] sm:$0xff]  }
 0xc48   : > { %2115 = vmatprep.subr.bf16.mxu0 %v4429_v0 }
 0xc4b   : > { %2116 = vmatpush1.bf16.msra.mxu0 %v4263_v59  ;;  %v4295_v59 = vld [vmem:[%s5660_s11 + $0x50] sm:$0xff]  }
 0xc4c   : > { %2117 = vmatprep.subr.bf16.mxu0 %v4429_v0 }
 0xc4f   : > { %2118 = vmatpush1.bf16.msra.mxu0 %v4264_v60  ;;  %v4296_v60 = vld [vmem:[%s5660_s11 + $0x58] sm:$0xff]  }
 0xc50   : > { %2119 = vmatprep.subr.bf16.mxu0 %v4429_v0 }
 0xc53   : > { %2120 = vmatpush1.bf16.msra.mxu0 %v4265_v61 }
 0xc54   : > { %2121 = vmatprep.subr.bf16.mxu0 %v4429_v0 }
 0xc57   : > { %2122 = vmatpush1.bf16.msra.mxu0 %v4266_v62 }
 0xc58   : > { %2123 = vmatprep.subr.bf16.mxu0 %v4429_v0 }
 0xc5b   : > { %2124 = vmatpush1.bf16.msra.mxu0 %v4267_v63 }
 0xc5c   : > { %2125 = vmatprep.subr.bf16.mxu0 %v4429_v0 }
 0xc5f   : > { %2126 = vmatpush1.bf16.msra.mxu0 %v4268_v2 }
 0xc60   : > { %2127 = vmatprep.subr.bf16.mxu0 %v4429_v0 }
 0xc63   : > { %2128 = vmatpush1.bf16.msra.mxu0 %v4269_v3 }
 0xc64   : > { %2129 = vmatprep.subr.bf16.mxu0 %v4429_v0 }
 0xc67   : > { %2130 = vmatpush1.bf16.msra.mxu0 %v4270_v4 }
 0xc68   : > { %2131 = vmatprep.subr.bf16.mxu0 %v4429_v0 }
 0xc6b   : > { %2132 = vmatpush1.bf16.msra.mxu0 %v4271_v5 }
 0xc6c   : > { %2133 = vmatprep.subr.bf16.mxu0 %v4429_v0 }
 0xc6f   : > { %2134 = vmatpush1.bf16.msra.mxu0 %v4272_v6 }
 0xc70   : > { %2434 = vmatprep.subr.bf16.mxu0 %v4429_v0 }
 0xd15   : > { %v1822_v44 = vpop.f32.mrb[16].mxu0 }
 0xd16   : > { %v1823_v45 = vadd.f32 %v3674_v43, %v1822_v44  ;;  %v4077_v46 = vpop.f32.mrb[17].mxu0 }
 0xd17   : > { %v1825_v47 = vpop.f32.mrb[18].mxu0 }
 0xd18   : > { %v5075_v48 = vmax.f32 %v1823_v45, 0.0  ;;  %v4078_v49 = vpop.f32.mrb[19].mxu0 }
 0xd19   : > { %v4285_v49 = vld [vmem:[%s5660_s11] sm:$0xff]  }
 0xd1a   : > { %1829 = vst.msk [vmem:[#allocation4 + $0x1] sm:$0xff] %vm552_vm7, %v5075_v48  ;;  %1833 = vrot.lane.b32.xlu0 %v5075_v48, %s5688_s21 }
 0xd21   : > { %v1838_v50 = vld [vmem:[#allocation4 + $0x2] sm:$0xff] }
 0xd22   : > { %v1830_v51 = vld [vmem:[#allocation4] sm:$0xff]  ;;  %1839 = vst.msk [vmem:[#allocation5 + $0x8] sm:$0xff] %vm552_vm7, %v1838_v50 }
 0xd23   : > { %1831 = vst.msk [vmem:[#allocation5] sm:$0xff] %vm552_vm7, %v1830_v51  ;;  %v4286_v50 = vld [vmem:[%s5660_s11 + $0x8] sm:$0xff]   ;;  %v4287_v51 = vld [vmem:[%s5660_s11 + $0x10] sm:$0xff]  }
 0xd29   : > { %v1841_v52 = vld [vmem:[#allocation5 + $0x8] sm:$0xff] }
 0xd2a   : > { %v1843_v54 = vpack.c.bf16 %v1841_v52, %v1841_v52  ;;  %v4288_v52 = vld [vmem:[%s5660_s11 + $0x18] sm:$0xff]  }
 0xd2c   : > { %3695 = vmatprep.mubr.msk.bf16.mxu1 %vm552_vm7, %v1843_v54  ;;  %v4289_v54 = vld [vmem:[%s5660_s11 + $0x20] sm:$0xff]  }
 0xd8c   : > { %v1834_v55 = vpop.permute.xlu0 %1833 }
 0xd8d   : > { %1837 = vst.msk [vmem:[#allocation5] sm:$0xff] %vm1836_vm9, %v1834_v55  ;;  %v4290_v55 = vld [vmem:[%s5660_s11 + $0x28] sm:$0xff]  }
 0xd94   : > { %v1840_v56 = vld [vmem:[#allocation5] sm:$0xff] }
 0xd95   : > { %v1842_v57 = vpack.c.bf16 %v1840_v56, %v1840_v56  ;;  %v4291_v56 = vld [vmem:[%s5660_s11 + $0x30] sm:$0xff]  }
 0xd97   : > { %1983 = vmatmul.mubr.bf16.vlgmr.msra.gmra.mrb[16].mxu1 %v1842_v57  ;;  %v4292_v57 = vld [vmem:[%s5660_s11 + $0x38] sm:$0xff]  }
 0xd98   : > { %2274 = vmatpush1.bf16.msra.mxu1 %v4273_v12  ;;  %v4305_v12 = vld [vmem:[%s5658_s9 + $0x40] sm:$0xff]  }
 0xd99   : > { %2275 = vmatprep.subr.bf16.mxu1 %v4429_v0 }
 0xd9c   : > { %2276 = vmatpush1.bf16.msra.mxu1 %v4274_v16  ;;  %v4306_v16 = vld [vmem:[%s5658_s9 + $0x48] sm:$0xff]  }
 0xd9d   : > { %2277 = vmatprep.subr.bf16.mxu1 %v4429_v0 }
 0xda0   : > { %2278 = vmatpush1.bf16.msra.mxu1 %v4275_v26  ;;  %v4307_v26 = vld [vmem:[%s5658_s9 + $0x50] sm:$0xff]  }
 0xda1   : > { %2279 = vmatprep.subr.bf16.mxu1 %v4429_v0 }
 0xda4   : > { %2280 = vmatpush1.bf16.msra.mxu1 %v4276_v36  ;;  %v4308_v36 = vld [vmem:[%s5658_s9 + $0x58] sm:$0xff]  }
 0xda5   : > { %2281 = vmatprep.subr.bf16.mxu1 %v4429_v0 }
 0xda8   : > { %2282 = vmatpush1.bf16.msra.mxu1 %v4277_v27 }
 0xda9   : > { %2283 = vmatprep.subr.bf16.mxu1 %v4429_v0 }
 0xdac   : > { %2284 = vmatpush1.bf16.msra.mxu1 %v4278_v17 }
 0xdad   : > { %2285 = vmatprep.subr.bf16.mxu1 %v4429_v0 }
 0xdb0   : > { %2286 = vmatpush1.bf16.msra.mxu1 %v4279_v34 }
 0xdb1   : > { %2287 = vmatprep.subr.bf16.mxu1 %v4429_v0 }
 0xdb4   : > { %2288 = vmatpush1.bf16.msra.mxu1 %v4280_v28 }
 0xdb5   : > { %2289 = vmatprep.subr.bf16.mxu1 %v4429_v0 }
 0xdb8   : > { %2290 = vmatpush1.bf16.msra.mxu1 %v4281_v19 }
 0xdb9   : > { %2291 = vmatprep.subr.bf16.mxu1 %v4429_v0 }
 0xdbc   : > { %2292 = vmatpush1.bf16.msra.mxu1 %v4282_v29 }
 0xdbd   : > { %2293 = vmatprep.subr.bf16.mxu1 %v4429_v0 }
 0xdc0   : > { %2294 = vmatpush1.bf16.msra.mxu1 %v4283_v30 }
 0xdc1   : > { %2295 = vmatprep.subr.bf16.mxu1 %v4429_v0 }
 0xdc4   : > { %2296 = vmatpush1.bf16.msra.mxu1 %v4284_v23 }
 0xdc5   : > { %2598 = vmatprep.subr.bf16.mxu1 %v4429_v0 }
 0xe6a   : > { %v1984_v8 = vpop.f32.mrb[16].mxu1 }
 0xe6b   : > { %v1985_v9 = vadd.f32 %v5135_v7, %v1984_v8  ;;  %v1986_v10 = vpop.f32.mrb[17].mxu1 }
 0xe6c   : > { %v1987_v11 = vpop.f32.mrb[18].mxu1 }
 0xe6d   : > { %v1990_v13 = vmax.f32 %v1985_v9, 0.0  ;;  %v1988_v14 = vpop.f32.mrb[19].mxu1 }
 0xe6e   : > { %v4297_v14 = vld [vmem:[%s5658_s9] sm:$0xff]  }
 0xe6f   : > { %1991 = vst.msk [vmem:[#allocation4 + $0x1] sm:$0xff] %vm552_vm7, %v1990_v13  ;;  %1995 = vrot.lane.b32.xlu1 %v1990_v13, %s5688_s21 }
 0xe76   : > { %v1999_v15 = vld [vmem:[#allocation4 + $0x2] sm:$0xff] }
 0xe77   : > { %v1992_v18 = vld [vmem:[#allocation4] sm:$0xff]  ;;  %2000 = vst.msk [vmem:[#allocation5 + $0x8] sm:$0xff] %vm552_vm7, %v1999_v15 }
 0xe78   : > { %1993 = vst.msk [vmem:[#allocation5] sm:$0xff] %vm552_vm7, %v1992_v18  ;;  %v4298_v15 = vld [vmem:[%s5658_s9 + $0x8] sm:$0xff]   ;;  %v4299_v18 = vld [vmem:[%s5658_s9 + $0x10] sm:$0xff]  }
 0xe7e   : > { %v2002_v20 = vld [vmem:[#allocation5 + $0x8] sm:$0xff] }
 0xe7f   : > { %v2004_v21 = vpack.c.bf16 %v2002_v20, %v2002_v20  ;;  %v4300_v20 = vld [vmem:[%s5658_s9 + $0x18] sm:$0xff]  }
 0xe81   : > { %3709 = vmatprep.mubr.msk.bf16.mxu0 %vm552_vm7, %v2004_v21  ;;  %v4301_v21 = vld [vmem:[%s5658_s9 + $0x20] sm:$0xff]  }
 0xee1   : > { %v1996_v24 = vpop.permute.xlu1 %1995 }
 0xee2   : > { %1998 = vst.msk [vmem:[#allocation5] sm:$0xff] %vm1836_vm9, %v1996_v24  ;;  %v4302_v24 = vld [vmem:[%s5658_s9 + $0x28] sm:$0xff]  }
 0xee9   : > { %v2001_v22 = vld [vmem:[#allocation5] sm:$0xff] }
 0xeea   : > { %v2003_v25 = vpack.c.bf16 %v2001_v22, %v2001_v22  ;;  %v4303_v22 = vld [vmem:[%s5658_s9 + $0x30] sm:$0xff]  }
 0xeec   : > { %2144 = vmatmul.mubr.bf16.vlgmr.msra.gmra.mrb[20].mxu0 %v2003_v25  ;;  %v4304_v25 = vld [vmem:[%s5658_s9 + $0x38] sm:$0xff]  }
 0xeed   : > { %2435 = vmatpush1.bf16.msra.mxu0 %v4285_v49  ;;  %v4316_v49 = vld [vmem:[%s5660_s11 + $0x38] sm:$0xff]  }
 0xeee   : > { %2436 = vmatprep.subr.bf16.mxu0 %v4429_v0 }
 0xef1   : > { %2437 = vmatpush1.bf16.msra.mxu0 %v4286_v50  ;;  %v4317_v50 = vld [vmem:[%s5660_s11 + $0x40] sm:$0xff]  }
 0xef2   : > { %2438 = vmatprep.subr.bf16.mxu0 %v4429_v0 }
 0xef5   : > { %2439 = vmatpush1.bf16.msra.mxu0 %v4287_v51  ;;  %v4318_v51 = vld [vmem:[%s5660_s11 + $0x48] sm:$0xff]  }
 0xef6   : > { %2440 = vmatprep.subr.bf16.mxu0 %v4429_v0 }
 0xef9   : > { %2441 = vmatpush1.bf16.msra.mxu0 %v4288_v52  ;;  %v4319_v52 = vld [vmem:[%s5660_s11 + $0x50] sm:$0xff]  }
 0xefa   : > { %2442 = vmatprep.subr.bf16.mxu0 %v4429_v0 }
 0xefd   : > { %2443 = vmatpush1.bf16.msra.mxu0 %v4289_v54  ;;  %v4320_v54 = vld [vmem:[%s5660_s11 + $0x58] sm:$0xff]  }
 0xefe   : > { %2444 = vmatprep.subr.bf16.mxu0 %v4429_v0 }
 0xf01   : > { %2445 = vmatpush1.bf16.msra.mxu0 %v4290_v55 }
 0xf02   : > { %2446 = vmatprep.subr.bf16.mxu0 %v4429_v0 }
 0xf05   : > { %2447 = vmatpush1.bf16.msra.mxu0 %v4291_v56 }
 0xf06   : > { %2448 = vmatprep.subr.bf16.mxu0 %v4429_v0 }
 0xf09   : > { %2449 = vmatpush1.bf16.msra.mxu0 %v4292_v57 }
 0xf0a   : > { %2450 = vmatprep.subr.bf16.mxu0 %v4429_v0 }
 0xf0d   : > { %2451 = vmatpush1.bf16.msra.mxu0 %v4293_v53 }
 0xf0e   : > { %2452 = vmatprep.subr.bf16.mxu0 %v4429_v0 }
 0xf11   : > { %2453 = vmatpush1.bf16.msra.mxu0 %v4294_v58 }
 0xf12   : > { %2454 = vmatprep.subr.bf16.mxu0 %v4429_v0 }
 0xf15   : > { %2455 = vmatpush1.bf16.msra.mxu0 %v4295_v59 }
 0xf16   : > { %2456 = vmatprep.subr.bf16.mxu0 %v4429_v0 }
 0xf19   : > { %2457 = vmatpush1.bf16.msra.mxu0 %v4296_v60 }
 0xf1a   : > { %2759 = vmatprep.subr.bf16.mxu0 %v4429_v0 }
 0xfbf   : > { %v2145_v32 = vpop.f32.mrb[20].mxu0 }
 0xfc0   : > { %v5198_v33 = vadd.f32 %v5195_v31, %v2145_v32  ;;  %v2147_v35 = vpop.f32.mrb[21].mxu0 }
 0xfc1   : > { %v2148_v37 = vpop.f32.mrb[22].mxu0 }
 0xfc2   : > { %v5202_v38 = vmul.f32 0.33333334, %v5198_v33  ;;  %v2149_v39 = vpop.f32.mrb[23].mxu0 }
 0xfc4   : > { %v2152_v40 = vadd.f32 %v5202_v38, %v5075_v48 }
 0xfc6   : > { %2157 = vrot.lane.b32.xlu0 %v2152_v40, %s5688_s21  ;;  %2153 = vst.msk [vmem:[#allocation4 + $0x1] sm:$0xff] %vm552_vm7, %v2152_v40 }
 0xfcd   : > { %v2161_v41 = vld [vmem:[#allocation4 + $0x2] sm:$0xff] }
 0xfce   : > { %v2154_v42 = vld [vmem:[#allocation4] sm:$0xff]  ;;  %2162 = vst.msk [vmem:[#allocation5 + $0x8] sm:$0xff] %vm552_vm7, %v2161_v41  ;;  %v4309_v41 = vld [vmem:[%s5660_s11] sm:$0xff]  }
 0xfcf   : > { %2155 = vst.msk [vmem:[#allocation5] sm:$0xff] %vm552_vm7, %v2154_v42  ;;  %v4310_v42 = vld [vmem:[%s5660_s11 + $0x8] sm:$0xff]  }
 0xfd5   : > { %v2164_v43 = vld [vmem:[#allocation5 + $0x8] sm:$0xff] }
 0xfd6   : > { %v2166_v44 = vpack.c.bf16 %v2164_v43, %v2164_v43  ;;  %v4311_v43 = vld [vmem:[%s5660_s11 + $0x10] sm:$0xff]  }
 0xfd8   : > { %3723 = vmatprep.mubr.msk.bf16.mxu1 %vm552_vm7, %v2166_v44  ;;  %v4312_v44 = vld [vmem:[%s5660_s11 + $0x18] sm:$0xff]  }
0x1038   : > { %v2158_v45 = vpop.permute.xlu0 %2157 }
0x1039   : > { %2160 = vst.msk [vmem:[#allocation5] sm:$0xff] %vm1836_vm9, %v2158_v45  ;;  %v4313_v45 = vld [vmem:[%s5660_s11 + $0x20] sm:$0xff]  }
0x1040   : > { %v2163_v46 = vld [vmem:[#allocation5] sm:$0xff] }
0x1041   : > { %v2165_v47 = vpack.c.bf16 %v2163_v46, %v2163_v46  ;;  %v4314_v46 = vld [vmem:[%s5660_s11 + $0x28] sm:$0xff]  }
0x1043   : > { %2306 = vmatmul.mubr.bf16.vlgmr.msra.gmra.mrb[20].mxu1 %v2165_v47  ;;  %v4315_v47 = vld [vmem:[%s5660_s11 + $0x30] sm:$0xff]  }
0x1044   : > { %2599 = vmatpush1.bf16.msra.mxu1 %v4297_v14  ;;  %v4328_v14 = vld [vmem:[%s5658_s9 + $0x38] sm:$0xff]  }
0x1045   : > { %2600 = vmatprep.subr.bf16.mxu1 %v4429_v0 }
0x1048   : > { %2601 = vmatpush1.bf16.msra.mxu1 %v4298_v15  ;;  %v4329_v15 = vld [vmem:[%s5658_s9 + $0x40] sm:$0xff]  }
0x1049   : > { %2602 = vmatprep.subr.bf16.mxu1 %v4429_v0 }
0x104c   : > { %2603 = vmatpush1.bf16.msra.mxu1 %v4299_v18  ;;  %v4330_v18 = vld [vmem:[%s5658_s9 + $0x48] sm:$0xff]  }
0x104d   : > { %2604 = vmatprep.subr.bf16.mxu1 %v4429_v0 }
0x1050   : > { %2605 = vmatpush1.bf16.msra.mxu1 %v4300_v20  ;;  %v4331_v20 = vld [vmem:[%s5658_s9 + $0x50] sm:$0xff]  }
0x1051   : > { %2606 = vmatprep.subr.bf16.mxu1 %v4429_v0 }
0x1054   : > { %2607 = vmatpush1.bf16.msra.mxu1 %v4301_v21  ;;  %v4332_v21 = vld [vmem:[%s5658_s9 + $0x58] sm:$0xff]  }
0x1055   : > { %2608 = vmatprep.subr.bf16.mxu1 %v4429_v0 }
0x1058   : > { %2609 = vmatpush1.bf16.msra.mxu1 %v4302_v24 }
0x1059   : > { %2610 = vmatprep.subr.bf16.mxu1 %v4429_v0 }
0x105c   : > { %2611 = vmatpush1.bf16.msra.mxu1 %v4303_v22 }
0x105d   : > { %2612 = vmatprep.subr.bf16.mxu1 %v4429_v0 }
0x1060   : > { %2613 = vmatpush1.bf16.msra.mxu1 %v4304_v25 }
0x1061   : > { %2614 = vmatprep.subr.bf16.mxu1 %v4429_v0 }
0x1064   : > { %2615 = vmatpush1.bf16.msra.mxu1 %v4305_v12 }
0x1065   : > { %2616 = vmatprep.subr.bf16.mxu1 %v4429_v0 }
0x1068   : > { %2617 = vmatpush1.bf16.msra.mxu1 %v4306_v16 }
0x1069   : > { %2618 = vmatprep.subr.bf16.mxu1 %v4429_v0 }
0x106c   : > { %2619 = vmatpush1.bf16.msra.mxu1 %v4307_v26 }
0x106d   : > { %2620 = vmatprep.subr.bf16.mxu1 %v4429_v0 }
0x1070   : > { %2621 = vmatpush1.bf16.msra.mxu1 %v4308_v36 }
0x1071   : > { %2924 = vmatprep.subr.bf16.mxu1 %v4429_v0 }
0x1116   : > { %v2307_v61 = vpop.f32.mrb[20].mxu1 }
0x1117   : > { %v2308_v62 = vadd.f32 %v5135_v7, %v2307_v61  ;;  %v2309_v63 = vpop.f32.mrb[21].mxu1 }
0x1118   : > { %v2310_v2 = vpop.f32.mrb[22].mxu1 }
0x1119   : > { %v2313_v3 = vmax.f32 %v2308_v62, 0.0  ;;  %v2311_v4 = vpop.f32.mrb[23].mxu1 }
0x111b   : > { %2314 = vst.msk [vmem:[#allocation4 + $0x1] sm:$0xff] %vm552_vm7, %v2313_v3  ;;  %2318 = vrot.lane.b32.xlu1 %v2313_v3, %s5688_s21 }
0x1122   : > { %v2322_v5 = vld [vmem:[#allocation4 + $0x2] sm:$0xff] }
0x1123   : > { %v2315_v6 = vld [vmem:[#allocation4] sm:$0xff]  ;;  %2323 = vst.msk [vmem:[#allocation5 + $0x8] sm:$0xff] %vm552_vm7, %v2322_v5  ;;  %v4321_v5 = vld [vmem:[%s5658_s9] sm:$0xff]  }
0x1124   : > { %2316 = vst.msk [vmem:[#allocation5] sm:$0xff] %vm552_vm7, %v2315_v6  ;;  %v4322_v6 = vld [vmem:[%s5658_s9 + $0x8] sm:$0xff]  }
0x112a   : > { %v2325_v8 = vld [vmem:[#allocation5 + $0x8] sm:$0xff] }
0x112b   : > { %v2327_v9 = vpack.c.bf16 %v2325_v8, %v2325_v8  ;;  %v4323_v8 = vld [vmem:[%s5658_s9 + $0x10] sm:$0xff]  }
0x112d   : > { %3737 = vmatprep.mubr.msk.bf16.mxu0 %vm552_vm7, %v2327_v9  ;;  %v4324_v9 = vld [vmem:[%s5658_s9 + $0x18] sm:$0xff]  }
0x118d   : > { %v2319_v10 = vpop.permute.xlu1 %2318 }
0x118e   : > { %2321 = vst.msk [vmem:[#allocation5] sm:$0xff] %vm1836_vm9, %v2319_v10  ;;  %v4325_v10 = vld [vmem:[%s5658_s9 + $0x20] sm:$0xff]  }
0x1195   : > { %v2324_v11 = vld [vmem:[#allocation5] sm:$0xff] }
0x1196   : > { %v2326_v13 = vpack.c.bf16 %v2324_v11, %v2324_v11  ;;  %v4326_v11 = vld [vmem:[%s5658_s9 + $0x28] sm:$0xff]  }
0x1198   : > { %2467 = vmatmul.mubr.bf16.vlgmr.msra.gmra.mrb[24].mxu0 %v2326_v13  ;;  %v4327_v13 = vld [vmem:[%s5658_s9 + $0x30] sm:$0xff]  }
0x1199   : > { %2760 = vmatpush1.bf16.msra.mxu0 %v4309_v41  ;;  %v4336_v41 = vld [vmem:[%s5660_s11 + $0x18] sm:$0xff]  }
0x119a   : > { %2761 = vmatprep.subr.bf16.mxu0 %v4429_v0 }
0x119d   : > { %2762 = vmatpush1.bf16.msra.mxu0 %v4310_v42  ;;  %v4337_v42 = vld [vmem:[%s5660_s11 + $0x20] sm:$0xff]  }
0x119e   : > { %2763 = vmatprep.subr.bf16.mxu0 %v4429_v0 }
0x11a1   : > { %2764 = vmatpush1.bf16.msra.mxu0 %v4311_v43  ;;  %v4338_v43 = vld [vmem:[%s5660_s11 + $0x28] sm:$0xff]  }
0x11a2   : > { %2765 = vmatprep.subr.bf16.mxu0 %v4429_v0 }
0x11a5   : > { %2766 = vmatpush1.bf16.msra.mxu0 %v4312_v44  ;;  %v4339_v44 = vld [vmem:[%s5660_s11 + $0x30] sm:$0xff]  }
0x11a6   : > { %2767 = vmatprep.subr.bf16.mxu0 %v4429_v0 }
0x11a9   : > { %2768 = vmatpush1.bf16.msra.mxu0 %v4313_v45  ;;  %v4340_v45 = vld [vmem:[%s5660_s11 + $0x38] sm:$0xff]  }
0x11aa   : > { %2769 = vmatprep.subr.bf16.mxu0 %v4429_v0 }
0x11ad   : > { %2770 = vmatpush1.bf16.msra.mxu0 %v4314_v46  ;;  %v4341_v46 = vld [vmem:[%s5660_s11 + $0x40] sm:$0xff]  }
0x11ae   : > { %2771 = vmatprep.subr.bf16.mxu0 %v4429_v0 }
0x11b1   : > { %2772 = vmatpush1.bf16.msra.mxu0 %v4315_v47  ;;  %v4342_v47 = vld [vmem:[%s5660_s11 + $0x48] sm:$0xff]  }
0x11b2   : > { %2773 = vmatprep.subr.bf16.mxu0 %v4429_v0 }
0x11b5   : > { %2774 = vmatpush1.bf16.msra.mxu0 %v4316_v49  ;;  %v4343_v49 = vld [vmem:[%s5660_s11 + $0x50] sm:$0xff]  }
0x11b6   : > { %2775 = vmatprep.subr.bf16.mxu0 %v4429_v0 }
0x11b9   : > { %2776 = vmatpush1.bf16.msra.mxu0 %v4317_v50  ;;  %v4344_v50 = vld [vmem:[%s5660_s11 + $0x58] sm:$0xff]  }
0x11ba   : > { %2777 = vmatprep.subr.bf16.mxu0 %v4429_v0 }
0x11bd   : > { %2778 = vmatpush1.bf16.msra.mxu0 %v4318_v51 }
0x11be   : > { %2779 = vmatprep.subr.bf16.mxu0 %v4429_v0 }
0x11c1   : > { %2780 = vmatpush1.bf16.msra.mxu0 %v4319_v52 }
0x11c2   : > { %2781 = vmatprep.subr.bf16.mxu0 %v4429_v0 }
0x11c5   : > { %2782 = vmatpush1.bf16.msra.mxu0 %v4320_v54 }
0x11c6   : > { %3085 = vmatprep.subr.bf16.mxu0 %v4429_v0 }
0x126b   : > { %v2468_v27 = vpop.f32.mrb[24].mxu0 }
0x126c   : > { %v5315_v17 = vadd.f32 %v5195_v31, %v2468_v27  ;;  %v2470_v34 = vpop.f32.mrb[25].mxu0 }
0x126d   : > { %v2471_v28 = vpop.f32.mrb[26].mxu0 }
0x126e   : > { %v2476_v19 = vsub.f32 %v5315_v17, %v5202_v38  ;;  %v2472_v29 = vpop.f32.mrb[27].mxu0  ;;  %v2474_v24 = vmul.f32 3.0, %v5315_v17  ;;  %v2801_v12 = vsub.f32 %v5198_v33, %v5315_v17 }
0x1270   : > { %v2477_v30 = vadd.f32 %v2476_v19, %v5075_v48  ;;  %v2475_v28 = vadd.f32 %v2474_v24, %v5198_v33 }
0x1272   : > { %2482 = vrot.lane.b32.xlu0 %v2477_v30, %s5688_s21  ;;  %2478 = vst.msk [vmem:[#allocation4 + $0x1] sm:$0xff] %vm552_vm7, %v2477_v30 }
0x1279   : > { %v2486_v23 = vld [vmem:[#allocation4 + $0x2] sm:$0xff] }
0x127a   : > { %v2479_v32 = vld [vmem:[#allocation4] sm:$0xff]  ;;  %2487 = vst.msk [vmem:[#allocation5 + $0x8] sm:$0xff] %vm552_vm7, %v2486_v23 }
0x127b   : > { %2480 = vst.msk [vmem:[#allocation5] sm:$0xff] %vm552_vm7, %v2479_v32 }
0x1281   : > { %v2489_v35 = vld [vmem:[#allocation5 + $0x8] sm:$0xff] }
0x1282   : > { %v2491_v37 = vpack.c.bf16 %v2489_v35, %v2489_v35 }
0x1284   : > { %3751 = vmatprep.mubr.msk.bf16.mxu1 %vm552_vm7, %v2491_v37 }
0x12e4   : > { %v2483_v39 = vpop.permute.xlu0 %2482 }
0x12e5   : > { %2485 = vst.msk [vmem:[#allocation5] sm:$0xff] %vm1836_vm9, %v2483_v39  ;;  %v4333_v39 = vld [vmem:[%s5660_s11] sm:$0xff]  }
0x12ec   : > { %v2488_v38 = vld [vmem:[#allocation5] sm:$0xff] }
0x12ed   : > { %v2490_v40 = vpack.c.bf16 %v2488_v38, %v2488_v38  ;;  %v4334_v38 = vld [vmem:[%s5660_s11 + $0x8] sm:$0xff]  }
0x12ef   : > { %2631 = vmatmul.mubr.bf16.vlgmr.msra.gmra.mrb[24].mxu1 %v2490_v40  ;;  %v4335_v40 = vld [vmem:[%s5660_s11 + $0x10] sm:$0xff]  }
0x12f0   : > { %2925 = vmatpush1.bf16.msra.mxu1 %v4321_v5  ;;  %v4350_v5 = vld [vmem:[%s5662_s13 + $0x10] sm:$0xff]  }
0x12f1   : > { %2926 = vmatprep.subr.bf16.mxu1 %v4429_v0 }
0x12f4   : > { %2927 = vmatpush1.bf16.msra.mxu1 %v4322_v6  ;;  %v4351_v6 = vld [vmem:[%s5662_s13 + $0x38] sm:$0xff]  }
0x12f5   : > { %2928 = vmatprep.subr.bf16.mxu1 %v4429_v0 }
0x12f8   : > { %2929 = vmatpush1.bf16.msra.mxu1 %v4323_v8  ;;  %v4352_v8 = vld [vmem:[%s5662_s13 + $0x18] sm:$0xff]  }
0x12f9   : > { %2930 = vmatprep.subr.bf16.mxu1 %v4429_v0 }
0x12fc   : > { %2931 = vmatpush1.bf16.msra.mxu1 %v4324_v9 }
0x12fd   : > { %2932 = vmatprep.subr.bf16.mxu1 %v4429_v0 }
0x1300   : > { %2933 = vmatpush1.bf16.msra.mxu1 %v4325_v10 }
0x1301   : > { %2934 = vmatprep.subr.bf16.mxu1 %v4429_v0 }
0x1304   : > { %2935 = vmatpush1.bf16.msra.mxu1 %v4326_v11 }
0x1305   : > { %2936 = vmatprep.subr.bf16.mxu1 %v4429_v0 }
0x1308   : > { %2937 = vmatpush1.bf16.msra.mxu1 %v4327_v13 }
0x1309   : > { %2938 = vmatprep.subr.bf16.mxu1 %v4429_v0 }
0x130c   : > { %2939 = vmatpush1.bf16.msra.mxu1 %v4328_v14 }
0x130d   : > { %2940 = vmatprep.subr.bf16.mxu1 %v4429_v0 }
0x1310   : > { %2941 = vmatpush1.bf16.msra.mxu1 %v4329_v15 }
0x1311   : > { %2942 = vmatprep.subr.bf16.mxu1 %v4429_v0 }
0x1314   : > { %2943 = vmatpush1.bf16.msra.mxu1 %v4330_v18 }
0x1315   : > { %2944 = vmatprep.subr.bf16.mxu1 %v4429_v0 }
0x1318   : > { %2945 = vmatpush1.bf16.msra.mxu1 %v4331_v20 }
0x1319   : > { %2946 = vmatprep.subr.bf16.mxu1 %v4429_v0 }
0x131c   : > { %2947 = vmatpush1.bf16.msra.mxu1 %v4332_v21 }
0x131d   : > { %4091 = vmatprep.subr.bf16.mxu1 %v4430_v1 }
0x13c2   : > { %v2632_v55 = vpop.f32.mrb[24].mxu1 }
0x13c3   : > { %v2633_v56 = vadd.f32 %v5135_v7, %v2632_v55  ;;  %v2634_v57 = vpop.f32.mrb[25].mxu1 }
0x13c4   : > { %v2635_v53 = vpop.f32.mrb[26].mxu1 }
0x13c5   : > { %v2638_v58 = vmax.f32 %v2633_v56, 0.0  ;;  %v2636_v59 = vpop.f32.mrb[27].mxu1 }
0x13c7   : > { %2639 = vst.msk [vmem:[#allocation4 + $0x1] sm:$0xff] %vm552_vm7, %v2638_v58  ;;  %2643 = vrot.lane.b32.xlu1 %v2638_v58, %s5688_s21 }
0x13ce   : > { %v2647_v60 = vld [vmem:[#allocation4 + $0x2] sm:$0xff] }
0x13cf   : > { %v2640_v61 = vld [vmem:[#allocation4] sm:$0xff]  ;;  %2648 = vst.msk [vmem:[#allocation5 + $0x8] sm:$0xff] %vm552_vm7, %v2647_v60 }
0x13d0   : > { %2641 = vst.msk [vmem:[#allocation5] sm:$0xff] %vm552_vm7, %v2640_v61 }
0x13d6   : > { %v2650_v62 = vld [vmem:[#allocation5 + $0x8] sm:$0xff] }
0x13d7   : > { %v2652_v63 = vpack.c.bf16 %v2650_v62, %v2650_v62  ;;  %v4345_v62 = vld [vmem:[%s5662_s13 + $0x20] sm:$0xff]  }
0x13d9   : > { %3765 = vmatprep.mubr.msk.bf16.mxu0 %vm552_vm7, %v2652_v63  ;;  %v4346_v63 = vld [vmem:[%s5662_s13] sm:$0xff]  }
0x1439   : > { %v2644_v2 = vpop.permute.xlu1 %2643 }
0x143a   : > { %2646 = vst.msk [vmem:[#allocation5] sm:$0xff] %vm1836_vm9, %v2644_v2  ;;  %v4347_v2 = vld [vmem:[%s5662_s13 + $0x28] sm:$0xff]  }
0x1441   : > { %v2649_v3 = vld [vmem:[#allocation5] sm:$0xff] }
0x1442   : > { %v2651_v4 = vpack.c.bf16 %v2649_v3, %v2649_v3  ;;  %v4348_v3 = vld [vmem:[%s5662_s13 + $0x8] sm:$0xff]  }
0x1444   : > { %2792 = vmatmul.mubr.bf16.vlgmr.msra.gmra.mrb[28].mxu0 %v2651_v4  ;;  %v4349_v4 = vld [vmem:[%s5662_s13 + $0x30] sm:$0xff]  }
0x1445   : > { %3086 = vmatpush1.bf16.msra.mxu0 %v4333_v39  ;;  %v4364_v39 = vld [vmem:[%s5664_s15 + $0x18] sm:$0xff]  }
0x1446   : > { %3087 = vmatprep.subr.bf16.mxu0 %v4429_v0 }
0x1449   : > { %3088 = vmatpush1.bf16.msra.mxu0 %v4334_v38 }
0x144a   : > { %3089 = vmatprep.subr.bf16.mxu0 %v4429_v0 }
0x144d   : > { %3090 = vmatpush1.bf16.msra.mxu0 %v4335_v40 }
0x144e   : > { %3091 = vmatprep.subr.bf16.mxu0 %v4429_v0 }
0x1451   : > { %3092 = vmatpush1.bf16.msra.mxu0 %v4336_v41 }
0x1452   : > { %3093 = vmatprep.subr.bf16.mxu0 %v4429_v0 }
0x1455   : > { %3094 = vmatpush1.bf16.msra.mxu0 %v4337_v42 }
0x1456   : > { %3095 = vmatprep.subr.bf16.mxu0 %v4429_v0 }
0x1459   : > { %3096 = vmatpush1.bf16.msra.mxu0 %v4338_v43  ;;  %v3136_v43 = vld [vmem:[%s5663_s14] sm:$0x1] }
0x145a   : > { %3097 = vmatprep.subr.bf16.mxu0 %v4429_v0 }
0x145d   : > { %3098 = vmatpush1.bf16.msra.mxu0 %v4339_v44 }
0x145e   : > { %3099 = vmatprep.subr.bf16.mxu0 %v4429_v0 }
0x1461   : > { %3100 = vmatpush1.bf16.msra.mxu0 %v4340_v45 }
0x1462   : > { %3101 = vmatprep.subr.bf16.mxu0 %v4429_v0 }
0x1465   : > { %3102 = vmatpush1.bf16.msra.mxu0 %v4341_v46 }
0x1466   : > { %3103 = vmatprep.subr.bf16.mxu0 %v4429_v0 }
0x1469   : > { %3104 = vmatpush1.bf16.msra.mxu0 %v4342_v47 }
0x146a   : > { %3105 = vmatprep.subr.bf16.mxu0 %v4429_v0 }
0x146d   : > { %3106 = vmatpush1.bf16.msra.mxu0 %v4343_v49 }
0x146e   : > { %3107 = vmatprep.subr.bf16.mxu0 %v4429_v0 }
0x1471   : > { %3108 = vmatpush1.bf16.msra.mxu0 %v4344_v50 }
0x1472   : > { %4079 = vmatprep.subr.bf16.mxu0 %v4430_v1 }
0x1517   : > { %v2793_v22 = vpop.f32.mrb[28].mxu0 }
0x1518   : > { %v2794_v25 = vadd.f32 %v5195_v31, %v2793_v22  ;;  %v2795_v16 = vpop.f32.mrb[29].mxu0 }
0x1519   : > { %v2796_v26 = vpop.f32.mrb[30].mxu0 }
0x151a   : > { %v2799_v36 = vmul.f32 3.0, %v2794_v25  ;;  %v2802_v27 = vadd.f32 %v2801_v12, %v2794_v25  ;;  %v2797_v34 = vpop.f32.mrb[31].mxu0 }
0x151c   : > { %v2803_v19 = vadd.f32 %v2802_v27, %v5075_v48  ;;  %v5436_v29 = vadd.f32 %v2799_v36, %v2475_v28  ;;  %v4355_v36 = vld [vmem:[%s5662_s13 + $0x50] sm:$0xff]   ;;  %v4356_v27 = vld [vmem:[%s5662_s13 + $0x58] sm:$0xff]   ;;  %v4357_v28 = vld [vmem:[%s5662_s13 + $0x60] sm:$0xff]  }
0x151e   : > { %2808 = vrot.lane.b32.xlu0 %v2803_v19, %s5688_s21  ;;  %2804 = vst.msk [vmem:[#allocation4 + $0x1] sm:$0xff] %vm552_vm7, %v2803_v19 }
0x1525   : > { %v2812_v30 = vld [vmem:[#allocation4 + $0x2] sm:$0xff] }
0x1526   : > { %v2805_v23 = vld [vmem:[#allocation4] sm:$0xff]  ;;  %2813 = vst.msk [vmem:[#allocation5 + $0x8] sm:$0xff] %vm552_vm7, %v2812_v30  ;;  %v4359_v30 = vld [vmem:[%s5662_s13 + $0x70] sm:$0xff]  }
0x1527   : > { %2806 = vst.msk [vmem:[#allocation5] sm:$0xff] %vm552_vm7, %v2805_v23  ;;  %v4360_v23 = vld [vmem:[%s5662_s13 + $0x78] sm:$0xff]  }
0x152d   : > { %v2815_v17 = vld [vmem:[#allocation5 + $0x8] sm:$0xff] }
0x152e   : > { %v2817_v32 = vpack.c.bf16 %v2815_v17, %v2815_v17 }
0x1530   : > { %3779 = vmatprep.mubr.msk.bf16.mxu1 %vm552_vm7, %v2817_v32 }
0x1590   : > { %v2809_v35 = vpop.permute.xlu0 %2808 }
0x1591   : > { %2811 = vst.msk [vmem:[#allocation5] sm:$0xff] %vm1836_vm9, %v2809_v35  ;;  %v4361_v35 = vld [vmem:[%s5664_s15] sm:$0xff]  }
0x1598   : > { %v2814_v33 = vld [vmem:[#allocation5] sm:$0xff] }
0x1599   : > { %v2816_v37 = vpack.c.bf16 %v2814_v33, %v2814_v33  ;;  %v4362_v33 = vld [vmem:[%s5664_s15 + $0x8] sm:$0xff]  }
0x159b   : > { %2957 = vmatmul.mubr.bf16.vlgmr.msra.gmra.mrb[28].mxu1 %v2816_v37  ;;  %v4363_v37 = vld [vmem:[%s5664_s15 + $0x10] sm:$0xff]  }
0x159c   : > { %4099 = vmatprep.mubr.msk.bf16.mxu1 %vm4431_vm3, %v4430_v1  ;;  %4092 = vmatpush3.bf16.msra.mxu1 %v4345_v62 }
0x159d   : > { %4093 = vmatprep.subr.bf16.mxu1 %v4430_v1 }
0x15a0   : > { %4094 = vmatpush3.bf16.msra.mxu1 %v4347_v2 }
0x15a1   : > { %4095 = vmatprep.subr.bf16.mxu1 %v4430_v1 }
0x15a4   : > { %4096 = vmatpush3.bf16.msra.mxu1 %v4349_v4 }
0x15a5   : > { %4097 = vmatprep.subr.bf16.mxu1 %v4430_v1 }
0x15a8   : > { %4098 = vmatpush3.bf16.msra.mxu1 %v4351_v6 }
0x15a9   : > { %4103 = vmatprep.subr.bf16.mxu1 %v4430_v1 }
0x166e   : > { %v2958_v51 = vpop.f32.mrb[28].mxu1 }
0x166f   : > { %v2959_v52 = vadd.f32 %v5135_v7, %v2958_v51  ;;  %v2960_v54 = vpop.f32.mrb[29].mxu1 }
0x1670   : > { %v2961_v55 = vpop.f32.mrb[30].mxu1 }
0x1671   : > { %v2964_v56 = vmax.f32 %v2959_v52, 0.0  ;;  %v2962_v57 = vpop.f32.mrb[31].mxu1  ;;  %v3462_v52 = vld [vmem:[%s5665_s16] sm:$0x1] }
0x1673   : > { %2965 = vst.msk [vmem:[#allocation4 + $0x1] sm:$0xff] %vm552_vm7, %v2964_v56  ;;  %2969 = vrot.lane.b32.xlu1 %v2964_v56, %s5688_s21  ;;  %s5607_s21 = scalar_lea.hbm %s5666_s17, %s3843_s20 }
0x167a   : > { %v2973_v53 = vld [vmem:[#allocation4 + $0x2] sm:$0xff] }
0x167b   : > { %v2966_v58 = vld [vmem:[#allocation4] sm:$0xff]  ;;  %2974 = vst.msk [vmem:[#allocation5 + $0x8] sm:$0xff] %vm552_vm7, %v2973_v53 }
0x167c   : > { %2967 = vst.msk [vmem:[#allocation5] sm:$0xff] %vm552_vm7, %v2966_v58 }
0x1682   : > { %v2976_v0 = vld [vmem:[#allocation5 + $0x8] sm:$0xff] }
0x1683   : > { %v2978_v59 = vpack.c.bf16 %v2976_v0, %v2976_v0 }
0x1685   : > { %3793 = vmatprep.mubr.msk.bf16.mxu0 %vm552_vm7, %v2978_v59 }
0x16e5   : > { %v2970_v60 = vpop.permute.xlu1 %2969 }
0x16e6   : > { %2972 = vst.msk [vmem:[#allocation5] sm:$0xff] %vm1836_vm9, %v2970_v60 }
0x16ed   : > { %v2975_v7 = vld [vmem:[#allocation5] sm:$0xff] }
0x16ee   : > { %v2977_v61 = vpack.c.bf16 %v2975_v7, %v2975_v7 }
0x16f0   : > { %3118 = vmatmul.mubr.bf16.vlgmr.msra.gmra.mrb[32].mxu0 %v2977_v61 }
0x16f1   : > { %4087 = vmatprep.mubr.msk.bf16.mxu0 %vm4431_vm3, %v4430_v1  ;;  %4080 = vmatpush3.bf16.msra.mxu0 %v4346_v63 }
0x16f2   : > { %4081 = vmatprep.subr.bf16.mxu0 %v4430_v1 }
0x16f5   : > { %4082 = vmatpush3.bf16.msra.mxu0 %v4348_v3 }
0x16f6   : > { %4083 = vmatprep.subr.bf16.mxu0 %v4430_v1 }
0x16f9   : > { %4084 = vmatpush3.bf16.msra.mxu0 %v4350_v5 }
0x16fa   : > { %4085 = vmatprep.subr.bf16.mxu0 %v4430_v1 }
0x16fd   : > { %4086 = vmatpush3.bf16.msra.mxu0 %v4352_v8 }
0x16fe   : > { %4127 = vmatprep.subr.bf16.mxu0 %v4430_v1 }
0x17c3   : > { %v3119_v9 = vpop.f32.mrb[32].mxu0 }
0x17c4   : > { %v3120_v10 = vadd.f32 %v5195_v31, %v3119_v9  ;;  %v3121_v11 = vpop.f32.mrb[33].mxu0  ;;  %v4353_v31 = vld [vmem:[%s5662_s13 + $0x40] sm:$0xff]  }
0x17c5   : > { %v3122_v13 = vpop.f32.mrb[34].mxu0 }
0x17c6   : > { %v3125_v14 = vadd.f32 %v3120_v10, %v5436_v29  ;;  %v3123_v15 = vpop.f32.mrb[35].mxu0  ;;  %v4358_v29 = vld [vmem:[%s5662_s13 + $0x68] sm:$0xff]  }
0x17c8   : > { %v3126_v18 = vmul.f32 0.125, %v3125_v14 }
0x17ca   : > { %v3127_v20 = vadd.f32 %v3126_v18, %v5075_v48  ;;  %v4354_v48 = vld [vmem:[%s5662_s13 + $0x48] sm:$0xff]  }
0x17cc   : > { %3128 = vst.msk [vmem:[#allocation4 + $0x1] sm:$0xff] %vm552_vm7, %v3127_v20 }
0x17d3   : > { %v3130_v21 = vld [vmem:[#allocation4 + $0x1] ss:$2 sm:$0xf]  ;;  %v3132_v24 = vld [vmem:[#allocation4 + $0x2] ss:$2 sm:$0xf] }
0x17d4   : > { %v3133_v22 = vmax.f32 %v3130_v21, %v3132_v24 }
0x17d6   : > { %3135 = vst.msk [vmem:[#allocation5] sm:$0xf] %vm3134_vm10, %v3133_v22 }
0x17dd   : > { %v3137_v25 = vld [vmem:[#allocation5] ss:$0 sm:$0xff]  ;;  %v3215_v12 = vld [vmem:[#allocation5 + $0x1] ss:$0 sm:$0xff]  ;;  %v3294_v34 = vld [vmem:[#allocation5 + $0x2] ss:$0 sm:$0xff] }
0x17de   : > { %v3138_v16 = vpack.c.bf16 %v3137_v25, %v3137_v25  ;;  %v3216_v26 = vpack.c.bf16 %v3215_v12, %v3215_v12  ;;  %v3295_v19 = vpack.c.bf16 %v3294_v34, %v3294_v34  ;;  %v3373_v17 = vld [vmem:[#allocation5 + $0x3] ss:$0 sm:$0xff] }
0x17df   : > { %v3374_v32 = vpack.c.bf16 %v3373_v17, %v3373_v17 }
0x17e0   : > { %4088 = vmatmul.mubr.msk.bf16.vlgmr.msra.gmra.mrb[36].mxu0 %vm552_vm7, %v3138_v16  ;;  %4100 = vmatmul.mubr.msk.bf16.vlgmr.msra.gmra.mrb[32].mxu1 %vm552_vm7, %v3216_v26 }
0x17e1   : > { %4104 = vmatpush3.bf16.msra.mxu1 %v4353_v31  ;;  %4111 = vmatprep.mubr.msk.bf16.mxu1 %vm4431_vm3, %v4430_v1 }
0x17e2   : > { %4105 = vmatprep.subr.bf16.mxu1 %v4430_v1  ;;  %4135 = vmatprep.mubr.msk.bf16.mxu0 %vm4431_vm3, %v4430_v1 }
0x17e3   : > { %4128 = vmatpush3.bf16.msra.mxu0 %v4361_v35 }
0x17e4   : > { %4129 = vmatprep.subr.bf16.mxu0 %v4430_v1 }
0x17e5   : > { %4106 = vmatpush3.bf16.msra.mxu1 %v4354_v48 }
0x17e6   : > { %4107 = vmatprep.subr.bf16.mxu1 %v4430_v1 }
0x17e7   : > { %4130 = vmatpush3.bf16.msra.mxu0 %v4362_v33 }
0x17e8   : > { %4131 = vmatprep.subr.bf16.mxu0 %v4430_v1 }
0x17e9   : > { %4108 = vmatpush3.bf16.msra.mxu1 %v4355_v36 }
0x17ea   : > { %4109 = vmatprep.subr.bf16.mxu1 %v4430_v1 }
0x17eb   : > { %4132 = vmatpush3.bf16.msra.mxu0 %v4363_v37 }
0x17ec   : > { %4133 = vmatprep.subr.bf16.mxu0 %v4430_v1 }
0x17ed   : > { %4110 = vmatpush3.bf16.msra.mxu1 %v4356_v27 }
0x17ee   : > { %4115 = vmatprep.subr.bf16.mxu1 %v4430_v1 }
0x17ef   : > { %4134 = vmatpush3.bf16.msra.mxu0 %v4364_v39 }
0x17f0   : > { %4112 = vmatmul.mubr.msk.bf16.vlgmr.msra.gmra.mrb[32].mxu1 %vm552_vm7, %v3295_v19 }
0x17f1   : > { %4116 = vmatpush3.bf16.msra.mxu1 %v4357_v28  ;;  %4123 = vmatprep.mubr.msk.bf16.mxu1 %vm4431_vm3, %v4430_v1 }
0x17f2   : > { %4117 = vmatprep.subr.bf16.mxu1 %v4430_v1 }
0x17f5   : > { %4118 = vmatpush3.bf16.msra.mxu1 %v4358_v29 }
0x17f6   : > { %4119 = vmatprep.subr.bf16.mxu1 %v4430_v1 }
0x17f9   : > { %4120 = vmatpush3.bf16.msra.mxu1 %v4359_v30 }
0x17fa   : > { %4121 = vmatprep.subr.bf16.mxu1 %v4430_v1 }
0x17fd   : > { %4122 = vmatpush3.bf16.msra.mxu1 %v4360_v23 }
0x1800   : > { %4124 = vmatmul.mubr.msk.bf16.vlgmr.msra.gmra.mrb[32].mxu1 %vm552_vm7, %v3374_v32 }
0x18b3   : > { %v3208_v38 = vpop.f32.mrb[36].mxu0 }
0x18b4   : > { %v4089_v40 = vpop.f32.mrb[37].mxu0  ;;  %v3214_v44 = vadd.f32 %v3208_v38, %v3136_v43 }
0x18b5   : > { %v3211_v41 = vpop.f32.mrb[38].mxu0 }
0x18b6   : > { %v4090_v42 = vpop.f32.mrb[39].mxu0 }
0x18d3   : > { %v3445_v45 = vpop.f32.mrb[32].mxu1 }
0x18d4   : > { %v4140_v46 = vadd.f32 %v3445_v45, %v3214_v44  ;;  %v4125_v47 = vpop.f32.mrb[33].mxu1 }
0x18d5   : > { %v3448_v1 = vpop.f32.mrb[34].mxu1 }
0x18d6   : > { %v3452_v49 = vmax.f32 %v4140_v46, 0.0  ;;  %v4126_v50 = vpop.f32.mrb[35].mxu1 }
0x18d8   : > { %v3453_v51 = vpack.c.bf16 %v3452_v49, %v3452_v49 }
0x18da   : > { %4136 = vmatmul.mubr.msk.bf16.vlgmr.msra.gmra.mrb[40].mxu0 %vm552_vm7, %v3453_v51 }
0x19ad   : > { %v3524_v54 = vpop.f32.mrb[40].mxu0 }
0x19ae   : > { %v3525_v55 = vadd.f32 %v3524_v54, %v3462_v52  ;;  %v4137_v56 = vpop.f32.mrb[41].mxu0 }
0x19af   : > { %v3527_v57 = vpop.f32.mrb[42].mxu0 }
0x19b0   : > { %v4138_v53 = vpop.f32.mrb[43].mxu0  ;;  %3531 = vst.msk [vmem:[%s540_s19] sm:$0x1] %vm3530_vm11, %v3525_v55 }
0x19b1   : > { %4378 = shalt.err (!%p4375_p3)
}
0x19b2   : > { %s4379_s22 = scalar_lea.hbm %s5607_s21, 16  ;;  %s4383_s26 = scalar_lea.hbm %s5666_s17, 32 }
0x19b3   : > { %p4380_p4 = scmp.ne.s32.totalorder %s5607_s21, %s4379_s22  ;;  %p4384_p9 = scmp.lt.u32.totalorder %s5607_s21, %s5666_s17 }
0x19b4   : > { %p4385_p10 = scmp.lt.u32.totalorder %s4383_s26, %s4379_s22  ;;  %p4387_p12 = scmp.lt.u32.totalorder %s4379_s22, %s5607_s21 }
0x19b5   : > { %p4381_p7 = pnand %p4380_p4, %p4563_p5 }
0x19b6   : > { %p4386_p11 = por %p4385_p10, %p4384_p9 }
0x19b7   : > { %p4382_p8 = pneg %p4381_p7 }
0x19b8   : > { %p4388_p13 = por %p4387_p12, %p4386_p11 }
0x19ba   : > { %p4389_p0 = pnand %p4388_p13, %p4382_p8 }
0x19bc   : > { %4392 = shalt.err (!%p4389_p0)
}
0x19bd   : > { %4149 = dma.vmem_to_hbm [thread:$0]  (%p4563_p5), %s5609_s23, 16, %s5607_s21, %s3533_s28  }
0x19be PF: > { %p4155_p1 = scmp.ge.s32.totalorder %s4427_s27, 2  ;;  %s3557_s29 = sand.u32 1, %s4415_s24  }
0x19bf   : > { %s3558_s20 = scalar_lea.sflag [#allocation7], %s3557_s29 }
0x19c0   : > { %p4152_p2 = pnand %p4155_p1, %p4567_p6 }
0x19c2   : > { %4410 = dma.done.wait (!%p4152_p2), %s3558_s20, 16  }
0x19c3   : > { %4412 = vsyncadd (!%p4152_p2), %s3558_s20, 4294967280  ;;  %s5691_s27 = sld [smem:[#allocation10_spill]]  ;;  %s5692_s22 = sld [smem:[#allocation9_spill]] }
0x19c4   : > { %s5693_s26 = sld [smem:[#allocation11_spill]]  ;;  %s5694_s24 = smov %s4419_s25 }
0x19c9   : > { %p27_p3 = scmp.ge.s32.totalorder %s5691_s27, 4   ;;  %s5695_s25 = smov %s5692_s22 }
0x19cb   :  { %29 = sbr.rel (!%p27_p3) target bundleno = 7 (0x7), region = 130 }
0x19d2   :  { %3562 = vsyncpa [#allocation7], 1 }
0x19d3   :  { %3564 = vsyncpa [#allocation7 + $0x1], 1 }

</bundles_post_ra>
